<compile_context>
chip_gen: v5e
topology: v5e:2x2
jax: 0.10.0
libtpu: 0.0.40
codegen_flags: <defaults>
</compile_context>

<pallas_src>
import jax
import jax.numpy as jnp
from jax import lax
from jax.experimental import pallas as pl
from jax.experimental.pallas import tpu as pltpu

NUM_GRAPHEMES = 3 + 26   # ['<pad>', '<unk>', '</s>'] + a-z  -> 29
EMB_DIM = 128
HIDDEN = 256


def gru_encoder_kernel(gi_ref, whh_ref, bhn_ref, h_ref):
    """Single-layer GRU recurrence over a full sequence; writes final hidden state.

    gi_ref:  [T, Bp, 3H] f32  gate-ready inputs (emb @ W_ih^T + b_ih + b_hh[r,z])
    whh_ref: [H, 3H]     bf16 (W_hh^T, gate order r|z|n)
    bhn_ref: [1, H]      f32  (b_hh n-part; must stay inside r*(...))
    h_ref:   [Bp, H]     f32  output: final hidden state
    """
    T, Bp, _ = gi_ref.shape
    _, H = h_ref.shape

    whh = whh_ref[...]                                       # bf16, hoisted
    bhn_b = jnp.broadcast_to(bhn_ref[...], (Bp, H))          # hoisted broadcast

    def step(t, h):
        gi = gi_ref[t]                                       # [Bp, 3H] f32
        gh = jnp.dot(h.astype(jnp.bfloat16), whh,
                     preferred_element_type=jnp.float32)     # [Bp, 3H] f32
        # sigmoid(x) == 0.5*tanh(0.5*x)+0.5 : single EUP op per gate.
        r = 0.5 * jnp.tanh(0.5 * (gi[:, 0:H] + gh[:, 0:H])) + 0.5
        z = 0.5 * jnp.tanh(0.5 * (gi[:, H:2 * H] + gh[:, H:2 * H])) + 0.5
        n = jnp.tanh(gi[:, 2 * H:3 * H] + r * (gh[:, 2 * H:3 * H] + bhn_b))
        return n + z * (h - n)                               # == (1-z)*n + z*h

    h = jnp.zeros((Bp, H), jnp.float32)
    if T <= 32:
        # Fully static unroll: static first-axis slices, no per-step index math.
        for t in range(T):
            h = step(t, h)
    else:
        # Bound code size at large T while keeping LLO visibility per group.
        h = lax.fori_loop(0, T, step, h, unroll=8)
    h_ref[...] = h


def init_params(key):
    """Deterministic synthetic parameters matching the PyTorch module's shapes."""
    k = jax.random.split(key, 5)
    scale = 0.08
    emb_table = scale * jax.random.normal(k[0], (NUM_GRAPHEMES, EMB_DIM), jnp.float32)
    w_ih = scale * jax.random.normal(k[1], (3 * HIDDEN, EMB_DIM), jnp.float32)   # PyTorch layout
    w_hh = scale * jax.random.normal(k[2], (3 * HIDDEN, HIDDEN), jnp.float32)    # PyTorch layout
    b_ih = scale * jax.random.normal(k[3], (3 * HIDDEN,), jnp.float32)
    b_hh = scale * jax.random.normal(k[4], (3 * HIDDEN,), jnp.float32)
    return emb_table, w_ih, w_hh, b_ih, b_hh


def g2p_forward(x_ids, params):
    """Equivalent of G2P.forward(x): returns GRU final hidden, shape [1, B, H]."""
    emb_table, w_ih, w_hh, b_ih, b_hh = params
    B, T = x_ids.shape
    H = HIDDEN

    # Pad batch to a multiple of 16 (bf16 MXU LHS packs two rows per sublane).
    Bp = max(16, ((B + 15) // 16) * 16)

    # Fold biases: b_ih (all gates) + b_hh's r/z parts go into gi; only b_hn
    # remains on the recurrent path (PyTorch n-gate structure).
    bgi = b_ih.astype(jnp.float32).at[:2 * H].add(b_hh[:2 * H].astype(jnp.float32))
    bhn = b_hh[2 * H:3 * H].astype(jnp.float32)

    # Fold the embedding table into the input projection: one tiny [29, 3H]
    # table computed once; the whole per-token input projection becomes a gather.
    gi_table = emb_table.astype(jnp.float32) @ w_ih.T.astype(jnp.float32) + bgi[None, :]

    # Transpose the tiny int id matrix (not float data) -> time-major gather.
    # Dropout is identity in eval/inference mode. Padded rows use <pad> id 0.
    x_tm = jnp.transpose(x_ids)                              # [T, B]
    x_tm = jnp.pad(x_tm, ((0, 0), (0, Bp - B)))              # [T, Bp]
    gi = jnp.take(gi_table, x_tm, axis=0)                    # [T, Bp, 3H] f32

    whh_t = jnp.asarray(w_hh.T, jnp.bfloat16)                # [H, 3H]

    # Size the scoped-VMEM limit from the actual footprint (matters on v5e's
    # small default scoped limit); clamp to a value safe on all generations.
    need = (T * Bp * 3 * H * 4) + (H * 3 * H * 2) + (H * 4) + (Bp * H * 4)
    vmem_limit = int(min(max(need + (8 << 20), 32 << 20), 100 << 20))

    h_pad = pl.pallas_call(
        gru_encoder_kernel,
        out_shape=jax.ShapeDtypeStruct((Bp, H), jnp.float32),
        in_specs=[pl.BlockSpec(memory_space=pltpu.MemorySpace.VMEM)] * 3,
        out_specs=pl.BlockSpec(memory_space=pltpu.MemorySpace.VMEM),
        compiler_params=pltpu.CompilerParams(vmem_limit_bytes=vmem_limit),
    )(
        gi,
        whh_t,
        bhn[None, :],      # [1, H]
    )
    return h_pad[None, :B, :]                                # [1, B, H] like nn.GRU hidden


def g2p_forward_ref(x_ids, params):
    """Pure-JAX f32 reference of the same forward pass (for validation)."""
    emb_table, w_ih, w_hh, b_ih, b_hh = params
    embedded = jnp.take(emb_table, x_ids, axis=0)            # [B, T, E]
    B, T, _ = embedded.shape
    H = HIDDEN

    def step(h, x_t):
        gi = x_t @ w_ih.T + b_ih
        gh = h @ w_hh.T + b_hh
        r = jax.nn.sigmoid(gi[:, 0:H] + gh[:, 0:H])
        z = jax.nn.sigmoid(gi[:, H:2 * H] + gh[:, H:2 * H])
        n = jnp.tanh(gi[:, 2 * H:3 * H] + r * gh[:, 2 * H:3 * H])
        h_new = (1.0 - z) * n + z * h
        return h_new, None

    h0 = jnp.zeros((B, H), jnp.float32)
    h_final, _ = lax.scan(step, h0, jnp.transpose(embedded, (1, 0, 2)))
    return h_final[None]


if __name__ == "__main__":
    key = jax.random.PRNGKey(0)
    pkey, xkey = jax.random.split(key)
    params = init_params(pkey)

    # Small example: batch=2, seq_len=8 grapheme token ids.
    B, T = 2, 8
    x_ids = jax.random.randint(xkey, (B, T), 0, NUM_GRAPHEMES, dtype=jnp.int32)

    hidden = jax.block_until_ready(g2p_forward(x_ids, params))
    assert hidden.shape == (1, B, HIDDEN), hidden.shape

    ref = jax.block_until_ready(g2p_forward_ref(x_ids, params))
    # Recurrent matmul operands are bf16 vs f32 reference -> looser tolerance.
    assert jnp.allclose(hidden, ref, atol=2e-2, rtol=2e-2), "mismatch vs reference"

    # TODO(synk): predict()/__call__ (spacy tagging, heteronym lookup, greedy
    # decode loop) are host-side string logic, not kernel work — not ported.
    print("KERNEL_OK")
</pallas_src>

<mosaic_0001>
module attributes {stable_mosaic.version = 11 : i64} {
  func.func @gru_encoder_kernel(%arg0: memref<8x16x768xf32, #tpu.memory_space<vmem>>, %arg1: memref<256x768xbf16, #tpu.memory_space<vmem>>, %arg2: memref<1x256xf32, #tpu.memory_space<vmem>>, %arg3: memref<16x256xf32, #tpu.memory_space<vmem>>) attributes {dimension_semantics = [], scalar_prefetch = 0 : i64, scratch_operands = 0 : i64, tpu.core_type = #tpu.core_type<tc>} {
    %c0 = arith.constant 0 : index
    %c0_0 = arith.constant 0 : index
    %0 = vector.load %arg1[%c0, %c0_0] : memref<256x768xbf16, #tpu.memory_space<vmem>>, vector<256x768xbf16>
    %c0_1 = arith.constant 0 : index
    %c0_2 = arith.constant 0 : index
    %1 = vector.load %arg2[%c0_1, %c0_2] : memref<1x256xf32, #tpu.memory_space<vmem>>, vector<1x256xf32>
    %2 = vector.shape_cast %1 : vector<1x256xf32> to vector<1x256xf32>
    %3 = vector.broadcast %2 : vector<1x256xf32> to vector<16x256xf32>
    %cst = arith.constant 0.000000e+00 : f32
    %4 = vector.broadcast %cst : f32 to vector<16x256xf32>
    %c0_3 = arith.constant 0 : index
    %c0_4 = arith.constant 0 : index
    %c0_5 = arith.constant 0 : index
    %5 = vector.load %arg0[%c0_3, %c0_4, %c0_5] : memref<8x16x768xf32, #tpu.memory_space<vmem>>, vector<1x16x768xf32>
    %6 = vector.shape_cast %5 : vector<1x16x768xf32> to vector<16x768xf32>
    %7 = arith.truncf %4 : vector<16x256xf32> to vector<16x256xbf16>
    %cst_6 = arith.constant dense<0.000000e+00> : vector<16x768xf32>
    %8 = tpu.matmul %7, %0, %cst_6 {dimension_numbers = #tpu.dot_dimension_numbers<[1], [0], [0], [1], [0, 0, 1, 1], [], []>} : vector<16x256xbf16>, vector<256x768xbf16>, vector<16x768xf32> -> vector<16x768xf32>
    %9 = vector.extract_strided_slice %6 {offsets = [0, 0], sizes = [16, 256], strides = [1, 1]} : vector<16x768xf32> to vector<16x256xf32>
    %10 = vector.extract_strided_slice %8 {offsets = [0, 0], sizes = [16, 256], strides = [1, 1]} : vector<16x768xf32> to vector<16x256xf32>
    %11 = arith.addf %9, %10 : vector<16x256xf32>
    %cst_7 = arith.constant 5.000000e-01 : f32
    %12 = vector.broadcast %cst_7 : f32 to vector<16x256xf32>
    %13 = arith.mulf %12, %11 : vector<16x256xf32>
    %14 = math.tanh %13 : vector<16x256xf32>
    %cst_8 = arith.constant 5.000000e-01 : f32
    %15 = vector.broadcast %cst_8 : f32 to vector<16x256xf32>
    %16 = arith.mulf %15, %14 : vector<16x256xf32>
    %cst_9 = arith.constant 5.000000e-01 : f32
    %17 = vector.broadcast %cst_9 : f32 to vector<16x256xf32>
    %18 = arith.addf %16, %17 : vector<16x256xf32>
    %19 = vector.extract_strided_slice %6 {offsets = [0, 256], sizes = [16, 256], strides = [1, 1]} : vector<16x768xf32> to vector<16x256xf32>
    %20 = vector.extract_strided_slice %8 {offsets = [0, 256], sizes = [16, 256], strides = [1, 1]} : vector<16x768xf32> to vector<16x256xf32>
    %21 = arith.addf %19, %20 : vector<16x256xf32>
    %cst_10 = arith.constant 5.000000e-01 : f32
    %22 = vector.broadcast %cst_10 : f32 to vector<16x256xf32>
    %23 = arith.mulf %22, %21 : vector<16x256xf32>
    %24 = math.tanh %23 : vector<16x256xf32>
    %cst_11 = arith.constant 5.000000e-01 : f32
    %25 = vector.broadcast %cst_11 : f32 to vector<16x256xf32>
    %26 = arith.mulf %25, %24 : vector<16x256xf32>
    %cst_12 = arith.constant 5.000000e-01 : f32
    %27 = vector.broadcast %cst_12 : f32 to vector<16x256xf32>
    %28 = arith.addf %26, %27 : vector<16x256xf32>
    %29 = vector.extract_strided_slice %6 {offsets = [0, 512], sizes = [16, 256], strides = [1, 1]} : vector<16x768xf32> to vector<16x256xf32>
    %30 = vector.extract_strided_slice %8 {offsets = [0, 512], sizes = [16, 256], strides = [1, 1]} : vector<16x768xf32> to vector<16x256xf32>
    %31 = arith.addf %30, %3 : vector<16x256xf32>
    %32 = arith.mulf %18, %31 : vector<16x256xf32>
    %33 = arith.addf %29, %32 : vector<16x256xf32>
    %34 = math.tanh %33 : vector<16x256xf32>
    %35 = arith.subf %4, %34 : vector<16x256xf32>
    %36 = arith.mulf %28, %35 : vector<16x256xf32>
    %37 = arith.addf %34, %36 : vector<16x256xf32>
    %c1 = arith.constant 1 : index
    %c0_13 = arith.constant 0 : index
    %c0_14 = arith.constant 0 : index
    %38 = vector.load %arg0[%c1, %c0_13, %c0_14] : memref<8x16x768xf32, #tpu.memory_space<vmem>>, vector<1x16x768xf32>
    %39 = vector.shape_cast %38 : vector<1x16x768xf32> to vector<16x768xf32>
    %40 = arith.truncf %37 : vector<16x256xf32> to vector<16x256xbf16>
    %cst_15 = arith.constant dense<0.000000e+00> : vector<16x768xf32>
    %41 = tpu.matmul %40, %0, %cst_15 {dimension_numbers = #tpu.dot_dimension_numbers<[1], [0], [0], [1], [0, 0, 1, 1], [], []>} : vector<16x256xbf16>, vector<256x768xbf16>, vector<16x768xf32> -> vector<16x768xf32>
    %42 = vector.extract_strided_slice %39 {offsets = [0, 0], sizes = [16, 256], strides = [1, 1]} : vector<16x768xf32> to vector<16x256xf32>
    %43 = vector.extract_strided_slice %41 {offsets = [0, 0], sizes = [16, 256], strides = [1, 1]} : vector<16x768xf32> to vector<16x256xf32>
    %44 = arith.addf %42, %43 : vector<16x256xf32>
    %cst_16 = arith.constant 5.000000e-01 : f32
    %45 = vector.broadcast %cst_16 : f32 to vector<16x256xf32>
    %46 = arith.mulf %45, %44 : vector<16x256xf32>
    %47 = math.tanh %46 : vector<16x256xf32>
    %cst_17 = arith.constant 5.000000e-01 : f32
    %48 = vector.broadcast %cst_17 : f32 to vector<16x256xf32>
    %49 = arith.mulf %48, %47 : vector<16x256xf32>
    %cst_18 = arith.constant 5.000000e-01 : f32
    %50 = vector.broadcast %cst_18 : f32 to vector<16x256xf32>
    %51 = arith.addf %49, %50 : vector<16x256xf32>
    %52 = vector.extract_strided_slice %39 {offsets = [0, 256], sizes = [16, 256], strides = [1, 1]} : vector<16x768xf32> to vector<16x256xf32>
    %53 = vector.extract_strided_slice %41 {offsets = [0, 256], sizes = [16, 256], strides = [1, 1]} : vector<16x768xf32> to vector<16x256xf32>
    %54 = arith.addf %52, %53 : vector<16x256xf32>
    %cst_19 = arith.constant 5.000000e-01 : f32
    %55 = vector.broadcast %cst_19 : f32 to vector<16x256xf32>
    %56 = arith.mulf %55, %54 : vector<16x256xf32>
    %57 = math.tanh %56 : vector<16x256xf32>
    %cst_20 = arith.constant 5.000000e-01 : f32
    %58 = vector.broadcast %cst_20 : f32 to vector<16x256xf32>
    %59 = arith.mulf %58, %57 : vector<16x256xf32>
    %cst_21 = arith.constant 5.000000e-01 : f32
    %60 = vector.broadcast %cst_21 : f32 to vector<16x256xf32>
    %61 = arith.addf %59, %60 : vector<16x256xf32>
    %62 = vector.extract_strided_slice %39 {offsets = [0, 512], sizes = [16, 256], strides = [1, 1]} : vector<16x768xf32> to vector<16x256xf32>
    %63 = vector.extract_strided_slice %41 {offsets = [0, 512], sizes = [16, 256], strides = [1, 1]} : vector<16x768xf32> to vector<16x256xf32>
    %64 = arith.addf %63, %3 : vector<16x256xf32>
    %65 = arith.mulf %51, %64 : vector<16x256xf32>
    %66 = arith.addf %62, %65 : vector<16x256xf32>
    %67 = math.tanh %66 : vector<16x256xf32>
    %68 = arith.subf %37, %67 : vector<16x256xf32>
    %69 = arith.mulf %61, %68 : vector<16x256xf32>
    %70 = arith.addf %67, %69 : vector<16x256xf32>
    %c2 = arith.constant 2 : index
    %c0_22 = arith.constant 0 : index
    %c0_23 = arith.constant 0 : index
    %71 = vector.load %arg0[%c2, %c0_22, %c0_23] : memref<8x16x768xf32, #tpu.memory_space<vmem>>, vector<1x16x768xf32>
    %72 = vector.shape_cast %71 : vector<1x16x768xf32> to vector<16x768xf32>
    %73 = arith.truncf %70 : vector<16x256xf32> to vector<16x256xbf16>
    %cst_24 = arith.constant dense<0.000000e+00> : vector<16x768xf32>
    %74 = tpu.matmul %73, %0, %cst_24 {dimension_numbers = #tpu.dot_dimension_numbers<[1], [0], [0], [1], [0, 0, 1, 1], [], []>} : vector<16x256xbf16>, vector<256x768xbf16>, vector<16x768xf32> -> vector<16x768xf32>
    %75 = vector.extract_strided_slice %72 {offsets = [0, 0], sizes = [16, 256], strides = [1, 1]} : vector<16x768xf32> to vector<16x256xf32>
    %76 = vector.extract_strided_slice %74 {offsets = [0, 0], sizes = [16, 256], strides = [1, 1]} : vector<16x768xf32> to vector<16x256xf32>
    %77 = arith.addf %75, %76 : vector<16x256xf32>
    %cst_25 = arith.constant 5.000000e-01 : f32
    %78 = vector.broadcast %cst_25 : f32 to vector<16x256xf32>
    %79 = arith.mulf %78, %77 : vector<16x256xf32>
    %80 = math.tanh %79 : vector<16x256xf32>
    %cst_26 = arith.constant 5.000000e-01 : f32
    %81 = vector.broadcast %cst_26 : f32 to vector<16x256xf32>
    %82 = arith.mulf %81, %80 : vector<16x256xf32>
    %cst_27 = arith.constant 5.000000e-01 : f32
    %83 = vector.broadcast %cst_27 : f32 to vector<16x256xf32>
    %84 = arith.addf %82, %83 : vector<16x256xf32>
    %85 = vector.extract_strided_slice %72 {offsets = [0, 256], sizes = [16, 256], strides = [1, 1]} : vector<16x768xf32> to vector<16x256xf32>
    %86 = vector.extract_strided_slice %74 {offsets = [0, 256], sizes = [16, 256], strides = [1, 1]} : vector<16x768xf32> to vector<16x256xf32>
    %87 = arith.addf %85, %86 : vector<16x256xf32>
    %cst_28 = arith.constant 5.000000e-01 : f32
    %88 = vector.broadcast %cst_28 : f32 to vector<16x256xf32>
    %89 = arith.mulf %88, %87 : vector<16x256xf32>
    %90 = math.tanh %89 : vector<16x256xf32>
    %cst_29 = arith.constant 5.000000e-01 : f32
    %91 = vector.broadcast %cst_29 : f32 to vector<16x256xf32>
    %92 = arith.mulf %91, %90 : vector<16x256xf32>
    %cst_30 = arith.constant 5.000000e-01 : f32
    %93 = vector.broadcast %cst_30 : f32 to vector<16x256xf32>
    %94 = arith.addf %92, %93 : vector<16x256xf32>
    %95 = vector.extract_strided_slice %72 {offsets = [0, 512], sizes = [16, 256], strides = [1, 1]} : vector<16x768xf32> to vector<16x256xf32>
    %96 = vector.extract_strided_slice %74 {offsets = [0, 512], sizes = [16, 256], strides = [1, 1]} : vector<16x768xf32> to vector<16x256xf32>
    %97 = arith.addf %96, %3 : vector<16x256xf32>
    %98 = arith.mulf %84, %97 : vector<16x256xf32>
    %99 = arith.addf %95, %98 : vector<16x256xf32>
    %100 = math.tanh %99 : vector<16x256xf32>
    %101 = arith.subf %70, %100 : vector<16x256xf32>
    %102 = arith.mulf %94, %101 : vector<16x256xf32>
    %103 = arith.addf %100, %102 : vector<16x256xf32>
    %c3 = arith.constant 3 : index
    %c0_31 = arith.constant 0 : index
    %c0_32 = arith.constant 0 : index
    %104 = vector.load %arg0[%c3, %c0_31, %c0_32] : memref<8x16x768xf32, #tpu.memory_space<vmem>>, vector<1x16x768xf32>
    %105 = vector.shape_cast %104 : vector<1x16x768xf32> to vector<16x768xf32>
    %106 = arith.truncf %103 : vector<16x256xf32> to vector<16x256xbf16>
    %cst_33 = arith.constant dense<0.000000e+00> : vector<16x768xf32>
    %107 = tpu.matmul %106, %0, %cst_33 {dimension_numbers = #tpu.dot_dimension_numbers<[1], [0], [0], [1], [0, 0, 1, 1], [], []>} : vector<16x256xbf16>, vector<256x768xbf16>, vector<16x768xf32> -> vector<16x768xf32>
    %108 = vector.extract_strided_slice %105 {offsets = [0, 0], sizes = [16, 256], strides = [1, 1]} : vector<16x768xf32> to vector<16x256xf32>
    %109 = vector.extract_strided_slice %107 {offsets = [0, 0], sizes = [16, 256], strides = [1, 1]} : vector<16x768xf32> to vector<16x256xf32>
    %110 = arith.addf %108, %109 : vector<16x256xf32>
    %cst_34 = arith.constant 5.000000e-01 : f32
    %111 = vector.broadcast %cst_34 : f32 to vector<16x256xf32>
    %112 = arith.mulf %111, %110 : vector<16x256xf32>
    %113 = math.tanh %112 : vector<16x256xf32>
    %cst_35 = arith.constant 5.000000e-01 : f32
    %114 = vector.broadcast %cst_35 : f32 to vector<16x256xf32>
    %115 = arith.mulf %114, %113 : vector<16x256xf32>
    %cst_36 = arith.constant 5.000000e-01 : f32
    %116 = vector.broadcast %cst_36 : f32 to vector<16x256xf32>
    %117 = arith.addf %115, %116 : vector<16x256xf32>
    %118 = vector.extract_strided_slice %105 {offsets = [0, 256], sizes = [16, 256], strides = [1, 1]} : vector<16x768xf32> to vector<16x256xf32>
    %119 = vector.extract_strided_slice %107 {offsets = [0, 256], sizes = [16, 256], strides = [1, 1]} : vector<16x768xf32> to vector<16x256xf32>
    %120 = arith.addf %118, %119 : vector<16x256xf32>
    %cst_37 = arith.constant 5.000000e-01 : f32
    %121 = vector.broadcast %cst_37 : f32 to vector<16x256xf32>
    %122 = arith.mulf %121, %120 : vector<16x256xf32>
    %123 = math.tanh %122 : vector<16x256xf32>
    %cst_38 = arith.constant 5.000000e-01 : f32
    %124 = vector.broadcast %cst_38 : f32 to vector<16x256xf32>
    %125 = arith.mulf %124, %123 : vector<16x256xf32>
    %cst_39 = arith.constant 5.000000e-01 : f32
    %126 = vector.broadcast %cst_39 : f32 to vector<16x256xf32>
    %127 = arith.addf %125, %126 : vector<16x256xf32>
    %128 = vector.extract_strided_slice %105 {offsets = [0, 512], sizes = [16, 256], strides = [1, 1]} : vector<16x768xf32> to vector<16x256xf32>
    %129 = vector.extract_strided_slice %107 {offsets = [0, 512], sizes = [16, 256], strides = [1, 1]} : vector<16x768xf32> to vector<16x256xf32>
    %130 = arith.addf %129, %3 : vector<16x256xf32>
    %131 = arith.mulf %117, %130 : vector<16x256xf32>
    %132 = arith.addf %128, %131 : vector<16x256xf32>
    %133 = math.tanh %132 : vector<16x256xf32>
    %134 = arith.subf %103, %133 : vector<16x256xf32>
    %135 = arith.mulf %127, %134 : vector<16x256xf32>
    %136 = arith.addf %133, %135 : vector<16x256xf32>
    %c4 = arith.constant 4 : index
    %c0_40 = arith.constant 0 : index
    %c0_41 = arith.constant 0 : index
    %137 = vector.load %arg0[%c4, %c0_40, %c0_41] : memref<8x16x768xf32, #tpu.memory_space<vmem>>, vector<1x16x768xf32>
    %138 = vector.shape_cast %137 : vector<1x16x768xf32> to vector<16x768xf32>
    %139 = arith.truncf %136 : vector<16x256xf32> to vector<16x256xbf16>
    %cst_42 = arith.constant dense<0.000000e+00> : vector<16x768xf32>
    %140 = tpu.matmul %139, %0, %cst_42 {dimension_numbers = #tpu.dot_dimension_numbers<[1], [0], [0], [1], [0, 0, 1, 1], [], []>} : vector<16x256xbf16>, vector<256x768xbf16>, vector<16x768xf32> -> vector<16x768xf32>
    %141 = vector.extract_strided_slice %138 {offsets = [0, 0], sizes = [16, 256], strides = [1, 1]} : vector<16x768xf32> to vector<16x256xf32>
    %142 = vector.extract_strided_slice %140 {offsets = [0, 0], sizes = [16, 256], strides = [1, 1]} : vector<16x768xf32> to vector<16x256xf32>
    %143 = arith.addf %141, %142 : vector<16x256xf32>
    %cst_43 = arith.constant 5.000000e-01 : f32
    %144 = vector.broadcast %cst_43 : f32 to vector<16x256xf32>
    %145 = arith.mulf %144, %143 : vector<16x256xf32>
    %146 = math.tanh %145 : vector<16x256xf32>
    %cst_44 = arith.constant 5.000000e-01 : f32
    %147 = vector.broadcast %cst_44 : f32 to vector<16x256xf32>
    %148 = arith.mulf %147, %146 : vector<16x256xf32>
    %cst_45 = arith.constant 5.000000e-01 : f32
    %149 = vector.broadcast %cst_45 : f32 to vector<16x256xf32>
    %150 = arith.addf %148, %149 : vector<16x256xf32>
    %151 = vector.extract_strided_slice %138 {offsets = [0, 256], sizes = [16, 256], strides = [1, 1]} : vector<16x768xf32> to vector<16x256xf32>
    %152 = vector.extract_strided_slice %140 {offsets = [0, 256], sizes = [16, 256], strides = [1, 1]} : vector<16x768xf32> to vector<16x256xf32>
    %153 = arith.addf %151, %152 : vector<16x256xf32>
    %cst_46 = arith.constant 5.000000e-01 : f32
    %154 = vector.broadcast %cst_46 : f32 to vector<16x256xf32>
    %155 = arith.mulf %154, %153 : vector<16x256xf32>
    %156 = math.tanh %155 : vector<16x256xf32>
    %cst_47 = arith.constant 5.000000e-01 : f32
    %157 = vector.broadcast %cst_47 : f32 to vector<16x256xf32>
    %158 = arith.mulf %157, %156 : vector<16x256xf32>
    %cst_48 = arith.constant 5.000000e-01 : f32
    %159 = vector.broadcast %cst_48 : f32 to vector<16x256xf32>
    %160 = arith.addf %158, %159 : vector<16x256xf32>
    %161 = vector.extract_strided_slice %138 {offsets = [0, 512], sizes = [16, 256], strides = [1, 1]} : vector<16x768xf32> to vector<16x256xf32>
    %162 = vector.extract_strided_slice %140 {offsets = [0, 512], sizes = [16, 256], strides = [1, 1]} : vector<16x768xf32> to vector<16x256xf32>
    %163 = arith.addf %162, %3 : vector<16x256xf32>
    %164 = arith.mulf %150, %163 : vector<16x256xf32>
    %165 = arith.addf %161, %164 : vector<16x256xf32>
    %166 = math.tanh %165 : vector<16x256xf32>
    %167 = arith.subf %136, %166 : vector<16x256xf32>
    %168 = arith.mulf %160, %167 : vector<16x256xf32>
    %169 = arith.addf %166, %168 : vector<16x256xf32>
    %c5 = arith.constant 5 : index
    %c0_49 = arith.constant 0 : index
    %c0_50 = arith.constant 0 : index
    %170 = vector.load %arg0[%c5, %c0_49, %c0_50] : memref<8x16x768xf32, #tpu.memory_space<vmem>>, vector<1x16x768xf32>
    %171 = vector.shape_cast %170 : vector<1x16x768xf32> to vector<16x768xf32>
    %172 = arith.truncf %169 : vector<16x256xf32> to vector<16x256xbf16>
    %cst_51 = arith.constant dense<0.000000e+00> : vector<16x768xf32>
    %173 = tpu.matmul %172, %0, %cst_51 {dimension_numbers = #tpu.dot_dimension_numbers<[1], [0], [0], [1], [0, 0, 1, 1], [], []>} : vector<16x256xbf16>, vector<256x768xbf16>, vector<16x768xf32> -> vector<16x768xf32>
    %174 = vector.extract_strided_slice %171 {offsets = [0, 0], sizes = [16, 256], strides = [1, 1]} : vector<16x768xf32> to vector<16x256xf32>
    %175 = vector.extract_strided_slice %173 {offsets = [0, 0], sizes = [16, 256], strides = [1, 1]} : vector<16x768xf32> to vector<16x256xf32>
    %176 = arith.addf %174, %175 : vector<16x256xf32>
    %cst_52 = arith.constant 5.000000e-01 : f32
    %177 = vector.broadcast %cst_52 : f32 to vector<16x256xf32>
    %178 = arith.mulf %177, %176 : vector<16x256xf32>
    %179 = math.tanh %178 : vector<16x256xf32>
    %cst_53 = arith.constant 5.000000e-01 : f32
    %180 = vector.broadcast %cst_53 : f32 to vector<16x256xf32>
    %181 = arith.mulf %180, %179 : vector<16x256xf32>
    %cst_54 = arith.constant 5.000000e-01 : f32
    %182 = vector.broadcast %cst_54 : f32 to vector<16x256xf32>
    %183 = arith.addf %181, %182 : vector<16x256xf32>
    %184 = vector.extract_strided_slice %171 {offsets = [0, 256], sizes = [16, 256], strides = [1, 1]} : vector<16x768xf32> to vector<16x256xf32>
    %185 = vector.extract_strided_slice %173 {offsets = [0, 256], sizes = [16, 256], strides = [1, 1]} : vector<16x768xf32> to vector<16x256xf32>
    %186 = arith.addf %184, %185 : vector<16x256xf32>
    %cst_55 = arith.constant 5.000000e-01 : f32
    %187 = vector.broadcast %cst_55 : f32 to vector<16x256xf32>
    %188 = arith.mulf %187, %186 : vector<16x256xf32>
    %189 = math.tanh %188 : vector<16x256xf32>
    %cst_56 = arith.constant 5.000000e-01 : f32
    %190 = vector.broadcast %cst_56 : f32 to vector<16x256xf32>
    %191 = arith.mulf %190, %189 : vector<16x256xf32>
    %cst_57 = arith.constant 5.000000e-01 : f32
    %192 = vector.broadcast %cst_57 : f32 to vector<16x256xf32>
    %193 = arith.addf %191, %192 : vector<16x256xf32>
    %194 = vector.extract_strided_slice %171 {offsets = [0, 512], sizes = [16, 256], strides = [1, 1]} : vector<16x768xf32> to vector<16x256xf32>
    %195 = vector.extract_strided_slice %173 {offsets = [0, 512], sizes = [16, 256], strides = [1, 1]} : vector<16x768xf32> to vector<16x256xf32>
    %196 = arith.addf %195, %3 : vector<16x256xf32>
    %197 = arith.mulf %183, %196 : vector<16x256xf32>
    %198 = arith.addf %194, %197 : vector<16x256xf32>
    %199 = math.tanh %198 : vector<16x256xf32>
    %200 = arith.subf %169, %199 : vector<16x256xf32>
    %201 = arith.mulf %193, %200 : vector<16x256xf32>
    %202 = arith.addf %199, %201 : vector<16x256xf32>
    %c6 = arith.constant 6 : index
    %c0_58 = arith.constant 0 : index
    %c0_59 = arith.constant 0 : index
    %203 = vector.load %arg0[%c6, %c0_58, %c0_59] : memref<8x16x768xf32, #tpu.memory_space<vmem>>, vector<1x16x768xf32>
    %204 = vector.shape_cast %203 : vector<1x16x768xf32> to vector<16x768xf32>
    %205 = arith.truncf %202 : vector<16x256xf32> to vector<16x256xbf16>
    %cst_60 = arith.constant dense<0.000000e+00> : vector<16x768xf32>
    %206 = tpu.matmul %205, %0, %cst_60 {dimension_numbers = #tpu.dot_dimension_numbers<[1], [0], [0], [1], [0, 0, 1, 1], [], []>} : vector<16x256xbf16>, vector<256x768xbf16>, vector<16x768xf32> -> vector<16x768xf32>
    %207 = vector.extract_strided_slice %204 {offsets = [0, 0], sizes = [16, 256], strides = [1, 1]} : vector<16x768xf32> to vector<16x256xf32>
    %208 = vector.extract_strided_slice %206 {offsets = [0, 0], sizes = [16, 256], strides = [1, 1]} : vector<16x768xf32> to vector<16x256xf32>
    %209 = arith.addf %207, %208 : vector<16x256xf32>
    %cst_61 = arith.constant 5.000000e-01 : f32
    %210 = vector.broadcast %cst_61 : f32 to vector<16x256xf32>
    %211 = arith.mulf %210, %209 : vector<16x256xf32>
    %212 = math.tanh %211 : vector<16x256xf32>
    %cst_62 = arith.constant 5.000000e-01 : f32
    %213 = vector.broadcast %cst_62 : f32 to vector<16x256xf32>
    %214 = arith.mulf %213, %212 : vector<16x256xf32>
    %cst_63 = arith.constant 5.000000e-01 : f32
    %215 = vector.broadcast %cst_63 : f32 to vector<16x256xf32>
    %216 = arith.addf %214, %215 : vector<16x256xf32>
    %217 = vector.extract_strided_slice %204 {offsets = [0, 256], sizes = [16, 256], strides = [1, 1]} : vector<16x768xf32> to vector<16x256xf32>
    %218 = vector.extract_strided_slice %206 {offsets = [0, 256], sizes = [16, 256], strides = [1, 1]} : vector<16x768xf32> to vector<16x256xf32>
    %219 = arith.addf %217, %218 : vector<16x256xf32>
    %cst_64 = arith.constant 5.000000e-01 : f32
    %220 = vector.broadcast %cst_64 : f32 to vector<16x256xf32>
    %221 = arith.mulf %220, %219 : vector<16x256xf32>
    %222 = math.tanh %221 : vector<16x256xf32>
    %cst_65 = arith.constant 5.000000e-01 : f32
    %223 = vector.broadcast %cst_65 : f32 to vector<16x256xf32>
    %224 = arith.mulf %223, %222 : vector<16x256xf32>
    %cst_66 = arith.constant 5.000000e-01 : f32
    %225 = vector.broadcast %cst_66 : f32 to vector<16x256xf32>
    %226 = arith.addf %224, %225 : vector<16x256xf32>
    %227 = vector.extract_strided_slice %204 {offsets = [0, 512], sizes = [16, 256], strides = [1, 1]} : vector<16x768xf32> to vector<16x256xf32>
    %228 = vector.extract_strided_slice %206 {offsets = [0, 512], sizes = [16, 256], strides = [1, 1]} : vector<16x768xf32> to vector<16x256xf32>
    %229 = arith.addf %228, %3 : vector<16x256xf32>
    %230 = arith.mulf %216, %229 : vector<16x256xf32>
    %231 = arith.addf %227, %230 : vector<16x256xf32>
    %232 = math.tanh %231 : vector<16x256xf32>
    %233 = arith.subf %202, %232 : vector<16x256xf32>
    %234 = arith.mulf %226, %233 : vector<16x256xf32>
    %235 = arith.addf %232, %234 : vector<16x256xf32>
    %c7 = arith.constant 7 : index
    %c0_67 = arith.constant 0 : index
    %c0_68 = arith.constant 0 : index
    %236 = vector.load %arg0[%c7, %c0_67, %c0_68] : memref<8x16x768xf32, #tpu.memory_space<vmem>>, vector<1x16x768xf32>
    %237 = vector.shape_cast %236 : vector<1x16x768xf32> to vector<16x768xf32>
    %238 = arith.truncf %235 : vector<16x256xf32> to vector<16x256xbf16>
    %cst_69 = arith.constant dense<0.000000e+00> : vector<16x768xf32>
    %239 = tpu.matmul %238, %0, %cst_69 {dimension_numbers = #tpu.dot_dimension_numbers<[1], [0], [0], [1], [0, 0, 1, 1], [], []>} : vector<16x256xbf16>, vector<256x768xbf16>, vector<16x768xf32> -> vector<16x768xf32>
    %240 = vector.extract_strided_slice %237 {offsets = [0, 0], sizes = [16, 256], strides = [1, 1]} : vector<16x768xf32> to vector<16x256xf32>
    %241 = vector.extract_strided_slice %239 {offsets = [0, 0], sizes = [16, 256], strides = [1, 1]} : vector<16x768xf32> to vector<16x256xf32>
    %242 = arith.addf %240, %241 : vector<16x256xf32>
    %cst_70 = arith.constant 5.000000e-01 : f32
    %243 = vector.broadcast %cst_70 : f32 to vector<16x256xf32>
    %244 = arith.mulf %243, %242 : vector<16x256xf32>
    %245 = math.tanh %244 : vector<16x256xf32>
    %cst_71 = arith.constant 5.000000e-01 : f32
    %246 = vector.broadcast %cst_71 : f32 to vector<16x256xf32>
    %247 = arith.mulf %246, %245 : vector<16x256xf32>
    %cst_72 = arith.constant 5.000000e-01 : f32
    %248 = vector.broadcast %cst_72 : f32 to vector<16x256xf32>
    %249 = arith.addf %247, %248 : vector<16x256xf32>
    %250 = vector.extract_strided_slice %237 {offsets = [0, 256], sizes = [16, 256], strides = [1, 1]} : vector<16x768xf32> to vector<16x256xf32>
    %251 = vector.extract_strided_slice %239 {offsets = [0, 256], sizes = [16, 256], strides = [1, 1]} : vector<16x768xf32> to vector<16x256xf32>
    %252 = arith.addf %250, %251 : vector<16x256xf32>
    %cst_73 = arith.constant 5.000000e-01 : f32
    %253 = vector.broadcast %cst_73 : f32 to vector<16x256xf32>
    %254 = arith.mulf %253, %252 : vector<16x256xf32>
    %255 = math.tanh %254 : vector<16x256xf32>
    %cst_74 = arith.constant 5.000000e-01 : f32
    %256 = vector.broadcast %cst_74 : f32 to vector<16x256xf32>
    %257 = arith.mulf %256, %255 : vector<16x256xf32>
    %cst_75 = arith.constant 5.000000e-01 : f32
    %258 = vector.broadcast %cst_75 : f32 to vector<16x256xf32>
    %259 = arith.addf %257, %258 : vector<16x256xf32>
    %260 = vector.extract_strided_slice %237 {offsets = [0, 512], sizes = [16, 256], strides = [1, 1]} : vector<16x768xf32> to vector<16x256xf32>
    %261 = vector.extract_strided_slice %239 {offsets = [0, 512], sizes = [16, 256], strides = [1, 1]} : vector<16x768xf32> to vector<16x256xf32>
    %262 = arith.addf %261, %3 : vector<16x256xf32>
    %263 = arith.mulf %249, %262 : vector<16x256xf32>
    %264 = arith.addf %260, %263 : vector<16x256xf32>
    %265 = math.tanh %264 : vector<16x256xf32>
    %266 = arith.subf %235, %265 : vector<16x256xf32>
    %267 = arith.mulf %259, %266 : vector<16x256xf32>
    %268 = arith.addf %265, %267 : vector<16x256xf32>
    %c0_76 = arith.constant 0 : index
    %c0_77 = arith.constant 0 : index
    %269 = vector.load %arg3[%c0_76, %c0_77] : memref<16x256xf32, #tpu.memory_space<vmem>>, vector<16x256xf32>
    tpu.vector_store %arg3[%c0_76, %c0_77], %268 {strides = array<i32>} : memref<16x256xf32, #tpu.memory_space<vmem>>, vector<16x256xf32>,
    return
  }
}

</mosaic_0001>

<bundles_post_ra>
// kernel: tpu_custom_call.1
= control target key start
LH: loop header
LB: loop body
LE: loop exit
PB: predicated region body
PF: predicated region fallthrough
CT: control target
= control target key end

     0   :  { %8 = vsyncpa [#allocation3], 0  ;;  %s4620_s0 = inlined_call_operand.hbm [shape: f32[8,16,768], index: 0, kind: input, shape index: {}]   ;;  %s4621_s1 = inlined_call_operand.hbm [shape: bf16[256,768], index: 1, kind: input, shape index: {}]   ;;  %s4622_s2 = inlined_call_operand.hbm [shape: f32[1,256], index: 2, kind: input, shape index: {}]   ;;  %s4623_s3 = inlined_call_operand.hbm [shape: f32[16,256], index: 3, kind: output, shape index: {}]  }
   0x1   :  { %9 = vsyncpa [#allocation6], 0  ;;  %s28_s14 = sshll.u32 %s4621_s1, 4  ;;  %s29_s14 = int_to_ptr.hbm [resolvable:$true] %s28_s14 }
   0x2   :  { %10 = vsyncpa [#allocation4], 0  ;;  %s3457_s15 = smov [#allocation5]   ;;  %s15_s19 = sshll.u32 %s4620_s0, 4  ;;  %s16_s19 = int_to_ptr.hbm [resolvable:$true] %s15_s19 }
   0x3   :  { %s30_s16 = sshll.u32 %s3457_s15, 4  ;;  %s3458_s20 = smov 384   ;;  %s31_s16 = int_to_ptr.vmem [resolvable:$true] %s30_s16 }
   0x4   :  { %s3459_s21 = smov 24   ;;  %s3460_s22 = smov [#allocation2]  }
   0x5   :  { %36 = dma.hbm_to_vmem [thread:$0]  %s29_s14, 12288, %s31_s16, [#allocation6], %s3458_s20, %s3458_s20, %s3459_s21  }
   0x6   :  { %s17_s23 = sshll.u32 %s3460_s22, 4  ;;  %s3461_s24 = smov 768   ;;  %s18_s23 = int_to_ptr.vmem [resolvable:$true] %s17_s23 }
   0x7   :  { %s3462_s25 = smov 48   ;;  %s42_s27 = sshll.u32 %s4622_s2, 4  ;;  %s43_s27 = int_to_ptr.hbm [resolvable:$true] %s42_s27 }
   0x8   :  { %23 = dma.hbm_to_vmem [thread:$0]  %s16_s19, 12288, %s18_s23, [#allocation3], %s3461_s24, %s3461_s24, %s3462_s25  }
   0x9   :  { %s3463_s28 = smov [#allocation7]  }
   0xa   :  { %s44_s29 = sshll.u32 %s3463_s28, 4  ;;  %s45_s29 = int_to_ptr.vmem [resolvable:$true] %s44_s29 }
   0xb   :  { %47 = dma.hbm_to_vmem [thread:$0]  %s43_s27, 32, %s45_s29, [#allocation6]  }
   0xc   :  { %3451 = dma.done.wait [#allocation3], 12288  }
   0xd   :  { %3452 = vsyncadd [#allocation3], 4294955008 }
   0xe   :  { %3453 = dma.done.wait [#allocation6], 12320  }
   0xf   :  { %3454 = vsyncadd [#allocation6], 4294954976  ;;  %v2842_v0 = vld [vmem:[#allocation5 + $0x150] sm:$0xf]  ;;  %v3101_v1 = vld [vmem:[#allocation5 + $0x164] sm:$0xf0] }
  0x10   :  { %v3034_v2 = vld [vmem:[#allocation5 + $0x2d0] sm:$0xf]  ;;  %v3497_v3 = vor.u32 %v3101_v1, %v2842_v0  ;;  %v3149_v4 = vld [vmem:[#allocation5 + $0x2e4] sm:$0xf0]  ;;  %v3098_v5 = vld [vmem:[#allocation5 + $0x154] sm:$0xf] }
  0x11   :  { %v2844_v6 = vld [vmem:[#allocation5 + $0x168] sm:$0xf0]  ;;  %v3499_v7 = vor.u32 %v3149_v4, %v3034_v2  ;;  %v3146_v9 = vld [vmem:[#allocation5 + $0x2d4] sm:$0xf]  ;;  %v2818_v11 = vld [vmem:[#allocation5 + $0x120] sm:$0xf] }
  0x12   :  { %4806 = vst [vmem:[#allocation12_spill] sm:$0xff] %v3497_v3  ;;  %v3501_v8 = vor.u32 %v3098_v5, %v2844_v6  ;;  %v3036_v10 = vld [vmem:[#allocation5 + $0x2e8] sm:$0xf0]  ;;  %655 = vmatpush.bf16.msra.mxu0 %v3497_v3  ;;  %v3095_v13 = vld [vmem:[#allocation5 + $0x134] sm:$0xf0]  ;;  %s3465_s0 = smov [#allocation8]  }
  0x13   :  { %4807 = vst [vmem:[#allocation13_spill] sm:$0xff] %v3499_v7  ;;  %v3504_v12 = vor.u32 %v3146_v9, %v3036_v10  ;;  %v3010_v14 = vld [vmem:[#allocation5 + $0x2a0] sm:$0xf]  ;;  %v3143_v15 = vld [vmem:[#allocation5 + $0x2b4] sm:$0xf0]  ;;  %669 = vmatpush.bf16.msra.mxu1 %v3499_v7  ;;  %v3508_v16 = vor.u32 %v3095_v13, %v2818_v11  ;;  %s2656_s2 = sshll.u32 %s3465_s0, 4  ;;  %s2657_s2 = int_to_ptr.vmem [resolvable:$true] %s2656_s2 }
  0x14   :  { %4808 = vst [vmem:[#allocation14_spill] sm:$0xff] %v3501_v8  ;;  %683 = vmatpush.bf16.msra.mxu2 %v3501_v8  ;;  %v3510_v17 = vor.u32 %v3143_v15, %v3010_v14  ;;  %v3092_v18 = vld [vmem:[#allocation5 + $0x124] sm:$0xf]  ;;  %v2820_v19 = vld [vmem:[#allocation5 + $0x138] sm:$0xf0]  ;;  %s2658_s5 = sshll.u32 %s4623_s3, 4  ;;  %s2659_s5 = int_to_ptr.hbm [resolvable:$true] %s2658_s5 }
  0x15   :  { %4809 = vst [vmem:[#allocation15_spill] sm:$0xff] %v3504_v12  ;;  %v3140_v20 = vld [vmem:[#allocation5 + $0x2a4] sm:$0xf]  ;;  %697 = vmatpush.bf16.msra.mxu3 %v3504_v12  ;;  %v3513_v21 = vor.u32 %v3092_v18, %v2820_v19  ;;  %v3012_v22 = vld [vmem:[#allocation5 + $0x2b8] sm:$0xf0]  ;;  %s3466_s6 = smov 256  }
  0x16   :  { %4810 = vst [vmem:[#allocation16_spill] sm:$0xff] %v3508_v16  ;;  %v2794_v23 = vld [vmem:[#allocation5 + $0xf0] sm:$0xf]  ;;  %v3089_v24 = vld [vmem:[#allocation5 + $0x104] sm:$0xf0]  ;;  %v3515_v25 = vor.u32 %v3140_v20, %v3012_v22  ;;  %656 = vmatpush.bf16.msra.mxu0 %v3508_v16  ;;  %s3467_s7 = smov 16  }
  0x17   :  { %4811 = vst [vmem:[#allocation17_spill] sm:$0xff] %v3510_v17  ;;  %v2986_v26 = vld [vmem:[#allocation5 + $0x270] sm:$0xf]  ;;  %v3137_v27 = vld [vmem:[#allocation5 + $0x284] sm:$0xf0]  ;;  %v3518_v29 = vor.u32 %v3089_v24, %v2794_v23  ;;  %670 = vmatpush.bf16.msra.mxu1 %v3510_v17 }
  0x18   :  { %4812 = vst [vmem:[#allocation18_spill] sm:$0xff] %v3513_v21  ;;  %v3086_v28 = vld [vmem:[#allocation5 + $0xf4] sm:$0xf]  ;;  %v2796_v30 = vld [vmem:[#allocation5 + $0x108] sm:$0xf0]  ;;  %684 = vmatpush.bf16.msra.mxu2 %v3513_v21  ;;  %v3522_v33 = vor.u32 %v3137_v27, %v2986_v26 }
  0x19   :  { %4813 = vst [vmem:[#allocation19_spill] sm:$0xff] %v3515_v25  ;;  %v3134_v31 = vld [vmem:[#allocation5 + $0x274] sm:$0xf]  ;;  %v2988_v32 = vld [vmem:[#allocation5 + $0x288] sm:$0xf0]  ;;  %v3524_v34 = vor.u32 %v3086_v28, %v2796_v30  ;;  %698 = vmatpush.bf16.msra.mxu3 %v3515_v25 }
  0x1a   :  { %4814 = vst [vmem:[#allocation20_spill] sm:$0xff] %v3518_v29  ;;  %v2770_v35 = vld [vmem:[#allocation5 + $0xc0] sm:$0xf]  ;;  %v3083_v36 = vld [vmem:[#allocation5 + $0xd4] sm:$0xf0]  ;;  %v3527_v38 = vor.u32 %v3134_v31, %v2988_v32  ;;  %657 = vmatpush.bf16.msra.mxu0 %v3518_v29 }
  0x1b   :  { %4815 = vst [vmem:[#allocation21_spill] sm:$0xff] %v3522_v33  ;;  %v2962_v37 = vld [vmem:[#allocation5 + $0x240] sm:$0xf]  ;;  %v3131_v39 = vld [vmem:[#allocation5 + $0x254] sm:$0xf0]  ;;  %v3530_v44 = vor.u32 %v3083_v36, %v2770_v35  ;;  %671 = vmatpush.bf16.msra.mxu1 %v3522_v33 }
  0x1c   :  { %4816 = vst [vmem:[#allocation22_spill] sm:$0xff] %v3524_v34  ;;  %v3080_v40 = vld [vmem:[#allocation5 + $0xc4] sm:$0xf]  ;;  %v2772_v41 = vld [vmem:[#allocation5 + $0xd8] sm:$0xf0]  ;;  %685 = vmatpush.bf16.msra.mxu2 %v3524_v34  ;;  %v3534_v45 = vor.u32 %v3131_v39, %v2962_v37 }
  0x1d   :  { %4817 = vst [vmem:[#allocation23_spill] sm:$0xff] %v3527_v38  ;;  %v3128_v42 = vld [vmem:[#allocation5 + $0x244] sm:$0xf]  ;;  %v2964_v43 = vld [vmem:[#allocation5 + $0x258] sm:$0xf0]  ;;  %v3536_v46 = vor.u32 %v3080_v40, %v2772_v41  ;;  %699 = vmatpush.bf16.msra.mxu3 %v3527_v38 }
  0x1e   :  { %4818 = vst [vmem:[#allocation24_spill] sm:$0xff] %v3530_v44  ;;  %v2746_v47 = vld [vmem:[#allocation5 + $0x90] sm:$0xf]  ;;  %v3077_v48 = vld [vmem:[#allocation5 + $0xa4] sm:$0xf0]  ;;  %v3539_v50 = vor.u32 %v3128_v42, %v2964_v43  ;;  %658 = vmatpush.bf16.msra.mxu0 %v3530_v44 }
  0x1f   :  { %4819 = vst [vmem:[#allocation25_spill] sm:$0xff] %v3534_v45  ;;  %v2938_v49 = vld [vmem:[#allocation5 + $0x210] sm:$0xf]  ;;  %v3125_v51 = vld [vmem:[#allocation5 + $0x224] sm:$0xf0]  ;;  %v3542_v56 = vor.u32 %v3077_v48, %v2746_v47  ;;  %672 = vmatpush.bf16.msra.mxu1 %v3534_v45 }
  0x20   :  { %4820 = vst [vmem:[#allocation26_spill] sm:$0xff] %v3536_v46  ;;  %v3074_v52 = vld [vmem:[#allocation5 + $0x94] sm:$0xf]  ;;  %v2748_v53 = vld [vmem:[#allocation5 + $0xa8] sm:$0xf0]  ;;  %686 = vmatpush.bf16.msra.mxu2 %v3536_v46  ;;  %v3546_v57 = vor.u32 %v3125_v51, %v2938_v49 }
  0x21   :  { %4821 = vst [vmem:[#allocation27_spill] sm:$0xff] %v3539_v50  ;;  %v3122_v54 = vld [vmem:[#allocation5 + $0x214] sm:$0xf]  ;;  %v2940_v55 = vld [vmem:[#allocation5 + $0x228] sm:$0xf0]  ;;  %v3548_v58 = vor.u32 %v3074_v52, %v2748_v53  ;;  %700 = vmatpush.bf16.msra.mxu3 %v3539_v50 }
  0x22   :  { %4822 = vst [vmem:[#allocation28_spill] sm:$0xff] %v3542_v56  ;;  %v2722_v59 = vld [vmem:[#allocation5 + $0x60] sm:$0xf]  ;;  %v3071_v60 = vld [vmem:[#allocation5 + $0x74] sm:$0xf0]  ;;  %v3551_v62 = vor.u32 %v3122_v54, %v2940_v55  ;;  %659 = vmatpush.bf16.msra.mxu0 %v3542_v56 }
  0x23   :  { %4823 = vst [vmem:[#allocation29_spill] sm:$0xff] %v3546_v57  ;;  %v2914_v61 = vld [vmem:[#allocation5 + $0x1e0] sm:$0xf]  ;;  %v3119_v63 = vld [vmem:[#allocation5 + $0x1f4] sm:$0xf0]  ;;  %v3554_v5 = vor.u32 %v3071_v60, %v2722_v59  ;;  %673 = vmatpush.bf16.msra.mxu1 %v3546_v57 }
  0x24   :  { %4824 = vst [vmem:[#allocation30_spill] sm:$0xff] %v3548_v58  ;;  %v3068_v0 = vld [vmem:[#allocation5 + $0x64] sm:$0xf]  ;;  %v2724_v1 = vld [vmem:[#allocation5 + $0x78] sm:$0xf0]  ;;  %687 = vmatpush.bf16.msra.mxu2 %v3548_v58  ;;  %v3558_v6 = vor.u32 %v3119_v63, %v2914_v61 }
  0x25   :  { %4825 = vst [vmem:[#allocation31_spill] sm:$0xff] %v3551_v62  ;;  %v3116_v2 = vld [vmem:[#allocation5 + $0x1e4] sm:$0xf]  ;;  %v2916_v4 = vld [vmem:[#allocation5 + $0x1f8] sm:$0xf0]  ;;  %v3560_v9 = vor.u32 %v3068_v0, %v2724_v1  ;;  %701 = vmatpush.bf16.msra.mxu3 %v3551_v62 }
  0x26   :  { %4826 = vst [vmem:[#allocation32_spill] sm:$0xff] %v3554_v5  ;;  %v2698_v10 = vld [vmem:[#allocation5 + $0x30] sm:$0xf]  ;;  %v3065_v11 = vld [vmem:[#allocation5 + $0x44] sm:$0xf0]  ;;  %v3563_v14 = vor.u32 %v3116_v2, %v2916_v4  ;;  %660 = vmatpush.bf16.msra.mxu0 %v3554_v5 }
  0x27   :  { %4827 = vst [vmem:[#allocation33_spill] sm:$0xff] %v3558_v6  ;;  %v2890_v13 = vld [vmem:[#allocation5 + $0x1b0] sm:$0xf]  ;;  %v3113_v15 = vld [vmem:[#allocation5 + $0x1c4] sm:$0xf0]  ;;  %v3566_v23 = vor.u32 %v3065_v11, %v2698_v10  ;;  %674 = vmatpush.bf16.msra.mxu1 %v3558_v6 }
  0x28   :  { %4828 = vst [vmem:[#allocation34_spill] sm:$0xff] %v3560_v9  ;;  %v3062_v18 = vld [vmem:[#allocation5 + $0x34] sm:$0xf]  ;;  %v2700_v19 = vld [vmem:[#allocation5 + $0x48] sm:$0xf0]  ;;  %688 = vmatpush.bf16.msra.mxu2 %v3560_v9  ;;  %v3570_v27 = vor.u32 %v3113_v15, %v2890_v13 }
  0x29   :  { %4829 = vst [vmem:[#allocation35_spill] sm:$0xff] %v3563_v14  ;;  %v3110_v20 = vld [vmem:[#allocation5 + $0x1b4] sm:$0xf]  ;;  %v2892_v22 = vld [vmem:[#allocation5 + $0x1c8] sm:$0xf0]  ;;  %v3572_v28 = vor.u32 %v3062_v18, %v2700_v19  ;;  %702 = vmatpush.bf16.msra.mxu3 %v3563_v14 }
  0x2a   :  { %4830 = vst [vmem:[#allocation36_spill] sm:$0xff] %v3566_v23  ;;  %v2674_v24 = vld [vmem:[#allocation5] sm:$0xf]  ;;  %v3059_v26 = vld [vmem:[#allocation5 + $0x14] sm:$0xf0]  ;;  %v3575_v35 = vor.u32 %v3110_v20, %v2892_v22  ;;  %661 = vmatpush.bf16.msra.mxu0 %v3566_v23 }
  0x2b   :  { %4831 = vst [vmem:[#allocation37_spill] sm:$0xff] %v3570_v27  ;;  %v2866_v30 = vld [vmem:[#allocation5 + $0x180] sm:$0xf]  ;;  %v3107_v31 = vld [vmem:[#allocation5 + $0x194] sm:$0xf0]  ;;  %v3578_v43 = vor.u32 %v3059_v26, %v2674_v24  ;;  %675 = vmatpush.bf16.msra.mxu1 %v3570_v27 }
  0x2c   :  { %4832 = vst [vmem:[#allocation38_spill] sm:$0xff] %v3572_v28  ;;  %v3056_v32 = vld [vmem:[#allocation5 + $0x4] sm:$0xf]  ;;  %v2676_v36 = vld [vmem:[#allocation5 + $0x18] sm:$0xf0]  ;;  %689 = vmatpush.bf16.msra.mxu2 %v3572_v28  ;;  %v3582_v51 = vor.u32 %v3107_v31, %v2866_v30 }
  0x2d   :  { %4833 = vst [vmem:[#allocation39_spill] sm:$0xff] %v3575_v35  ;;  %v3104_v37 = vld [vmem:[#allocation5 + $0x184] sm:$0xf]  ;;  %v2868_v39 = vld [vmem:[#allocation5 + $0x198] sm:$0xf0]  ;;  %v3584_v52 = vor.u32 %v3056_v32, %v2676_v36  ;;  %703 = vmatpush.bf16.msra.mxu3 %v3575_v35 }
  0x2e   :  { %v2850_v40 = vld [vmem:[#allocation5 + $0x158] sm:$0xf]  ;;  %v3102_v41 = vld [vmem:[#allocation5 + $0x16c] sm:$0xf0]  ;;  %4834 = vst [vmem:[#allocation40_spill] sm:$0xff] %v3578_v43  ;;  %v3587_v55 = vor.u32 %v3104_v37, %v2868_v39  ;;  %662 = vmatpush.bf16.msra.mxu0 %v3578_v43  ;;  %v4624_v37 = vmov 0  }
  0x2f   :  { %v3042_v42 = vld [vmem:[#allocation5 + $0x2d8] sm:$0xf]  ;;  %v3150_v47 = vld [vmem:[#allocation5 + $0x2ec] sm:$0xf0]  ;;  %v3099_v48 = vld [vmem:[#allocation5 + $0x15c] sm:$0xf]  ;;  %v3589_v59 = vor.u32 %v3102_v41, %v2850_v40  ;;  %676 = vmatpush.bf16.msra.mxu1 %v3582_v51 }
  0x30   :  { %v2852_v49 = vld [vmem:[#allocation5 + $0x170] sm:$0xf0]  ;;  %4835 = vst [vmem:[#allocation41_spill] sm:$0xff] %v3582_v51  ;;  %v3147_v53 = vld [vmem:[#allocation5 + $0x2dc] sm:$0xf]  ;;  %v3591_v60 = vor.u32 %v3150_v47, %v3042_v42  ;;  %690 = vmatpush.bf16.msra.mxu2 %v3584_v52 }
  0x31   :  { %4836 = vst [vmem:[#allocation42_spill] sm:$0xff] %v3584_v52  ;;  %v3044_v54 = vld [vmem:[#allocation5 + $0x2f0] sm:$0xf0]  ;;  %v3593_v61 = vor.u32 %v3099_v48, %v2852_v49  ;;  %v2826_v63 = vld [vmem:[#allocation5 + $0x128] sm:$0xf]  ;;  %704 = vmatpush.bf16.msra.mxu3 %v3587_v55  ;;  %663 = vmatmul.bf16.vlgmr.msra.gmra.mxu0 %v4624_v37 }
  0x32   :  { %4837 = vst [vmem:[#allocation43_spill] sm:$0xff] %v3587_v55  ;;  %v3096_v0 = vld [vmem:[#allocation5 + $0x13c] sm:$0xf0]  ;;  %v3018_v1 = vld [vmem:[#allocation5 + $0x2a8] sm:$0xf]  ;;  %v3596_v2 = vor.u32 %v3147_v53, %v3044_v54  ;;  %711 = vmatpush.bf16.msrb.mxu0 %v3589_v59  ;;  %677 = vmatmul.bf16.vlgmr.msra.gmra.mxu1 %v4624_v37 }
  0x33   :  { %4838 = vst [vmem:[#allocation44_spill] sm:$0xff] %v3589_v59  ;;  %v3144_v4 = vld [vmem:[#allocation5 + $0x2bc] sm:$0xf0]  ;;  %v3093_v10 = vld [vmem:[#allocation5 + $0x12c] sm:$0xf]  ;;  %v3602_v18 = vor.u32 %v3096_v0, %v2826_v63  ;;  %725 = vmatpush.bf16.msrb.mxu1 %v3591_v60  ;;  %691 = vmatmul.bf16.vlgmr.msra.gmra.mxu2 %v4624_v37 }
  0x34   :  { %4839 = vst [vmem:[#allocation45_spill] sm:$0xff] %v3591_v60  ;;  %v2828_v11 = vld [vmem:[#allocation5 + $0x140] sm:$0xf0]  ;;  %v3141_v13 = vld [vmem:[#allocation5 + $0x2ac] sm:$0xf]  ;;  %739 = vmatpush.bf16.msrb.mxu2 %v3593_v61  ;;  %v3606_v20 = vor.u32 %v3144_v4, %v3018_v1  ;;  %705 = vmatmul.bf16.vlgmr.msra.gmra.mxu3 %v4624_v37 }
  0x35   :  { %4840 = vst [vmem:[#allocation46_spill] sm:$0xff] %v3593_v61  ;;  %v3020_v15 = vld [vmem:[#allocation5 + $0x2c0] sm:$0xf0]  ;;  %v2802_v19 = vld [vmem:[#allocation5 + $0xf8] sm:$0xf]  ;;  %v3608_v22 = vor.u32 %v3093_v10, %v2828_v11  ;;  %753 = vmatpush.bf16.msrb.mxu3 %v3596_v2 }
  0x36   :  { %4841 = vst [vmem:[#allocation47_spill] sm:$0xff] %v3596_v2  ;;  %v3090_v24 = vld [vmem:[#allocation5 + $0x10c] sm:$0xf0]  ;;  %v2994_v26 = vld [vmem:[#allocation5 + $0x278] sm:$0xf]  ;;  %v3611_v30 = vor.u32 %v3141_v13, %v3020_v15  ;;  %712 = vmatpush.bf16.msrb.mxu0 %v3602_v18 }
  0x37   :  { %4842 = vst [vmem:[#allocation48_spill] sm:$0xff] %v3602_v18  ;;  %v3138_v31 = vld [vmem:[#allocation5 + $0x28c] sm:$0xf0]  ;;  %v3087_v32 = vld [vmem:[#allocation5 + $0xfc] sm:$0xf]  ;;  %v3617_v41 = vor.u32 %v3090_v24, %v2802_v19  ;;  %726 = vmatpush.bf16.msrb.mxu1 %v3606_v20 }
  0x38   :  { %4843 = vst [vmem:[#allocation49_spill] sm:$0xff] %v3606_v20  ;;  %v2804_v36 = vld [vmem:[#allocation5 + $0x110] sm:$0xf0]  ;;  %v3135_v39 = vld [vmem:[#allocation5 + $0x27c] sm:$0xf]  ;;  %740 = vmatpush.bf16.msrb.mxu2 %v3608_v22  ;;  %v3622_v42 = vor.u32 %v3138_v31, %v2994_v26 }
  0x39   :  { %4844 = vst [vmem:[#allocation50_spill] sm:$0xff] %v3608_v22  ;;  %v2996_v40 = vld [vmem:[#allocation5 + $0x290] sm:$0xf0]  ;;  %v3624_v47 = vor.u32 %v3087_v32, %v2804_v36  ;;  %v2778_v48 = vld [vmem:[#allocation5 + $0xc8] sm:$0xf]  ;;  %754 = vmatpush.bf16.msrb.mxu3 %v3611_v30 }
  0x3a   :  { %4845 = vst [vmem:[#allocation51_spill] sm:$0xff] %v3611_v30  ;;  %v3084_v49 = vld [vmem:[#allocation5 + $0xdc] sm:$0xf0]  ;;  %v2970_v53 = vld [vmem:[#allocation5 + $0x248] sm:$0xf]  ;;  %v3627_v54 = vor.u32 %v3135_v39, %v2996_v40  ;;  %713 = vmatpush.bf16.msrb.mxu0 %v3617_v41 }
  0x3b   :  { %4846 = vst [vmem:[#allocation52_spill] sm:$0xff] %v3617_v41  ;;  %v3132_v63 = vld [vmem:[#allocation5 + $0x25c] sm:$0xf0]  ;;  %v3081_v0 = vld [vmem:[#allocation5 + $0xcc] sm:$0xf]  ;;  %v3630_v11 = vor.u32 %v3084_v49, %v2778_v48  ;;  %727 = vmatpush.bf16.msrb.mxu1 %v3622_v42 }
  0x3c   :  { %4847 = vst [vmem:[#allocation53_spill] sm:$0xff] %v3622_v42  ;;  %v2780_v1 = vld [vmem:[#allocation5 + $0xe0] sm:$0xf0]  ;;  %v3129_v4 = vld [vmem:[#allocation5 + $0x24c] sm:$0xf]  ;;  %741 = vmatpush.bf16.msrb.mxu2 %v3624_v47  ;;  %v3634_v13 = vor.u32 %v3132_v63, %v2970_v53 }
  0x3d   :  { %4848 = vst [vmem:[#allocation54_spill] sm:$0xff] %v3624_v47  ;;  %v2972_v10 = vld [vmem:[#allocation5 + $0x260] sm:$0xf0]  ;;  %v3636_v15 = vor.u32 %v3081_v0, %v2780_v1  ;;  %v2754_v19 = vld [vmem:[#allocation5 + $0x98] sm:$0xf]  ;;  %755 = vmatpush.bf16.msrb.mxu3 %v3627_v54 }
  0x3e   :  { %4849 = vst [vmem:[#allocation55_spill] sm:$0xff] %v3627_v54  ;;  %v3078_v24 = vld [vmem:[#allocation5 + $0xac] sm:$0xf0]  ;;  %v2946_v26 = vld [vmem:[#allocation5 + $0x218] sm:$0xf]  ;;  %v3639_v31 = vor.u32 %v3129_v4, %v2972_v10  ;;  %714 = vmatpush.bf16.msrb.mxu0 %v3630_v11 }
  0x3f   :  { %4850 = vst [vmem:[#allocation56_spill] sm:$0xff] %v3630_v11  ;;  %v3126_v32 = vld [vmem:[#allocation5 + $0x22c] sm:$0xf0]  ;;  %v3075_v36 = vld [vmem:[#allocation5 + $0x9c] sm:$0xf]  ;;  %v3642_v49 = vor.u32 %v3078_v24, %v2754_v19  ;;  %728 = vmatpush.bf16.msrb.mxu1 %v3634_v13 }
  0x40   :  { %4851 = vst [vmem:[#allocation57_spill] sm:$0xff] %v3634_v13  ;;  %v2756_v39 = vld [vmem:[#allocation5 + $0xb0] sm:$0xf0]  ;;  %v3123_v40 = vld [vmem:[#allocation5 + $0x21c] sm:$0xf]  ;;  %742 = vmatpush.bf16.msrb.mxu2 %v3636_v15  ;;  %v3646_v53 = vor.u32 %v3126_v32, %v2946_v26 }
  0x41   :  { %4852 = vst [vmem:[#allocation58_spill] sm:$0xff] %v3636_v15  ;;  %v2948_v48 = vld [vmem:[#allocation5 + $0x230] sm:$0xf0]  ;;  %v3648_v63 = vor.u32 %v3075_v36, %v2756_v39  ;;  %v2730_v0 = vld [vmem:[#allocation5 + $0x68] sm:$0xf]  ;;  %756 = vmatpush.bf16.msrb.mxu3 %v3639_v31 }
  0x42   :  { %4853 = vst [vmem:[#allocation59_spill] sm:$0xff] %v3639_v31  ;;  %v3072_v1 = vld [vmem:[#allocation5 + $0x7c] sm:$0xf0]  ;;  %v2922_v4 = vld [vmem:[#allocation5 + $0x1e8] sm:$0xf]  ;;  %v3651_v10 = vor.u32 %v3123_v40, %v2948_v48  ;;  %715 = vmatpush.bf16.msrb.mxu0 %v3642_v49 }
  0x43   :  { %4854 = vst [vmem:[#allocation60_spill] sm:$0xff] %v3642_v49  ;;  %v3120_v37 = vld [vmem:[#allocation5 + $0x1fc] sm:$0xf0]  ;;  %v3069_v54 = vld [vmem:[#allocation5 + $0x6c] sm:$0xf]  ;;  %v3654_v13 = vor.u32 %v3072_v1, %v2730_v0  ;;  %729 = vmatpush.bf16.msrb.mxu1 %v3646_v53 }
  0x44   :  { %4855 = vst [vmem:[#allocation61_spill] sm:$0xff] %v3646_v53  ;;  %v2732_v11 = vld [vmem:[#allocation5 + $0x80] sm:$0xf0]  ;;  %v3117_v19 = vld [vmem:[#allocation5 + $0x1ec] sm:$0xf]  ;;  %743 = vmatpush.bf16.msrb.mxu2 %v3648_v63  ;;  %v3658_v26 = vor.u32 %v3120_v37, %v2922_v4 }
  0x45   :  { %4856 = vst [vmem:[#allocation62_spill] sm:$0xff] %v3648_v63  ;;  %v2924_v24 = vld [vmem:[#allocation5 + $0x200] sm:$0xf0]  ;;  %v3660_v32 = vor.u32 %v3069_v54, %v2732_v11  ;;  %v2706_v36 = vld [vmem:[#allocation5 + $0x38] sm:$0xf]  ;;  %757 = vmatpush.bf16.msrb.mxu3 %v3651_v10 }
  0x46   :  { %4857 = vst [vmem:[#allocation63_spill] sm:$0xff] %v3651_v10  ;;  %v3066_v39 = vld [vmem:[#allocation5 + $0x4c] sm:$0xf0]  ;;  %v2898_v40 = vld [vmem:[#allocation5 + $0x1b8] sm:$0xf]  ;;  %v3663_v48 = vor.u32 %v3117_v19, %v2924_v24  ;;  %716 = vmatpush.bf16.msrb.mxu0 %v3654_v13 }
  0x47   :  { %4858 = vst [vmem:[#allocation64_spill] sm:$0xff] %v3654_v13  ;;  %v3114_v31 = vld [vmem:[#allocation5 + $0x1cc] sm:$0xf0]  ;;  %v3063_v15 = vld [vmem:[#allocation5 + $0x3c] sm:$0xf]  ;;  %v3666_v53 = vor.u32 %v3066_v39, %v2706_v36  ;;  %730 = vmatpush.bf16.msrb.mxu1 %v3658_v26 }
  0x48   :  { %4859 = vst [vmem:[#allocation65_spill] sm:$0xff] %v3658_v26  ;;  %v2708_v49 = vld [vmem:[#allocation5 + $0x50] sm:$0xf0]  ;;  %v3111_v0 = vld [vmem:[#allocation5 + $0x1bc] sm:$0xf]  ;;  %744 = vmatpush.bf16.msrb.mxu2 %v3660_v32  ;;  %v3670_v54 = vor.u32 %v3114_v31, %v2898_v40 }
  0x49   :  { %4860 = vst [vmem:[#allocation66_spill] sm:$0xff] %v3660_v32  ;;  %v2900_v1 = vld [vmem:[#allocation5 + $0x1d0] sm:$0xf0]  ;;  %v2682_v37 = vld [vmem:[#allocation5 + $0x8] sm:$0xf]  ;;  %v3672_v11 = vor.u32 %v3063_v15, %v2708_v49  ;;  %758 = vmatpush.bf16.msrb.mxu3 %v3663_v48 }
  0x4a   :  { %4861 = vst [vmem:[#allocation67_spill] sm:$0xff] %v3663_v48  ;;  %v3060_v4 = vld [vmem:[#allocation5 + $0x1c] sm:$0xf0]  ;;  %v2874_v19 = vld [vmem:[#allocation5 + $0x188] sm:$0xf]  ;;  %v3675_v63 = vor.u32 %v3111_v0, %v2900_v1  ;;  %717 = vmatpush.bf16.msrb.mxu0 %v3666_v53 }
  0x4b   :  { %4862 = vst [vmem:[#allocation68_spill] sm:$0xff] %v3666_v53  ;;  %v3108_v24 = vld [vmem:[#allocation5 + $0x19c] sm:$0xf0]  ;;  %v3057_v10 = vld [vmem:[#allocation5 + $0xc] sm:$0xf]  ;;  %v3678_v26 = vor.u32 %v3060_v4, %v2682_v37  ;;  %731 = vmatpush.bf16.msrb.mxu1 %v3670_v54 }
  0x4c   :  { %4863 = vst [vmem:[#allocation69_spill] sm:$0xff] %v3670_v54  ;;  %v2684_v13 = vld [vmem:[#allocation5 + $0x20] sm:$0xf0]  ;;  %v3105_v36 = vld [vmem:[#allocation5 + $0x18c] sm:$0xf]  ;;  %745 = vmatpush.bf16.msrb.mxu2 %v3672_v11  ;;  %v3682_v40 = vor.u32 %v3108_v24, %v2874_v19 }
  0x4d   :  { %4864 = vst [vmem:[#allocation70_spill] sm:$0xff] %v3672_v11  ;;  %v2876_v39 = vld [vmem:[#allocation5 + $0x1a0] sm:$0xf0]  ;;  %v2858_v42 = vld [vmem:[#allocation5 + $0x160] sm:$0xf]  ;;  %v3684_v0 = vor.u32 %v3057_v10, %v2684_v13  ;;  %759 = vmatpush.bf16.msrb.mxu3 %v3675_v63 }
  0x4e   :  { %4865 = vst [vmem:[#allocation71_spill] sm:$0xff] %v3675_v63  ;;  %v3103_v47 = vld [vmem:[#allocation5 + $0x174] sm:$0xf0]  ;;  %v3050_v30 = vld [vmem:[#allocation5 + $0x2e0] sm:$0xf]  ;;  %v3687_v32 = vor.u32 %v3105_v36, %v2876_v39  ;;  %718 = vmatpush.bf16.msrb.mxu0 %v3678_v26 }
  0x4f   :  { %4866 = vst [vmem:[#allocation72_spill] sm:$0xff] %v3678_v26  ;;  %v3151_v31 = vld [vmem:[#allocation5 + $0x2f4] sm:$0xf0]  ;;  %v3100_v15 = vld [vmem:[#allocation5 + $0x164] sm:$0xf]  ;;  %v3689_v53 = vor.u32 %v3103_v47, %v2858_v42  ;;  %732 = vmatpush.bf16.msrb.mxu1 %v3682_v40 }
  0x50   :  { %v2860_v49 = vld [vmem:[#allocation5 + $0x178] sm:$0xf0]  ;;  %4867 = vst [vmem:[#allocation73_spill] sm:$0xff] %v3682_v40  ;;  %v3148_v1 = vld [vmem:[#allocation5 + $0x2e4] sm:$0xf]  ;;  %v3691_v37 = vor.u32 %v3151_v31, %v3050_v30  ;;  %746 = vmatpush.bf16.msrb.mxu2 %v3684_v0 }
  0x51   :  { %4868 = vst [vmem:[#allocation74_spill] sm:$0xff] %v3684_v0  ;;  %v3052_v48 = vld [vmem:[#allocation5 + $0x2f8] sm:$0xf0]  ;;  %v3693_v4 = vor.u32 %v3100_v15, %v2860_v49  ;;  %v2834_v41 = vld [vmem:[#allocation5 + $0x130] sm:$0xf]  ;;  %760 = vmatpush.bf16.msrb.mxu3 %v3687_v32 }
  0x52   :  { %4869 = vst [vmem:[#allocation75_spill] sm:$0xff] %v3687_v32  ;;  %v3097_v54 = vld [vmem:[#allocation5 + $0x144] sm:$0xf0]  ;;  %v3026_v20 = vld [vmem:[#allocation5 + $0x2b0] sm:$0xf]  ;;  %v3696_v19 = vor.u32 %v3148_v1, %v3052_v48  ;;  %767 = vmatpush.bf16.msra.mxu0 %v3689_v53  ;;  %v4878_v1 = vmov 0  }
  0x53   :  { %4870 = vst [vmem:[#allocation76_spill] sm:$0xff] %v3689_v53  ;;  %v3145_v13 = vld [vmem:[#allocation5 + $0x2c4] sm:$0xf0]  ;;  %v3094_v10 = vld [vmem:[#allocation5 + $0x134] sm:$0xf]  ;;  %v3702_v30 = vor.u32 %v3097_v54, %v2834_v41  ;;  %781 = vmatpush.bf16.msra.mxu1 %v3691_v37  ;;  %747 = vmatmul.bf16.vlgmr.msrb.gmra.mxu2 %v4878_v1 }
  0x54   :  { %4871 = vst [vmem:[#allocation77_spill] sm:$0xff] %v3691_v37  ;;  %v2836_v24 = vld [vmem:[#allocation5 + $0x148] sm:$0xf0]  ;;  %v3142_v42 = vld [vmem:[#allocation5 + $0x2b4] sm:$0xf]  ;;  %795 = vmatpush.bf16.msra.mxu2 %v3693_v4  ;;  %v3706_v48 = vor.u32 %v3145_v13, %v3026_v20  ;;  %761 = vmatmul.bf16.vlgmr.msrb.gmra.mxu3 %v4878_v1 }
  0x55   :  { %4872 = vst [vmem:[#allocation78_spill] sm:$0xff] %v3693_v4  ;;  %v3028_v47 = vld [vmem:[#allocation5 + $0x2c8] sm:$0xf0]  ;;  %v3708_v36 = vor.u32 %v3094_v10, %v2836_v24  ;;  %v2810_v39 = vld [vmem:[#allocation5 + $0x100] sm:$0xf]  ;;  %809 = vmatpush.bf16.msra.mxu3 %v3696_v19  ;;  %719 = vmatmul.bf16.vlgmr.msrb.gmra.mxu0 %v4878_v1 }
  0x56   :  { %4873 = vst [vmem:[#allocation79_spill] sm:$0xff] %v3696_v19  ;;  %v3091_v31 = vld [vmem:[#allocation5 + $0x114] sm:$0xf0]  ;;  %v3002_v15 = vld [vmem:[#allocation5 + $0x280] sm:$0xf]  ;;  %v3711_v49 = vor.u32 %v3142_v42, %v3028_v47  ;;  %768 = vmatpush.bf16.msra.mxu0 %v3702_v30  ;;  %733 = vmatmul.bf16.vlgmr.msrb.gmra.mxu1 %v4878_v1 }
  0x57   :  { %4874 = vst [vmem:[#allocation80_spill] sm:$0xff] %v3702_v30  ;;  %v3139_v53 = vld [vmem:[#allocation5 + $0x294] sm:$0xf0]  ;;  %v3088_v41 = vld [vmem:[#allocation5 + $0x104] sm:$0xf]  ;;  %v3717_v20 = vor.u32 %v3091_v31, %v2810_v39  ;;  %782 = vmatpush.bf16.msra.mxu1 %v3706_v48 }
  0x58   :  { %4875 = vst [vmem:[#allocation81_spill] sm:$0xff] %v3706_v48  ;;  %v2812_v54 = vld [vmem:[#allocation5 + $0x118] sm:$0xf0]  ;;  %v3136_v37 = vld [vmem:[#allocation5 + $0x284] sm:$0xf]  ;;  %796 = vmatpush.bf16.msra.mxu2 %v3708_v36  ;;  %v3722_v13 = vor.u32 %v3139_v53, %v3002_v15 }
  0x59   :  { %4876 = vst [vmem:[#allocation82_spill] sm:$0xff] %v3708_v36  ;;  %v3004_v4 = vld [vmem:[#allocation5 + $0x298] sm:$0xf0]  ;;  %v3724_v10 = vor.u32 %v3088_v41, %v2812_v54  ;;  %v2786_v24 = vld [vmem:[#allocation5 + $0xd0] sm:$0xf]  ;;  %810 = vmatpush.bf16.msra.mxu3 %v3711_v49 }
  0x5a   :  { %4877 = vst [vmem:[#allocation83_spill] sm:$0xff] %v3711_v49  ;;  %v3085_v42 = vld [vmem:[#allocation5 + $0xe4] sm:$0xf0]  ;;  %v2978_v47 = vld [vmem:[#allocation5 + $0x250] sm:$0xf]  ;;  %v3727_v19 = vor.u32 %v3136_v37, %v3004_v4  ;;  %769 = vmatpush.bf16.msra.mxu0 %v3717_v20 }
  0x5b   :  { %4879 = vst [vmem:[#allocation84_spill] sm:$0xff] %v3717_v20  ;;  %v3133_v30 = vld [vmem:[#allocation5 + $0x264] sm:$0xf0]  ;;  %v3082_v39 = vld [vmem:[#allocation5 + $0xd4] sm:$0xf]  ;;  %v3730_v48 = vor.u32 %v3085_v42, %v2786_v24  ;;  %783 = vmatpush.bf16.msra.mxu1 %v3722_v13 }
  0x5c   :  { %4880 = vst [vmem:[#allocation85_spill] sm:$0xff] %v3722_v13  ;;  %v2788_v31 = vld [vmem:[#allocation5 + $0xe8] sm:$0xf0]  ;;  %v3130_v32 = vld [vmem:[#allocation5 + $0x254] sm:$0xf]  ;;  %797 = vmatpush.bf16.msra.mxu2 %v3724_v10  ;;  %v3734_v53 = vor.u32 %v3133_v30, %v2978_v47 }
  0x5d   :  { %4881 = vst [vmem:[#allocation86_spill] sm:$0xff] %v3724_v10  ;;  %v2980_v40 = vld [vmem:[#allocation5 + $0x268] sm:$0xf0]  ;;  %v3736_v15 = vor.u32 %v3082_v39, %v2788_v31  ;;  %v2762_v41 = vld [vmem:[#allocation5 + $0xa0] sm:$0xf]  ;;  %811 = vmatpush.bf16.msra.mxu3 %v3727_v19 }
  0x5e   :  { %4882 = vst [vmem:[#allocation87_spill] sm:$0xff] %v3727_v19  ;;  %v3079_v37 = vld [vmem:[#allocation5 + $0xb4] sm:$0xf0]  ;;  %v2954_v4 = vld [vmem:[#allocation5 + $0x220] sm:$0xf]  ;;  %v3739_v54 = vor.u32 %v3130_v32, %v2980_v40  ;;  %770 = vmatpush.bf16.msra.mxu0 %v3730_v48 }
  0x5f   :  { %4883 = vst [vmem:[#allocation88_spill] sm:$0xff] %v3730_v48  ;;  %v3127_v49 = vld [vmem:[#allocation5 + $0x234] sm:$0xf0]  ;;  %v3076_v36 = vld [vmem:[#allocation5 + $0xa4] sm:$0xf]  ;;  %v3742_v13 = vor.u32 %v3079_v37, %v2762_v41  ;;  %784 = vmatpush.bf16.msra.mxu1 %v3734_v53 }
  0x60   :  { %4884 = vst [vmem:[#allocation89_spill] sm:$0xff] %v3734_v53  ;;  %v2764_v20 = vld [vmem:[#allocation5 + $0xb8] sm:$0xf0]  ;;  %v3124_v24 = vld [vmem:[#allocation5 + $0x224] sm:$0xf]  ;;  %798 = vmatpush.bf16.msra.mxu2 %v3736_v15  ;;  %v3746_v30 = vor.u32 %v3127_v49, %v2954_v4 }
  0x61   :  { %4885 = vst [vmem:[#allocation90_spill] sm:$0xff] %v3736_v15  ;;  %v2956_v42 = vld [vmem:[#allocation5 + $0x238] sm:$0xf0]  ;;  %v3748_v47 = vor.u32 %v3076_v36, %v2764_v20  ;;  %v2738_v39 = vld [vmem:[#allocation5 + $0x70] sm:$0xf]  ;;  %812 = vmatpush.bf16.msra.mxu3 %v3739_v54 }
  0x62   :  { %4886 = vst [vmem:[#allocation91_spill] sm:$0xff] %v3739_v54  ;;  %v3073_v32 = vld [vmem:[#allocation5 + $0x84] sm:$0xf0]  ;;  %v2930_v40 = vld [vmem:[#allocation5 + $0x1f0] sm:$0xf]  ;;  %v3751_v31 = vor.u32 %v3124_v24, %v2956_v42  ;;  %771 = vmatpush.bf16.msra.mxu0 %v3742_v13 }
  0x63   :  { %4887 = vst [vmem:[#allocation92_spill] sm:$0xff] %v3742_v13  ;;  %v3121_v19 = vld [vmem:[#allocation5 + $0x204] sm:$0xf0]  ;;  %v3070_v10 = vld [vmem:[#allocation5 + $0x74] sm:$0xf]  ;;  %v3754_v53 = vor.u32 %v3073_v32, %v2738_v39  ;;  %785 = vmatpush.bf16.msra.mxu1 %v3746_v30 }
  0x64   :  { %4888 = vst [vmem:[#allocation93_spill] sm:$0xff] %v3746_v30  ;;  %v2740_v48 = vld [vmem:[#allocation5 + $0x88] sm:$0xf0]  ;;  %v3118_v41 = vld [vmem:[#allocation5 + $0x1f4] sm:$0xf]  ;;  %799 = vmatpush.bf16.msra.mxu2 %v3748_v47  ;;  %v3758_v36 = vor.u32 %v3121_v19, %v2930_v40 }
  0x65   :  { %4889 = vst [vmem:[#allocation94_spill] sm:$0xff] %v3748_v47  ;;  %v2932_v37 = vld [vmem:[#allocation5 + $0x208] sm:$0xf0]  ;;  %v3760_v49 = vor.u32 %v3070_v10, %v2740_v48  ;;  %v2714_v20 = vld [vmem:[#allocation5 + $0x40] sm:$0xf]  ;;  %813 = vmatpush.bf16.msra.mxu3 %v3751_v31 }
  0x66   :  { %4890 = vst [vmem:[#allocation95_spill] sm:$0xff] %v3751_v31  ;;  %v3067_v4 = vld [vmem:[#allocation5 + $0x54] sm:$0xf0]  ;;  %v2906_v24 = vld [vmem:[#allocation5 + $0x1c0] sm:$0xf]  ;;  %v3763_v42 = vor.u32 %v3118_v41, %v2932_v37  ;;  %772 = vmatpush.bf16.msra.mxu0 %v3754_v53 }
  0x67   :  { %4891 = vst [vmem:[#allocation96_spill] sm:$0xff] %v3754_v53  ;;  %v3115_v54 = vld [vmem:[#allocation5 + $0x1d4] sm:$0xf0]  ;;  %v3064_v15 = vld [vmem:[#allocation5 + $0x44] sm:$0xf]  ;;  %v3766_v30 = vor.u32 %v3067_v4, %v2714_v20  ;;  %786 = vmatpush.bf16.msra.mxu1 %v3758_v36 }
  0x68   :  { %4892 = vst [vmem:[#allocation97_spill] sm:$0xff] %v3758_v36  ;;  %v2716_v13 = vld [vmem:[#allocation5 + $0x58] sm:$0xf0]  ;;  %v3112_v39 = vld [vmem:[#allocation5 + $0x1c4] sm:$0xf]  ;;  %800 = vmatpush.bf16.msra.mxu2 %v3760_v49  ;;  %v3770_v19 = vor.u32 %v3115_v54, %v2906_v24  ;;  %v4901_v24 = vld [vmem:[#allocation53_spill] sm:$0xff] }
  0x69   :  { %v2908_v32 = vld [vmem:[#allocation5 + $0x1d8] sm:$0xf0]  ;;  %v3772_v48 = vor.u32 %v3064_v15, %v2716_v13  ;;  %v2690_v10 = vld [vmem:[#allocation5 + $0x10] sm:$0xf]  ;;  %v3061_v40 = vld [vmem:[#allocation5 + $0x24] sm:$0xf0]  ;;  %814 = vmatpush.bf16.msra.mxu3 %v3763_v42 }
  0x6a   :  { %4893 = vst [vmem:[#allocation98_spill] sm:$0xff] %v3770_v19  ;;  %v2882_v41 = vld [vmem:[#allocation5 + $0x190] sm:$0xf]  ;;  %v3775_v37 = vor.u32 %v3112_v39, %v2908_v32  ;;  %v3109_v31 = vld [vmem:[#allocation5 + $0x1a4] sm:$0xf0]  ;;  %773 = vmatpush.bf16.msra.mxu0 %v3766_v30  ;;  %v3778_v36 = vor.u32 %v3061_v40, %v2690_v10  ;;  %v4903_v32 = vld [vmem:[#allocation55_spill] sm:$0xff] }
  0x6b   :  { %v3058_v47 = vld [vmem:[#allocation5 + $0x14] sm:$0xf]  ;;  %v2692_v53 = vld [vmem:[#allocation5 + $0x28] sm:$0xf0]  ;;  %787 = vmatpush.bf16.msra.mxu1 %v3770_v19  ;;  %v3782_v13 = vor.u32 %v3109_v31, %v2882_v41  ;;  %v4902_v39 = vld [vmem:[#allocation56_spill] sm:$0xff] }
  0x6c   :  { %4894 = vst [vmem:[#allocation99_spill] sm:$0xff] %v3775_v37  ;;  %v3106_v20 = vld [vmem:[#allocation5 + $0x194] sm:$0xf]  ;;  %v2884_v4 = vld [vmem:[#allocation5 + $0x1a8] sm:$0xf0]  ;;  %801 = vmatpush.bf16.msra.mxu2 %v3772_v48  ;;  %v3784_v15 = vor.u32 %v3058_v47, %v2692_v53  ;;  %v4898_v53 = vld [vmem:[#allocation52_spill] sm:$0xff] }
  0x6d   :  { %4895 = vst [vmem:[#allocation100_spill] sm:$0xff] %v3782_v13  ;;  %815 = vmatpush.bf16.msra.mxu3 %v3775_v37  ;;  %v3787_v54 = vor.u32 %v3106_v20, %v2884_v4  ;;  %v4899_v47 = vld [vmem:[#allocation51_spill] sm:$0xff]  ;;  %v4900_v31 = vld [vmem:[#allocation54_spill] sm:$0xff]  ;;  %v4905_v40 = vld [vmem:[#allocation57_spill] sm:$0xff] }
  0x6e   :  { %774 = vmatpush.bf16.msra.mxu0 %v3778_v36  ;;  %v4904_v10 = vld [vmem:[#allocation58_spill] sm:$0xff]  ;;  %v4906_v41 = vld [vmem:[#allocation60_spill] sm:$0xff]  ;;  %v4907_v20 = vld [vmem:[#allocation59_spill] sm:$0xff] }
  0x6f   :  { %4896 = vst [vmem:[#allocation101_spill] sm:$0xff] %v3787_v54  ;;  %788 = vmatpush.bf16.msra.mxu1 %v3782_v13  ;;  %v4908_v4 = vld [vmem:[#allocation62_spill] sm:$0xff] }
  0x70   :  { %802 = vmatpush.bf16.msra.mxu2 %v3784_v15 }
  0x71   :  { %816 = vmatpush.bf16.msra.mxu3 %v3787_v54  ;;  %775 = vmatmul.bf16.vlgmr.msra.gmra.mxu0 %v4878_v1 }
  0x72   :  { %906 = vmatpush.bf16.msrb.mxu0 %v3497_v3  ;;  %789 = vmatmul.bf16.vlgmr.msra.gmra.mxu1 %v4878_v1 }
  0x73   :  { %803 = vmatmul.bf16.vlgmr.msra.gmra.mxu2 %v4878_v1  ;;  %920 = vmatpush.bf16.msrb.mxu1 %v3499_v7 }
  0x74   :  { %934 = vmatpush.bf16.msrb.mxu2 %v3501_v8  ;;  %817 = vmatmul.bf16.vlgmr.msra.gmra.mxu3 %v4878_v1  ;;  %v4897_v1 = vld [vmem:[#allocation49_spill] sm:$0xff] }
  0x75   :  { %948 = vmatpush.bf16.msrb.mxu3 %v3504_v12 }
  0x76   :  { %907 = vmatpush.bf16.msrb.mxu0 %v3508_v16 }
  0x77   :  { %921 = vmatpush.bf16.msrb.mxu1 %v3510_v17 }
  0x78   :  { %935 = vmatpush.bf16.msrb.mxu2 %v3513_v21 }
  0x79   :  { %949 = vmatpush.bf16.msrb.mxu3 %v3515_v25 }
  0x7a   :  { %908 = vmatpush.bf16.msrb.mxu0 %v3518_v29 }
  0x7b   :  { %922 = vmatpush.bf16.msrb.mxu1 %v3522_v33 }
  0x7c   :  { %936 = vmatpush.bf16.msrb.mxu2 %v3524_v34 }
  0x7d   :  { %950 = vmatpush.bf16.msrb.mxu3 %v3527_v38 }
  0x7e   :  { %909 = vmatpush.bf16.msrb.mxu0 %v3530_v44 }
  0x7f   :  { %923 = vmatpush.bf16.msrb.mxu1 %v3534_v45 }
  0x80   :  { %937 = vmatpush.bf16.msrb.mxu2 %v3536_v46 }
  0x81   :  { %951 = vmatpush.bf16.msrb.mxu3 %v3539_v50 }
  0x82   :  { %910 = vmatpush.bf16.msrb.mxu0 %v3542_v56 }
  0x83   :  { %924 = vmatpush.bf16.msrb.mxu1 %v3546_v57 }
  0x84   :  { %938 = vmatpush.bf16.msrb.mxu2 %v3548_v58 }
  0x85   :  { %952 = vmatpush.bf16.msrb.mxu3 %v3551_v62 }
  0x86   :  { %911 = vmatpush.bf16.msrb.mxu0 %v3554_v5 }
  0x87   :  { %925 = vmatpush.bf16.msrb.mxu1 %v3558_v6 }
  0x88   :  { %939 = vmatpush.bf16.msrb.mxu2 %v3560_v9 }
  0x89   :  { %953 = vmatpush.bf16.msrb.mxu3 %v3563_v14 }
  0x8a   :  { %912 = vmatpush.bf16.msrb.mxu0 %v3566_v23 }
  0x8b   :  { %926 = vmatpush.bf16.msrb.mxu1 %v3570_v27 }
  0x8c   :  { %940 = vmatpush.bf16.msrb.mxu2 %v3572_v28 }
  0x8d   :  { %954 = vmatpush.bf16.msrb.mxu3 %v3575_v35 }
  0x8e   :  { %913 = vmatpush.bf16.msrb.mxu0 %v3578_v43  ;;  %v157_v43 = vld [vmem:[#allocation7] sm:$0x3] }
  0x8f   :  { %927 = vmatpush.bf16.msrb.mxu1 %v3582_v51 }
  0x90   :  { %941 = vmatpush.bf16.msrb.mxu2 %v3584_v52 }
  0x91   :  { %955 = vmatpush.bf16.msrb.mxu3 %v3587_v55 }
  0x92   :  { %962 = vmatpush.bf16.msra.mxu0 %v3589_v59  ;;  %v170_v59 = vld [vmem:[#allocation2 + $0x38] sm:$0xff] }
  0x93   :  { %976 = vmatpush.bf16.msra.mxu1 %v3591_v60 }
  0x94   :  { %990 = vmatpush.bf16.msra.mxu2 %v3593_v61 }
  0x95   :  { %1004 = vmatpush.bf16.msra.mxu3 %v3596_v2 }
  0x96   :  { %963 = vmatpush.bf16.msra.mxu0 %v3602_v18 }
  0x97   :  { %977 = vmatpush.bf16.msra.mxu1 %v4897_v1  ;;  %v4909_v1 = vld [vmem:[#allocation61_spill] sm:$0xff] }
  0x98   :  { %991 = vmatpush.bf16.msra.mxu2 %v3608_v22 }
  0x99   :  { %1005 = vmatpush.bf16.msra.mxu3 %v4899_v47  ;;  %v4910_v47 = vld [vmem:[#allocation64_spill] sm:$0xff] }
  0x9a   :  { %964 = vmatpush.bf16.msra.mxu0 %v4898_v53 }
  0x9b   :  { %978 = vmatpush.bf16.msra.mxu1 %v4901_v24  ;;  %v4912_v24 = vld [vmem:[#allocation66_spill] sm:$0xff] }
  0x9c   :  { %992 = vmatpush.bf16.msra.mxu2 %v4900_v31  ;;  %v4911_v31 = vld [vmem:[#allocation63_spill] sm:$0xff] }
  0x9d   :  { %1006 = vmatpush.bf16.msra.mxu3 %v4903_v32  ;;  %v4914_v32 = vld [vmem:[#allocation68_spill] sm:$0xff] }
  0x9e   :  { %965 = vmatpush.bf16.msra.mxu0 %v4902_v39  ;;  %v4913_v39 = vld [vmem:[#allocation65_spill] sm:$0xff] }
  0x9f   :  { %979 = vmatpush.bf16.msra.mxu1 %v4905_v40  ;;  %v4916_v40 = vld [vmem:[#allocation69_spill] sm:$0xff] }
  0xa0   :  { %993 = vmatpush.bf16.msra.mxu2 %v4904_v10  ;;  %v4915_v10 = vld [vmem:[#allocation67_spill] sm:$0xff] }
  0xa1   :  { %1007 = vmatpush.bf16.msra.mxu3 %v4907_v20 }
  0xa2   :  { %966 = vmatpush.bf16.msra.mxu0 %v4906_v41  ;;  %v163_v41 = vld [vmem:[#allocation2] sm:$0xff] }
  0xa3   :  { %980 = vmatpush.bf16.msra.mxu1 %v4909_v1  ;;  %v4917_v1 = vld [vmem:[#allocation73_spill] sm:$0xff] }
  0xa4   :  { %994 = vmatpush.bf16.msra.mxu2 %v4908_v4 }
  0xa5   :  { %1008 = vmatpush.bf16.msra.mxu3 %v4911_v31  ;;  %v4918_v31 = vld [vmem:[#allocation75_spill] sm:$0xff] }
  0xa6   :  { %967 = vmatpush.bf16.msra.mxu0 %v4910_v47 }
  0xa7   :  { %981 = vmatpush.bf16.msra.mxu1 %v4913_v39 }
  0xa8   :  { %995 = vmatpush.bf16.msra.mxu2 %v4912_v24 }
  0xa9   :  { %1009 = vmatpush.bf16.msra.mxu3 %v4915_v10 }
  0xaa   :  { %968 = vmatpush.bf16.msra.mxu0 %v4914_v32 }
  0xab   :  { %982 = vmatpush.bf16.msra.mxu1 %v4916_v40 }
  0xac   :  { %996 = vmatpush.bf16.msra.mxu2 %v3672_v11 }
  0xad   :  { %1010 = vmatpush.bf16.msra.mxu3 %v3675_v63 }
  0xae   :  { %969 = vmatpush.bf16.msra.mxu0 %v3678_v26  ;;  %v664_v24 = vpop.f32.mrf.mxu0 }
  0xaf   :  { %983 = vmatpush.bf16.msra.mxu1 %v4917_v1  ;;  %v678_v39 = vpop.f32.mrf.mxu1  ;;  %v169_v1 = vld [vmem:[#allocation2 + $0x30] sm:$0xff] }
  0xb0   :  { %997 = vmatpush.bf16.msra.mxu2 %v3684_v0  ;;  %v679_v4 = vadd.f32 %v678_v39, %v664_v24  ;;  %v164_v0 = vld [vmem:[#allocation2 + $0x8] sm:$0xff] }
  0xb1   :  { %1011 = vmatpush.bf16.msra.mxu3 %v4918_v31 }
  0xb2   :  { %v823_v26 = vadd.f32 %v679_v4, %v163_v41 }
  0xb4   :  { %v827_v60 = vmul.f32 0.5, %v823_v26  ;;  %v165_v26 = vld [vmem:[#allocation2 + $0x10] sm:$0xff] }
  0xb6   :  { %v692_v47 = vpop.f32.mrf.mxu2  ;;  %v666_v20 = vpop.f32.mrf.mxu0  ;;  %3163 = vtanh.f32 %v827_v60 }
  0xb7   :  { %v706_v32 = vpop.f32.mrf.mxu3  ;;  %v680_v10 = vpop.f32.mrf.mxu1 }
  0xb8   :  { %v707_v63 = vadd.f32 %v706_v32, %v692_v47  ;;  %v681_v55 = vadd.f32 %v680_v10, %v666_v20 }
  0xba   :  { %v824_v31 = vadd.f32 %v707_v63, %v164_v0  ;;  %v825_v18 = vadd.f32 %v681_v55, %v169_v1  ;;  %v171_v63 = vld [vmem:[#allocation2 + $0x40] sm:$0xff]  ;;  %v3861_v55 = vperm.slane %v157_v43, 0 }
  0xbc   :  { %v828_v61 = vmul.f32 0.5, %v824_v31  ;;  %v829_v39 = vmul.f32 0.5, %v825_v18  ;;  %v3164_v52 = vpop.eup %3163 }
  0xbd   :  { %v835_v20 = vmul.f32 0.5, %v3164_v52 }
  0xbe   :  { %v694_v11 = vpop.f32.mrf.mxu2  ;;  %3165 = vtanh.f32 %v828_v61 }
  0xbf   :  { %v708_v40 = vpop.f32.mrf.mxu3  ;;  %3167 = vtanh.f32 %v829_v39  ;;  %v839_v14 = vadd.f32 0.5, %v835_v20 }
  0xc0   :  { %v709_v24 = vadd.f32 %v708_v40, %v694_v11 }
  0xc2   :  { %v826_v41 = vadd.f32 %v709_v24, %v170_v59  ;;  %v172_v24 = vld [vmem:[#allocation2 + $0x48] sm:$0xff] }
  0xc4   :  { %v830_v31 = vmul.f32 0.5, %v826_v41  ;;  %v3166_v4 = vpop.eup %3165  ;;  %v3864_v41 = vperm.slane %v157_v43, 1  ;;  %v168_v43 = vld [vmem:[#allocation2 + $0x28] sm:$0xff] }
  0xc5   :  { %v836_v6 = vmul.f32 0.5, %v3166_v4 }
  0xc6   :  { %3169 = vtanh.f32 %v830_v31 }
  0xd2   :  { %v720_v53 = vpop.f32.mrf.mxu0 }
  0xd3   :  { %v734_v2 = vpop.f32.mrf.mxu1 }
  0xd4   :  { %v735_v47 = vadd.f32 %v734_v2, %v720_v53  ;;  %v3168_v2 = vpop.eup %3167  ;;  %v166_v53 = vld [vmem:[#allocation2 + $0x18] sm:$0xff] }
  0xd6   :  { %v748_v51 = vpop.f32.mrf.mxu2  ;;  %v843_v11 = vadd.f32 %v735_v47, %v165_v26  ;;  %v837_v47 = vmul.f32 0.5, %v3168_v2 }
  0xd7   :  { %v762_v22 = vpop.f32.mrf.mxu3 }
  0xd8   :  { %v763_v61 = vadd.f32 %v762_v22, %v748_v51  ;;  %v847_v52 = vmul.f32 0.5, %v843_v11  ;;  %v841_v31 = vadd.f32 0.5, %v837_v47 }
  0xda   :  { %v722_v35 = vpop.f32.mrf.mxu0  ;;  %v844_v26 = vadd.f32 %v763_v61, %v166_v53  ;;  %3171 = vtanh.f32 %v847_v52  ;;  %v173_v61 = vld [vmem:[#allocation2 + $0x50] sm:$0xff] }
  0xdb   :  { %v736_v27 = vpop.f32.mrf.mxu1 }
  0xdc   :  { %v737_v32 = vadd.f32 %v736_v27, %v722_v35  ;;  %v167_v35 = vld [vmem:[#allocation2 + $0x20] sm:$0xff]  ;;  %v848_v11 = vmul.f32 0.5, %v844_v26 }
  0xde   :  { %v750_v10 = vpop.f32.mrf.mxu2  ;;  %v845_v40 = vadd.f32 %v737_v32, %v171_v63 }
  0xdf   :  { %v764_v0 = vpop.f32.mrf.mxu3 }
  0xe0   :  { %v765_v27 = vadd.f32 %v764_v0, %v750_v10  ;;  %v849_v28 = vmul.f32 0.5, %v845_v40  ;;  %v840_v0 = vadd.f32 0.5, %v836_v6 }
  0xe2   :  { %v846_v22 = vadd.f32 %v765_v27, %v172_v24  ;;  %3173 = vtanh.f32 %v849_v28 }
  0xe4   :  { %v850_v40 = vmul.f32 0.5, %v846_v22 }
  0xee   :  { %v776_v60 = vpop.f32.mrf.mxu0 }
  0xef   :  { %v790_v1 = vpop.f32.mrf.mxu1 }
  0xf0   :  { %v791_v18 = vadd.f32 %v790_v1, %v776_v60 }
  0xf2   :  { %v863_v59 = vadd.f32 %v791_v18, %v3861_v55 }
  0xf4   :  { %v867_v39 = vmul.f32 %v863_v59, %v839_v14  ;;  %v3170_v14 = vpop.eup %3169 }
  0xf5   :  { %v838_v2 = vmul.f32 0.5, %v3170_v14  ;;  %v3172_v27 = vpop.eup %3171 }
  0xf6   :  { %v804_v23 = vpop.f32.mrf.mxu2  ;;  %v871_v32 = vadd.f32 %v867_v39, %v167_v35  ;;  %v778_v51 = vpop.f32.mrf.mxu0  ;;  %v855_v47 = vmul.f32 0.5, %v3172_v27 }
  0xf7   :  { %v818_v20 = vpop.f32.mrf.mxu3  ;;  %v792_v60 = vpop.f32.mrf.mxu1  ;;  %v842_v39 = vadd.f32 0.5, %v838_v2 }
  0xf8   :  { %v819_v63 = vadd.f32 %v818_v20, %v804_v23  ;;  %v793_v10 = vadd.f32 %v792_v60, %v778_v51  ;;  %3175 = vtanh.f32 %v871_v32  ;;  %v3174_v35 = vpop.eup %3173  ;;  %v174_v32 = vld [vmem:[#allocation2 + $0x58] sm:$0xff] }
  0xf9   :  { %3177 = vtanh.f32 %v848_v11  ;;  %v857_v20 = vmul.f32 0.5, %v3174_v35 }
  0xfa   :  { %v864_v1 = vadd.f32 %v819_v63, %v3864_v41  ;;  %v865_v18 = vadd.f32 %v793_v10, %v3861_v55  ;;  %3179 = vtanh.f32 %v850_v40  ;;  %v859_v10 = vadd.f32 0.5, %v855_v47  ;;  %v4920_v47 = vld [vmem:[#allocation78_spill] sm:$0xff] }
  0xfc   :  { %v868_v4 = vmul.f32 %v864_v1, %v840_v0  ;;  %v869_v59 = vmul.f32 %v865_v18, %v841_v31  ;;  %v861_v31 = vadd.f32 0.5, %v857_v20  ;;  %v4921_v20 = vld [vmem:[#allocation80_spill] sm:$0xff] }
  0xfe   :  { %v872_v23 = vadd.f32 %v868_v4, %v168_v43  ;;  %v806_v53 = vpop.f32.mrf.mxu2  ;;  %v873_v6 = vadd.f32 %v869_v59, %v173_v61  ;;  %v3176_v24 = vpop.eup %3175 }
  0xff   :  { %v820_v28 = vpop.f32.mrf.mxu3  ;;  %v879_v51 = vsub.f32 0.0, %v3176_v24  ;;  %v3178_v63 = vpop.eup %3177 }
 0x100   :  { %v821_v52 = vadd.f32 %v820_v28, %v806_v53  ;;  %3181 = vtanh.f32 %v873_v6  ;;  %v3180_v60 = vpop.eup %3179  ;;  %v856_v18 = vmul.f32 0.5, %v3178_v63  ;;  %v4924_v63 = vld [vmem:[#allocation79_spill] sm:$0xff] }
 0x101   :  { %3183 = vtanh.f32 %v872_v23  ;;  %v883_v11 = vmul.f32 %v879_v51, %v859_v10  ;;  %v858_v4 = vmul.f32 0.5, %v3180_v60  ;;  %v4922_v51 = vld [vmem:[#allocation82_spill] sm:$0xff]  ;;  %v4925_v60 = vld [vmem:[#allocation84_spill] sm:$0xff] }
 0x102   :  { %v866_v26 = vadd.f32 %v821_v52, %v3864_v41  ;;  %v860_v23 = vadd.f32 0.5, %v856_v18  ;;  %v4926_v10 = vld [vmem:[#allocation86_spill] sm:$0xff]  ;;  %v4933_v18 = vld [vmem:[#allocation92_spill] sm:$0xff] }
 0x103   :  { %v3869_v59 = vadd.f32 %v3176_v24, %v883_v11  ;;  %v862_v6 = vadd.f32 0.5, %v858_v4  ;;  %v4931_v11 = vld [vmem:[#allocation85_spill] sm:$0xff] }
 0x104   :  { %v870_v22 = vmul.f32 %v866_v26, %v842_v39  ;;  %v4919_v39 = vld [vmem:[#allocation76_spill] sm:$0xff]  ;;  %v4935_v4 = vld [vmem:[#allocation89_spill] sm:$0xff] }
 0x106   :  { %v874_v0 = vadd.f32 %v870_v22, %v174_v32  ;;  %v3182_v1 = vpop.eup %3181  ;;  %v4923_v22 = vld [vmem:[#allocation77_spill] sm:$0xff] }
 0x107   :  { %v3184_v14 = vpop.eup %3183  ;;  %v881_v43 = vsub.f32 0.0, %v3182_v1 }
 0x108   :  { %3185 = vtanh.f32 %v874_v0  ;;  %v880_v61 = vsub.f32 0.0, %v3184_v14  ;;  %v4927_v0 = vld [vmem:[#allocation81_spill] sm:$0xff] }
 0x109   :  { %v885_v40 = vmul.f32 %v881_v43, %v861_v31  ;;  %v4930_v31 = vld [vmem:[#allocation90_spill] sm:$0xff]  ;;  %v4932_v43 = vld [vmem:[#allocation87_spill] sm:$0xff] }
 0x10a   :  { %v884_v28 = vmul.f32 %v880_v61, %v860_v23  ;;  %v4936_v61 = vld [vmem:[#allocation91_spill] sm:$0xff]  ;;  %v4937_v23 = vld [vmem:[#allocation96_spill] sm:$0xff] }
 0x10b   :  { %v3871_v2 = vadd.f32 %v3182_v1, %v885_v40  ;;  %v4928_v1 = vld [vmem:[#allocation83_spill] sm:$0xff]  ;;  %v4934_v40 = vld [vmem:[#allocation94_spill] sm:$0xff] }
 0x10c   :  { %v3877_v26 = vadd.f32 %v3184_v14, %v884_v28  ;;  %v4929_v14 = vld [vmem:[#allocation88_spill] sm:$0xff]  ;;  %v4940_v28 = vld [vmem:[#allocation97_spill] sm:$0xff] }
 0x10d   :  { %v904_v27 = vpack.c.bf16 %v3871_v2, %v3869_v59 }
 0x10e   :  { %v3186_v53 = vpop.eup %3185 }
 0x10f   :  { %v882_v35 = vsub.f32 0.0, %v3186_v53  ;;  %914 = vmatmul.bf16.vlgmr.msrb.gmra.mxu0 %v904_v27  ;;  %942 = vmatmul.bf16.vlgmr.msrb.gmra.mxu2 %v904_v27 }
 0x110   :  { %1018 = vmatpush.bf16.msrb.mxu0 %v4919_v39  ;;  %1046 = vmatpush.bf16.msrb.mxu2 %v4920_v47 }
 0x111   :  { %v886_v52 = vmul.f32 %v882_v35, %v862_v6  ;;  %v4939_v6 = vld [vmem:[#allocation95_spill] sm:$0xff]  ;;  %v4942_v35 = vld [vmem:[#allocation38_spill] sm:$0xff] }
 0x113   :  { %v3879_v24 = vadd.f32 %v3186_v53, %v886_v52  ;;  %v4938_v53 = vld [vmem:[#allocation93_spill] sm:$0xff] }
 0x114   :  { %1019 = vmatpush.bf16.msrb.mxu0 %v4921_v20  ;;  %1047 = vmatpush.bf16.msrb.mxu2 %v4922_v51  ;;  %v4943_v52 = vld [vmem:[#allocation33_spill] sm:$0xff] }
 0x115   :  { %v905_v32 = vpack.c.bf16 %v3879_v24, %v3877_v26 }
 0x117   :  { %928 = vmatmul.bf16.vlgmr.msrb.gmra.mxu1 %v905_v32  ;;  %956 = vmatmul.bf16.vlgmr.msrb.gmra.mxu3 %v905_v32 }
 0x118   :  { %1032 = vmatpush.bf16.msrb.mxu1 %v4923_v22  ;;  %1060 = vmatpush.bf16.msrb.mxu3 %v4924_v63 }
 0x119   :  { %1020 = vmatpush.bf16.msrb.mxu0 %v4925_v60  ;;  %1048 = vmatpush.bf16.msrb.mxu2 %v4926_v10 }
 0x11c   :  { %1033 = vmatpush.bf16.msrb.mxu1 %v4927_v0  ;;  %1061 = vmatpush.bf16.msrb.mxu3 %v4928_v1 }
 0x11d   :  { %1021 = vmatpush.bf16.msrb.mxu0 %v4929_v14  ;;  %1049 = vmatpush.bf16.msrb.mxu2 %v4930_v31 }
 0x11f   :  { %970 = vmatmul.bf16.vlgmr.msra.gmra.mxu0 %v904_v27  ;;  %998 = vmatmul.bf16.vlgmr.msra.gmra.mxu2 %v904_v27 }
 0x120   :  { %1034 = vmatpush.bf16.msrb.mxu1 %v4931_v11  ;;  %1062 = vmatpush.bf16.msrb.mxu3 %v4932_v43 }
 0x121   :  { %1022 = vmatpush.bf16.msrb.mxu0 %v4933_v18  ;;  %1050 = vmatpush.bf16.msrb.mxu2 %v4934_v40 }
 0x124   :  { %1035 = vmatpush.bf16.msrb.mxu1 %v4935_v4  ;;  %1063 = vmatpush.bf16.msrb.mxu3 %v4936_v61 }
 0x125   :  { %1023 = vmatpush.bf16.msrb.mxu0 %v4937_v23  ;;  %1051 = vmatpush.bf16.msrb.mxu2 %v3760_v49 }
 0x127   :  { %984 = vmatmul.bf16.vlgmr.msra.gmra.mxu1 %v905_v32  ;;  %1012 = vmatmul.bf16.vlgmr.msra.gmra.mxu3 %v905_v32 }
 0x128   :  { %1036 = vmatpush.bf16.msrb.mxu1 %v4938_v53  ;;  %1064 = vmatpush.bf16.msrb.mxu3 %v4939_v6 }
 0x129   :  { %1024 = vmatpush.bf16.msrb.mxu0 %v3766_v30  ;;  %1052 = vmatpush.bf16.msrb.mxu2 %v3772_v48 }
 0x12c   :  { %1037 = vmatpush.bf16.msrb.mxu1 %v4940_v28  ;;  %1065 = vmatpush.bf16.msrb.mxu3 %v3763_v42 }
 0x12d   :  { %1025 = vmatpush.bf16.msrb.mxu0 %v3778_v36  ;;  %1053 = vmatpush.bf16.msrb.mxu2 %v3784_v15 }
 0x130   :  { %1038 = vmatpush.bf16.msrb.mxu1 %v3770_v19  ;;  %1066 = vmatpush.bf16.msrb.mxu3 %v3775_v37 }
 0x131   :  { %1157 = vmatpush.bf16.msra.mxu0 %v3497_v3  ;;  %1185 = vmatpush.bf16.msra.mxu2 %v3501_v8  ;;  %v895_v3 = vld [vmem:[#allocation2 + $0x78] sm:$0xff] }
 0x132   :  { %1026 = vmatmul.bf16.vlgmr.msrb.gmra.mxu0 %v904_v27  ;;  %1054 = vmatmul.bf16.vlgmr.msrb.gmra.mxu2 %v904_v27  ;;  %v4941_v27 = vld [vmem:[#allocation36_spill] sm:$0xff] }
 0x134   :  { %1039 = vmatpush.bf16.msrb.mxu1 %v3782_v13  ;;  %1067 = vmatpush.bf16.msrb.mxu3 %v3787_v54 }
 0x135   :  { %1158 = vmatpush.bf16.msra.mxu0 %v3508_v16  ;;  %1186 = vmatpush.bf16.msra.mxu2 %v3513_v21 }
 0x137   :  { %1040 = vmatmul.bf16.vlgmr.msrb.gmra.mxu1 %v905_v32  ;;  %1068 = vmatmul.bf16.vlgmr.msrb.gmra.mxu3 %v905_v32  ;;  %v4944_v32 = vld [vmem:[#allocation35_spill] sm:$0xff] }
 0x138   :  { %1171 = vmatpush.bf16.msra.mxu1 %v3499_v7  ;;  %1199 = vmatpush.bf16.msra.mxu3 %v3504_v12 }
 0x139   :  { %1159 = vmatpush.bf16.msra.mxu0 %v3518_v29  ;;  %1187 = vmatpush.bf16.msra.mxu2 %v3524_v34  ;;  %v898_v29 = vld [vmem:[#allocation2 + $0x90] sm:$0xff] }
 0x13c   :  { %1172 = vmatpush.bf16.msra.mxu1 %v3510_v17  ;;  %1200 = vmatpush.bf16.msra.mxu3 %v3515_v25 }
 0x13d   :  { %1160 = vmatpush.bf16.msra.mxu0 %v3530_v44  ;;  %1188 = vmatpush.bf16.msra.mxu2 %v3536_v46 }
 0x140   :  { %1173 = vmatpush.bf16.msra.mxu1 %v3522_v33  ;;  %1201 = vmatpush.bf16.msra.mxu3 %v3527_v38 }
 0x141   :  { %1161 = vmatpush.bf16.msra.mxu0 %v3542_v56  ;;  %1189 = vmatpush.bf16.msra.mxu2 %v3548_v58  ;;  %v4945_v58 = vld [vmem:[#allocation40_spill] sm:$0xff] }
 0x144   :  { %1174 = vmatpush.bf16.msra.mxu1 %v3534_v45  ;;  %1202 = vmatpush.bf16.msra.mxu3 %v3539_v50  ;;  %v4946_v45 = vld [vmem:[#allocation42_spill] sm:$0xff]  ;;  %v4947_v50 = vld [vmem:[#allocation44_spill] sm:$0xff] }
 0x145   :  { %1162 = vmatpush.bf16.msra.mxu0 %v3554_v5  ;;  %1190 = vmatpush.bf16.msra.mxu2 %v3560_v9  ;;  %v4948_v5 = vld [vmem:[#allocation46_spill] sm:$0xff]  ;;  %v4949_v9 = vld [vmem:[#allocation37_spill] sm:$0xff] }
 0x148   :  { %1175 = vmatpush.bf16.msra.mxu1 %v3546_v57  ;;  %1203 = vmatpush.bf16.msra.mxu3 %v3551_v62  ;;  %v4950_v57 = vld [vmem:[#allocation39_spill] sm:$0xff]  ;;  %v4951_v62 = vld [vmem:[#allocation48_spill] sm:$0xff] }
 0x149   :  { %1163 = vmatpush.bf16.msra.mxu0 %v4941_v27  ;;  %1191 = vmatpush.bf16.msra.mxu2 %v4942_v35  ;;  %v4952_v27 = vld [vmem:[#allocation50_spill] sm:$0xff]  ;;  %v4953_v35 = vld [vmem:[#allocation41_spill] sm:$0xff] }
 0x14c   :  { %1176 = vmatpush.bf16.msra.mxu1 %v4943_v52  ;;  %1204 = vmatpush.bf16.msra.mxu3 %v4944_v32  ;;  %v4954_v52 = vld [vmem:[#allocation43_spill] sm:$0xff]  ;;  %v4955_v32 = vld [vmem:[#allocation45_spill] sm:$0xff] }
 0x14d   :  { %1164 = vmatpush.bf16.msra.mxu0 %v4945_v58  ;;  %1192 = vmatpush.bf16.msra.mxu2 %v4946_v45  ;;  %v4956_v58 = vld [vmem:[#allocation47_spill] sm:$0xff]  ;;  %v4957_v45 = vld [vmem:[#allocation52_spill] sm:$0xff] }
 0x150   :  { %1177 = vmatpush.bf16.msra.mxu1 %v4949_v9  ;;  %1205 = vmatpush.bf16.msra.mxu3 %v4950_v57  ;;  %v4960_v9 = vld [vmem:[#allocation51_spill] sm:$0xff]  ;;  %v4961_v57 = vld [vmem:[#allocation56_spill] sm:$0xff] }
 0x151   :  { %1213 = vmatpush.bf16.msrb.mxu0 %v4947_v50  ;;  %1241 = vmatpush.bf16.msrb.mxu2 %v4948_v5  ;;  %v4958_v50 = vld [vmem:[#allocation54_spill] sm:$0xff]  ;;  %v4959_v5 = vld [vmem:[#allocation49_spill] sm:$0xff] }
 0x154   :  { %1178 = vmatpush.bf16.msra.mxu1 %v4953_v35  ;;  %1206 = vmatpush.bf16.msra.mxu3 %v4954_v52  ;;  %v4964_v35 = vld [vmem:[#allocation55_spill] sm:$0xff]  ;;  %v4965_v52 = vld [vmem:[#allocation60_spill] sm:$0xff] }
 0x155   :  { %1214 = vmatpush.bf16.msrb.mxu0 %v4951_v62  ;;  %1242 = vmatpush.bf16.msrb.mxu2 %v4952_v27  ;;  %v4962_v62 = vld [vmem:[#allocation58_spill] sm:$0xff]  ;;  %v4963_v27 = vld [vmem:[#allocation53_spill] sm:$0xff] }
 0x158   :  { %1227 = vmatpush.bf16.msrb.mxu1 %v4955_v32  ;;  %1255 = vmatpush.bf16.msrb.mxu3 %v4956_v58  ;;  %v4966_v32 = vld [vmem:[#allocation62_spill] sm:$0xff]  ;;  %v4967_v58 = vld [vmem:[#allocation57_spill] sm:$0xff] }
 0x159   :  { %1215 = vmatpush.bf16.msrb.mxu0 %v4957_v45  ;;  %1243 = vmatpush.bf16.msrb.mxu2 %v4958_v50  ;;  %v4968_v45 = vld [vmem:[#allocation59_spill] sm:$0xff]  ;;  %v4969_v50 = vld [vmem:[#allocation64_spill] sm:$0xff] }
 0x15c   :  { %1228 = vmatpush.bf16.msrb.mxu1 %v4959_v5  ;;  %1256 = vmatpush.bf16.msrb.mxu3 %v4960_v9  ;;  %v4970_v5 = vld [vmem:[#allocation66_spill] sm:$0xff]  ;;  %v4971_v9 = vld [vmem:[#allocation61_spill] sm:$0xff] }
 0x15d   :  { %1216 = vmatpush.bf16.msrb.mxu0 %v4961_v57  ;;  %1244 = vmatpush.bf16.msrb.mxu2 %v4962_v62  ;;  %v4972_v57 = vld [vmem:[#allocation63_spill] sm:$0xff]  ;;  %v4973_v62 = vld [vmem:[#allocation68_spill] sm:$0xff] }
 0x160   :  { %1229 = vmatpush.bf16.msrb.mxu1 %v4963_v27  ;;  %1257 = vmatpush.bf16.msrb.mxu3 %v4964_v35  ;;  %v4974_v27 = vld [vmem:[#allocation70_spill] sm:$0xff]  ;;  %v4975_v35 = vld [vmem:[#allocation65_spill] sm:$0xff] }
 0x161   :  { %1217 = vmatpush.bf16.msrb.mxu0 %v4965_v52  ;;  %1245 = vmatpush.bf16.msrb.mxu2 %v4966_v32  ;;  %v4976_v52 = vld [vmem:[#allocation67_spill] sm:$0xff]  ;;  %v4977_v32 = vld [vmem:[#allocation72_spill] sm:$0xff] }
 0x164   :  { %1230 = vmatpush.bf16.msrb.mxu1 %v4967_v58  ;;  %1258 = vmatpush.bf16.msrb.mxu3 %v4968_v45  ;;  %v4978_v58 = vld [vmem:[#allocation74_spill] sm:$0xff]  ;;  %v4979_v45 = vld [vmem:[#allocation69_spill] sm:$0xff] }
 0x165   :  { %1218 = vmatpush.bf16.msrb.mxu0 %v4969_v50  ;;  %1246 = vmatpush.bf16.msrb.mxu2 %v4970_v5  ;;  %v4980_v50 = vld [vmem:[#allocation71_spill] sm:$0xff]  ;;  %v4981_v5 = vld [vmem:[#allocation73_spill] sm:$0xff] }
 0x168   :  { %1231 = vmatpush.bf16.msrb.mxu1 %v4971_v9  ;;  %1259 = vmatpush.bf16.msrb.mxu3 %v4972_v57  ;;  %v4982_v9 = vld [vmem:[#allocation75_spill] sm:$0xff] }
 0x169   :  { %1219 = vmatpush.bf16.msrb.mxu0 %v4973_v62  ;;  %1247 = vmatpush.bf16.msrb.mxu2 %v4974_v27 }
 0x16c   :  { %1232 = vmatpush.bf16.msrb.mxu1 %v4975_v35  ;;  %1260 = vmatpush.bf16.msrb.mxu3 %v4976_v52 }
 0x16d   :  { %1220 = vmatpush.bf16.msrb.mxu0 %v4977_v32  ;;  %1248 = vmatpush.bf16.msrb.mxu2 %v4978_v58  ;;  %v892_v32 = vld [vmem:[#allocation2 + $0x60] sm:$0xff] }
 0x170   :  { %1233 = vmatpush.bf16.msrb.mxu1 %v4979_v45  ;;  %1261 = vmatpush.bf16.msrb.mxu3 %v4980_v50  ;;  %v893_v50 = vld [vmem:[#allocation2 + $0x68] sm:$0xff] }
 0x174   :  { %1234 = vmatpush.bf16.msrb.mxu1 %v4981_v5  ;;  %1262 = vmatpush.bf16.msrb.mxu3 %v4982_v9 }
 0x18c   :  { %v915_v57 = vpop.f32.mrf.mxu0 }
 0x192   :  { %v943_v62 = vpop.f32.mrf.mxu2 }
 0x194   :  { %v929_v56 = vpop.f32.mrf.mxu1  ;;  %v917_v27 = vpop.f32.mrf.mxu0 }
 0x195   :  { %v930_v52 = vadd.f32 %v929_v56, %v915_v57  ;;  %v899_v57 = vld [vmem:[#allocation2 + $0x98] sm:$0xff] }
 0x197   :  { %v1074_v44 = vadd.f32 %v930_v52, %v892_v32  ;;  %v894_v32 = vld [vmem:[#allocation2 + $0x70] sm:$0xff] }
 0x199   :  { %v1078_v5 = vmul.f32 0.5, %v1074_v44 }
 0x19a   :  { %v957_v38 = vpop.f32.mrf.mxu3  ;;  %v945_v35 = vpop.f32.mrf.mxu2 }
 0x19b   :  { %v958_v25 = vadd.f32 %v957_v38, %v943_v62  ;;  %3187 = vtanh.f32 %v1078_v5 }
 0x19c   :  { %v931_v33 = vpop.f32.mrf.mxu1  ;;  %v971_v46 = vpop.f32.mrf.mxu0 }
 0x19d   :  { %v932_v34 = vadd.f32 %v931_v33, %v917_v27  ;;  %v1075_v9 = vadd.f32 %v958_v25, %v893_v50  ;;  %v900_v50 = vld [vmem:[#allocation2 + $0xa0] sm:$0xff] }
 0x19f   :  { %v1076_v7 = vadd.f32 %v932_v34, %v898_v29  ;;  %v1079_v13 = vmul.f32 0.5, %v1075_v9 }
 0x1a1   :  { %v1080_v56 = vmul.f32 0.5, %v1076_v7  ;;  %v3188_v52 = vpop.eup %3187  ;;  %3189 = vtanh.f32 %v1079_v13 }
 0x1a2   :  { %v959_v58 = vpop.f32.mrf.mxu3  ;;  %v999_v17 = vpop.f32.mrf.mxu2  ;;  %v1086_v25 = vmul.f32 0.5, %v3188_v52 }
 0x1a3   :  { %v960_v21 = vadd.f32 %v959_v58, %v945_v35  ;;  %3191 = vtanh.f32 %v1080_v56 }
 0x1a4   :  { %v985_v45 = vpop.f32.mrf.mxu1  ;;  %v973_v12 = vpop.f32.mrf.mxu0  ;;  %v1090_v8 = vadd.f32 0.5, %v1086_v25 }
 0x1a5   :  { %v1077_v38 = vadd.f32 %v960_v21, %v899_v57  ;;  %v986_v62 = vadd.f32 %v985_v45, %v971_v46  ;;  %v901_v45 = vld [vmem:[#allocation2 + $0xa8] sm:$0xff] }
 0x1a7   :  { %v1081_v29 = vmul.f32 0.5, %v1077_v38  ;;  %v1094_v5 = vadd.f32 %v986_v62, %v894_v32  ;;  %v3190_v58 = vpop.eup %3189 }
 0x1a8   :  { %v1087_v46 = vmul.f32 0.5, %v3190_v58  ;;  %v902_v58 = vld [vmem:[#allocation2 + $0xb0] sm:$0xff] }
 0x1a9   :  { %v3192_v19 = vpop.eup %3191  ;;  %3193 = vtanh.f32 %v1081_v29  ;;  %v1098_v56 = vmul.f32 0.5, %v1094_v5  ;;  %v897_v5 = vld [vmem:[#allocation2 + $0x88] sm:$0xff] }
 0x1aa   :  { %v1013_v54 = vpop.f32.mrf.mxu3  ;;  %v1001_v37 = vpop.f32.mrf.mxu2  ;;  %v1088_v52 = vmul.f32 0.5, %v3192_v19 }
 0x1ab   :  { %v1014_v35 = vadd.f32 %v1013_v54, %v999_v17  ;;  %3195 = vtanh.f32 %v1098_v56 }
 0x1ac   :  { %v987_v16 = vpop.f32.mrf.mxu1 }
 0x1ad   :  { %v988_v33 = vadd.f32 %v987_v16, %v973_v12  ;;  %v896_v12 = vld [vmem:[#allocation2 + $0x80] sm:$0xff]  ;;  %v1095_v38 = vadd.f32 %v1014_v35, %v895_v3 }
 0x1af   :  { %v1027_v44 = vpop.f32.mrf.mxu0  ;;  %v1096_v7 = vadd.f32 %v988_v33, %v900_v50  ;;  %v1091_v50 = vadd.f32 0.5, %v1087_v46  ;;  %v3194_v29 = vpop.eup %3193 }
 0x1b0   :  { %v1089_v35 = vmul.f32 0.5, %v3194_v29 }
 0x1b1   :  { %v1100_v62 = vmul.f32 0.5, %v1096_v7 }
 0x1b2   :  { %v1015_v27 = vpop.f32.mrf.mxu3 }
 0x1b3   :  { %v1016_v13 = vadd.f32 %v1015_v27, %v1001_v37  ;;  %3197 = vtanh.f32 %v1100_v62 }
 0x1b4   :  { %v1041_v34 = vpop.f32.mrf.mxu1 }
 0x1b5   :  { %v1042_v9 = vadd.f32 %v1041_v34, %v1027_v44  ;;  %v1055_v16 = vpop.f32.mrf.mxu2  ;;  %v1097_v44 = vadd.f32 %v1016_v13, %v901_v45  ;;  %v1092_v34 = vadd.f32 0.5, %v1088_v52  ;;  %v1093_v52 = vadd.f32 0.5, %v1089_v35 }
 0x1b7   :  { %v1114_v21 = vadd.f32 %v1042_v9, %v3861_v55  ;;  %v1029_v33 = vpop.f32.mrf.mxu0  ;;  %v1099_v9 = vmul.f32 0.5, %v1095_v38 }
 0x1b9   :  { %v1118_v57 = vmul.f32 %v1114_v21, %v1090_v8  ;;  %v1101_v8 = vmul.f32 0.5, %v1097_v44 }
 0x1ba   :  { %v1069_v32 = vpop.f32.mrf.mxu3 }
 0x1bb   :  { %v1122_v17 = vadd.f32 %v1118_v57, %v896_v12  ;;  %v1070_v54 = vadd.f32 %v1069_v32, %v1055_v16  ;;  %v3196_v12 = vpop.eup %3195  ;;  %v903_v32 = vld [vmem:[#allocation2 + $0xb8] sm:$0xff] }
 0x1bc   :  { %v1043_v25 = vpop.f32.mrf.mxu1  ;;  %v3198_v56 = vpop.eup %3197  ;;  %v1106_v62 = vmul.f32 0.5, %v3196_v12 }
 0x1bd   :  { %v1115_v37 = vadd.f32 %v1070_v54, %v3864_v41  ;;  %v1044_v27 = vadd.f32 %v1043_v25, %v1029_v33  ;;  %3199 = vtanh.f32 %v1122_v17  ;;  %v1057_v21 = vpop.f32.mrf.mxu2  ;;  %v1108_v54 = vmul.f32 0.5, %v3198_v56 }
 0x1be   :  { %3201 = vtanh.f32 %v1099_v9 }
 0x1bf   :  { %v1119_v3 = vmul.f32 %v1115_v37, %v1091_v50  ;;  %v1116_v19 = vadd.f32 %v1044_v27, %v3861_v55  ;;  %3203 = vtanh.f32 %v1101_v8  ;;  %v1110_v27 = vadd.f32 0.5, %v1106_v62  ;;  %v4987_v62 = vld [vmem:[#allocation16_spill] sm:$0xff] }
 0x1c0   :  { %v1112_v9 = vadd.f32 0.5, %v1108_v54  ;;  %v4991_v54 = vld [vmem:[#allocation13_spill] sm:$0xff] }
 0x1c1   :  { %v1123_v7 = vadd.f32 %v1119_v3, %v897_v5  ;;  %v1120_v13 = vmul.f32 %v1116_v19, %v1092_v34 }
 0x1c2   :  { %v1071_v45 = vpop.f32.mrf.mxu3 }
 0x1c3   :  { %v1124_v16 = vadd.f32 %v1120_v13, %v902_v58  ;;  %v1072_v46 = vadd.f32 %v1071_v45, %v1057_v21  ;;  %3205 = vtanh.f32 %v1123_v7  ;;  %v3200_v57 = vpop.eup %3199 }
 0x1c4   :  { %v3202_v17 = vpop.eup %3201  ;;  %v1130_v33 = vsub.f32 %v3869_v59, %v3200_v57 }
 0x1c5   :  { %3207 = vtanh.f32 %v1124_v16  ;;  %v1117_v38 = vadd.f32 %v1072_v46, %v3864_v41  ;;  %v3204_v25 = vpop.eup %3203  ;;  %v1107_v34 = vmul.f32 0.5, %v3202_v17  ;;  %v4990_v17 = vld [vmem:[#allocation101_spill] sm:$0xff] }
 0x1c6   :  { %v1134_v5 = vmul.f32 %v1130_v33, %v1110_v27  ;;  %v1109_v3 = vmul.f32 0.5, %v3204_v25  ;;  %v4992_v33 = vld [vmem:[#allocation15_spill] sm:$0xff]  ;;  %v4993_v25 = vld [vmem:[#allocation20_spill] sm:$0xff] }
 0x1c7   :  { %v1121_v44 = vmul.f32 %v1117_v38, %v1093_v52  ;;  %v1111_v35 = vadd.f32 0.5, %v1107_v34  ;;  %v4985_v52 = vld [vmem:[#allocation98_spill] sm:$0xff]  ;;  %v4986_v38 = vld [vmem:[#allocation99_spill] sm:$0xff] }
 0x1c8   :  { %v3984_v7 = vadd.f32 %v3200_v57, %v1134_v5  ;;  %v1113_v21 = vadd.f32 0.5, %v1109_v3  ;;  %v4984_v57 = vld [vmem:[#allocation14_spill] sm:$0xff]  ;;  %v4996_v27 = vld [vmem:[#allocation19_spill] sm:$0xff] }
 0x1c9   :  { %v1125_v50 = vadd.f32 %v1121_v44, %v903_v32  ;;  %v3206_v37 = vpop.eup %3205  ;;  %v4988_v32 = vld [vmem:[#allocation18_spill] sm:$0xff]  ;;  %v4989_v44 = vld [vmem:[#allocation100_spill] sm:$0xff]  ;;  %v5000_v5 = vld [vmem:[#allocation23_spill] sm:$0xff] }
 0x1ca   :  { %v1131_v19 = vsub.f32 %v3877_v26, %v3206_v37  ;;  %v4998_v34 = vld [vmem:[#allocation26_spill] sm:$0xff] }
 0x1cb   :  { %v3208_v29 = vpop.eup %3207  ;;  %3209 = vtanh.f32 %v1125_v50  ;;  %v4994_v50 = vld [vmem:[#allocation22_spill] sm:$0xff] }
 0x1cc   :  { %v1132_v8 = vsub.f32 %v3871_v2, %v3208_v29  ;;  %v1135_v45 = vmul.f32 %v1131_v19, %v1111_v35  ;;  %v5002_v3 = vld [vmem:[#allocation30_spill] sm:$0xff]  ;;  %v5003_v19 = vld [vmem:[#allocation25_spill] sm:$0xff]  ;;  %v5005_v35 = vld [vmem:[#allocation32_spill] sm:$0xff] }
 0x1ce   :  { %v1136_v58 = vmul.f32 %v1132_v8, %v1112_v9  ;;  %v3993_v2 = vadd.f32 %v3206_v37, %v1135_v45  ;;  %v4995_v37 = vld [vmem:[#allocation17_spill] sm:$0xff]  ;;  %v5001_v8 = vld [vmem:[#allocation28_spill] sm:$0xff]  ;;  %v5008_v45 = vld [vmem:[#allocation31_spill] sm:$0xff] }
 0x1cf   :  { %v4999_v9 = vld [vmem:[#allocation21_spill] sm:$0xff] }
 0x1d0   :  { %v3986_v13 = vadd.f32 %v3208_v29, %v1136_v58  ;;  %v4997_v29 = vld [vmem:[#allocation24_spill] sm:$0xff]  ;;  %v5004_v58 = vld [vmem:[#allocation27_spill] sm:$0xff] }
 0x1d1   :  { %v3210_v59 = vpop.eup %3209 }
 0x1d2   :  { %v1155_v12 = vpack.c.bf16 %v3986_v13, %v3984_v7  ;;  %v1133_v16 = vsub.f32 %v3879_v24, %v3210_v59  ;;  %v4983_v24 = vld [vmem:[#allocation12_spill] sm:$0xff] }
 0x1d4   :  { %v1137_v46 = vmul.f32 %v1133_v16, %v1113_v21  ;;  %1165 = vmatmul.bf16.vlgmr.msra.gmra.mxu0 %v1155_v12  ;;  %1193 = vmatmul.bf16.vlgmr.msra.gmra.mxu2 %v1155_v12  ;;  %v5007_v21 = vld [vmem:[#allocation29_spill] sm:$0xff]  ;;  %v5010_v16 = vld [vmem:[#allocation38_spill] sm:$0xff] }
 0x1d5   :  { %1269 = vmatpush.bf16.msra.mxu0 %v4919_v39  ;;  %1297 = vmatpush.bf16.msra.mxu2 %v4920_v47 }
 0x1d6   :  { %v3995_v26 = vadd.f32 %v3210_v59, %v1137_v46  ;;  %v5006_v59 = vld [vmem:[#allocation34_spill] sm:$0xff]  ;;  %v5011_v46 = vld [vmem:[#allocation33_spill] sm:$0xff] }
 0x1d8   :  { %v1156_v56 = vpack.c.bf16 %v3995_v26, %v3993_v2 }
 0x1d9   :  { %1270 = vmatpush.bf16.msra.mxu0 %v4921_v20  ;;  %1298 = vmatpush.bf16.msra.mxu2 %v4922_v51 }
 0x1da   :  { %1179 = vmatmul.bf16.vlgmr.msra.gmra.mxu1 %v1156_v56  ;;  %1207 = vmatmul.bf16.vlgmr.msra.gmra.mxu3 %v1156_v56 }
 0x1db   :  { %1283 = vmatpush.bf16.msra.mxu1 %v4923_v22  ;;  %1311 = vmatpush.bf16.msra.mxu3 %v4924_v63 }
 0x1dd   :  { %1271 = vmatpush.bf16.msra.mxu0 %v4925_v60  ;;  %1299 = vmatpush.bf16.msra.mxu2 %v4926_v10 }
 0x1df   :  { %1284 = vmatpush.bf16.msra.mxu1 %v4927_v0  ;;  %1312 = vmatpush.bf16.msra.mxu3 %v4928_v1 }
 0x1e1   :  { %1272 = vmatpush.bf16.msra.mxu0 %v4929_v14  ;;  %1300 = vmatpush.bf16.msra.mxu2 %v4930_v31 }
 0x1e3   :  { %1285 = vmatpush.bf16.msra.mxu1 %v4931_v11  ;;  %1313 = vmatpush.bf16.msra.mxu3 %v4932_v43 }
 0x1e4   :  { %1221 = vmatmul.bf16.vlgmr.msrb.gmra.mxu0 %v1155_v12  ;;  %1249 = vmatmul.bf16.vlgmr.msrb.gmra.mxu2 %v1155_v12 }
 0x1e5   :  { %1273 = vmatpush.bf16.msra.mxu0 %v4933_v18  ;;  %1301 = vmatpush.bf16.msra.mxu2 %v4934_v40 }
 0x1e7   :  { %1286 = vmatpush.bf16.msra.mxu1 %v4935_v4  ;;  %1314 = vmatpush.bf16.msra.mxu3 %v4936_v61 }
 0x1e9   :  { %1274 = vmatpush.bf16.msra.mxu0 %v4937_v23  ;;  %1302 = vmatpush.bf16.msra.mxu2 %v3760_v49 }
 0x1ea   :  { %1235 = vmatmul.bf16.vlgmr.msrb.gmra.mxu1 %v1156_v56  ;;  %1263 = vmatmul.bf16.vlgmr.msrb.gmra.mxu3 %v1156_v56 }
 0x1eb   :  { %1287 = vmatpush.bf16.msra.mxu1 %v4938_v53  ;;  %1315 = vmatpush.bf16.msra.mxu3 %v4939_v6 }
 0x1ed   :  { %1275 = vmatpush.bf16.msra.mxu0 %v3766_v30  ;;  %1303 = vmatpush.bf16.msra.mxu2 %v3772_v48 }
 0x1ef   :  { %1288 = vmatpush.bf16.msra.mxu1 %v4940_v28  ;;  %1316 = vmatpush.bf16.msra.mxu3 %v3763_v42 }
 0x1f1   :  { %1276 = vmatpush.bf16.msra.mxu0 %v3778_v36  ;;  %1304 = vmatpush.bf16.msra.mxu2 %v3784_v15 }
 0x1f3   :  { %1289 = vmatpush.bf16.msra.mxu1 %v4985_v52  ;;  %1317 = vmatpush.bf16.msra.mxu3 %v4986_v38 }
 0x1f4   :  { %1277 = vmatmul.bf16.vlgmr.msra.gmra.mxu0 %v1155_v12  ;;  %1305 = vmatmul.bf16.vlgmr.msra.gmra.mxu2 %v1155_v12  ;;  %v5009_v12 = vld [vmem:[#allocation36_spill] sm:$0xff] }
 0x1f5   :  { %1408 = vmatpush.bf16.msrb.mxu0 %v4983_v24  ;;  %1436 = vmatpush.bf16.msrb.mxu2 %v4984_v57  ;;  %v1146_v24 = vld [vmem:[#allocation2 + $0xd8] sm:$0xff] }
 0x1f7   :  { %1290 = vmatpush.bf16.msra.mxu1 %v4989_v44  ;;  %1318 = vmatpush.bf16.msra.mxu3 %v4990_v17 }
 0x1f9   :  { %1409 = vmatpush.bf16.msrb.mxu0 %v4987_v62  ;;  %1437 = vmatpush.bf16.msrb.mxu2 %v4988_v32 }
 0x1fa   :  { %1291 = vmatmul.bf16.vlgmr.msra.gmra.mxu1 %v1156_v56  ;;  %1319 = vmatmul.bf16.vlgmr.msra.gmra.mxu3 %v1156_v56  ;;  %v5012_v56 = vld [vmem:[#allocation35_spill] sm:$0xff] }
 0x1fb   :  { %1422 = vmatpush.bf16.msrb.mxu1 %v4991_v54  ;;  %1450 = vmatpush.bf16.msrb.mxu3 %v4992_v33 }
 0x1fd   :  { %1410 = vmatpush.bf16.msrb.mxu0 %v4993_v25  ;;  %1438 = vmatpush.bf16.msrb.mxu2 %v4994_v50  ;;  %v1149_v25 = vld [vmem:[#allocation2 + $0xf0] sm:$0xff] }
 0x1ff   :  { %1423 = vmatpush.bf16.msrb.mxu1 %v4995_v37  ;;  %1451 = vmatpush.bf16.msrb.mxu3 %v4996_v27 }
 0x201   :  { %1411 = vmatpush.bf16.msrb.mxu0 %v4997_v29  ;;  %1439 = vmatpush.bf16.msrb.mxu2 %v4998_v34 }
 0x203   :  { %1424 = vmatpush.bf16.msrb.mxu1 %v4999_v9  ;;  %1452 = vmatpush.bf16.msrb.mxu3 %v5000_v5 }
 0x205   :  { %1412 = vmatpush.bf16.msrb.mxu0 %v5001_v8  ;;  %1440 = vmatpush.bf16.msrb.mxu2 %v5002_v3  ;;  %v5013_v3 = vld [vmem:[#allocation40_spill] sm:$0xff] }
 0x207   :  { %1425 = vmatpush.bf16.msrb.mxu1 %v5003_v19  ;;  %1453 = vmatpush.bf16.msrb.mxu3 %v5004_v58  ;;  %v5014_v19 = vld [vmem:[#allocation42_spill] sm:$0xff]  ;;  %v5015_v58 = vld [vmem:[#allocation44_spill] sm:$0xff] }
 0x209   :  { %1413 = vmatpush.bf16.msrb.mxu0 %v5005_v35  ;;  %1441 = vmatpush.bf16.msrb.mxu2 %v5006_v59  ;;  %v5016_v35 = vld [vmem:[#allocation46_spill] sm:$0xff]  ;;  %v5017_v59 = vld [vmem:[#allocation37_spill] sm:$0xff] }
 0x20b   :  { %1426 = vmatpush.bf16.msrb.mxu1 %v5007_v21  ;;  %1454 = vmatpush.bf16.msrb.mxu3 %v5008_v45  ;;  %v5018_v21 = vld [vmem:[#allocation39_spill] sm:$0xff]  ;;  %v5019_v45 = vld [vmem:[#allocation48_spill] sm:$0xff] }
 0x20d   :  { %1414 = vmatpush.bf16.msrb.mxu0 %v5009_v12  ;;  %1442 = vmatpush.bf16.msrb.mxu2 %v5010_v16  ;;  %v5020_v12 = vld [vmem:[#allocation50_spill] sm:$0xff]  ;;  %v5021_v16 = vld [vmem:[#allocation41_spill] sm:$0xff] }
 0x20f   :  { %1427 = vmatpush.bf16.msrb.mxu1 %v5011_v46  ;;  %1455 = vmatpush.bf16.msrb.mxu3 %v5012_v56  ;;  %v5022_v46 = vld [vmem:[#allocation43_spill] sm:$0xff]  ;;  %v5023_v56 = vld [vmem:[#allocation45_spill] sm:$0xff] }
 0x211   :  { %1415 = vmatpush.bf16.msrb.mxu0 %v5013_v3  ;;  %1443 = vmatpush.bf16.msrb.mxu2 %v5014_v19  ;;  %v5024_v3 = vld [vmem:[#allocation47_spill] sm:$0xff]  ;;  %v5025_v19 = vld [vmem:[#allocation52_spill] sm:$0xff] }
 0x213   :  { %1428 = vmatpush.bf16.msrb.mxu1 %v5017_v59  ;;  %1456 = vmatpush.bf16.msrb.mxu3 %v5018_v21  ;;  %v5028_v59 = vld [vmem:[#allocation51_spill] sm:$0xff]  ;;  %v5029_v21 = vld [vmem:[#allocation56_spill] sm:$0xff] }
 0x215   :  { %1464 = vmatpush.bf16.msra.mxu0 %v5015_v58  ;;  %1492 = vmatpush.bf16.msra.mxu2 %v5016_v35  ;;  %v5026_v58 = vld [vmem:[#allocation54_spill] sm:$0xff]  ;;  %v5027_v35 = vld [vmem:[#allocation49_spill] sm:$0xff] }
 0x217   :  { %1429 = vmatpush.bf16.msrb.mxu1 %v5021_v16  ;;  %1457 = vmatpush.bf16.msrb.mxu3 %v5022_v46  ;;  %v5032_v16 = vld [vmem:[#allocation55_spill] sm:$0xff]  ;;  %v5033_v46 = vld [vmem:[#allocation60_spill] sm:$0xff] }
 0x219   :  { %1465 = vmatpush.bf16.msra.mxu0 %v5019_v45  ;;  %1493 = vmatpush.bf16.msra.mxu2 %v5020_v12  ;;  %v5030_v45 = vld [vmem:[#allocation58_spill] sm:$0xff]  ;;  %v5031_v12 = vld [vmem:[#allocation53_spill] sm:$0xff] }
 0x21b   :  { %1478 = vmatpush.bf16.msra.mxu1 %v5023_v56  ;;  %1506 = vmatpush.bf16.msra.mxu3 %v5024_v3  ;;  %v5034_v56 = vld [vmem:[#allocation62_spill] sm:$0xff]  ;;  %v5035_v3 = vld [vmem:[#allocation57_spill] sm:$0xff] }
 0x21d   :  { %1466 = vmatpush.bf16.msra.mxu0 %v5025_v19  ;;  %1494 = vmatpush.bf16.msra.mxu2 %v5026_v58  ;;  %v5036_v19 = vld [vmem:[#allocation59_spill] sm:$0xff]  ;;  %v5037_v58 = vld [vmem:[#allocation64_spill] sm:$0xff] }
 0x21f   :  { %1479 = vmatpush.bf16.msra.mxu1 %v5027_v35  ;;  %1507 = vmatpush.bf16.msra.mxu3 %v5028_v59  ;;  %v5038_v35 = vld [vmem:[#allocation66_spill] sm:$0xff]  ;;  %v5039_v59 = vld [vmem:[#allocation61_spill] sm:$0xff] }
 0x221   :  { %1467 = vmatpush.bf16.msra.mxu0 %v5029_v21  ;;  %1495 = vmatpush.bf16.msra.mxu2 %v5030_v45  ;;  %v5040_v21 = vld [vmem:[#allocation63_spill] sm:$0xff]  ;;  %v5041_v45 = vld [vmem:[#allocation68_spill] sm:$0xff] }
 0x223   :  { %1480 = vmatpush.bf16.msra.mxu1 %v5031_v12  ;;  %1508 = vmatpush.bf16.msra.mxu3 %v5032_v16  ;;  %v5042_v12 = vld [vmem:[#allocation70_spill] sm:$0xff]  ;;  %v5043_v16 = vld [vmem:[#allocation65_spill] sm:$0xff] }
 0x225   :  { %1468 = vmatpush.bf16.msra.mxu0 %v5033_v46  ;;  %1496 = vmatpush.bf16.msra.mxu2 %v5034_v56  ;;  %v5044_v46 = vld [vmem:[#allocation67_spill] sm:$0xff]  ;;  %v5045_v56 = vld [vmem:[#allocation72_spill] sm:$0xff] }
 0x227   :  { %1481 = vmatpush.bf16.msra.mxu1 %v5035_v3  ;;  %1509 = vmatpush.bf16.msra.mxu3 %v5036_v19  ;;  %v5046_v3 = vld [vmem:[#allocation74_spill] sm:$0xff]  ;;  %v5047_v19 = vld [vmem:[#allocation69_spill] sm:$0xff] }
 0x229   :  { %1469 = vmatpush.bf16.msra.mxu0 %v5037_v58  ;;  %1497 = vmatpush.bf16.msra.mxu2 %v5038_v35  ;;  %v5048_v58 = vld [vmem:[#allocation71_spill] sm:$0xff]  ;;  %v5049_v35 = vld [vmem:[#allocation73_spill] sm:$0xff] }
 0x22b   :  { %1482 = vmatpush.bf16.msra.mxu1 %v5039_v59  ;;  %1510 = vmatpush.bf16.msra.mxu3 %v5040_v21  ;;  %v5050_v59 = vld [vmem:[#allocation75_spill] sm:$0xff] }
 0x22d   :  { %1470 = vmatpush.bf16.msra.mxu0 %v5041_v45  ;;  %1498 = vmatpush.bf16.msra.mxu2 %v5042_v12 }
 0x22f   :  { %1483 = vmatpush.bf16.msra.mxu1 %v5043_v16  ;;  %1511 = vmatpush.bf16.msra.mxu3 %v5044_v46 }
 0x231   :  { %1471 = vmatpush.bf16.msra.mxu0 %v5045_v56  ;;  %1499 = vmatpush.bf16.msra.mxu2 %v5046_v3  ;;  %v1143_v56 = vld [vmem:[#allocation2 + $0xc0] sm:$0xff] }
 0x233   :  { %1484 = vmatpush.bf16.msra.mxu1 %v5047_v19  ;;  %1512 = vmatpush.bf16.msra.mxu3 %v5048_v58  ;;  %v1144_v58 = vld [vmem:[#allocation2 + $0xc8] sm:$0xff] }
 0x237   :  { %1485 = vmatpush.bf16.msra.mxu1 %v5049_v35  ;;  %1513 = vmatpush.bf16.msra.mxu3 %v5050_v59 }
 0x251   :  { %v1166_v21 = vpop.f32.mrf.mxu0 }
 0x257   :  { %v1180_v45 = vpop.f32.mrf.mxu1  ;;  %v1194_v8 = vpop.f32.mrf.mxu2 }
 0x258   :  { %v1181_v46 = vadd.f32 %v1180_v45, %v1166_v21  ;;  %v1150_v45 = vld [vmem:[#allocation2 + $0xf8] sm:$0xff] }
 0x259   :  { %v1168_v12 = vpop.f32.mrf.mxu0 }
 0x25a   :  { %v1325_v29 = vadd.f32 %v1181_v46, %v1143_v56  ;;  %v1145_v56 = vld [vmem:[#allocation2 + $0xd0] sm:$0xff] }
 0x25c   :  { %v1329_v35 = vmul.f32 0.5, %v1325_v29 }
 0x25d   :  { %v1208_v5 = vpop.f32.mrf.mxu3 }
 0x25e   :  { %v1209_v27 = vadd.f32 %v1208_v5, %v1194_v8  ;;  %3211 = vtanh.f32 %v1329_v35 }
 0x25f   :  { %v1182_v16 = vpop.f32.mrf.mxu1  ;;  %v1196_v9 = vpop.f32.mrf.mxu2 }
 0x260   :  { %v1183_v50 = vadd.f32 %v1182_v16, %v1168_v12  ;;  %v1326_v59 = vadd.f32 %v1209_v27, %v1144_v58  ;;  %v1151_v58 = vld [vmem:[#allocation2 + $0x100] sm:$0xff] }
 0x261   :  { %v1222_v34 = vpop.f32.mrf.mxu0 }
 0x262   :  { %v1327_v54 = vadd.f32 %v1183_v50, %v1149_v25  ;;  %v1330_v44 = vmul.f32 0.5, %v1326_v59 }
 0x264   :  { %v1331_v21 = vmul.f32 0.5, %v1327_v54  ;;  %v3212_v46 = vpop.eup %3211  ;;  %3213 = vtanh.f32 %v1330_v44 }
 0x265   :  { %v1210_v3 = vpop.f32.mrf.mxu3  ;;  %v1337_v27 = vmul.f32 0.5, %v3212_v46 }
 0x266   :  { %v1211_v32 = vadd.f32 %v1210_v3, %v1196_v9  ;;  %3215 = vtanh.f32 %v1331_v21 }
 0x267   :  { %v1236_v19 = vpop.f32.mrf.mxu1  ;;  %v1250_v37 = vpop.f32.mrf.mxu2  ;;  %v1341_v57 = vadd.f32 0.5, %v1337_v27 }
 0x268   :  { %v1328_v5 = vadd.f32 %v1211_v32, %v1150_v45  ;;  %v1237_v8 = vadd.f32 %v1236_v19, %v1222_v34  ;;  %v1152_v34 = vld [vmem:[#allocation2 + $0x108] sm:$0xff] }
 0x269   :  { %v1224_v33 = vpop.f32.mrf.mxu0 }
 0x26a   :  { %v1332_v25 = vmul.f32 0.5, %v1328_v5  ;;  %v1345_v35 = vadd.f32 %v1237_v8, %v1145_v56  ;;  %v3214_v9 = vpop.eup %3213 }
 0x26b   :  { %v1338_v19 = vmul.f32 0.5, %v3214_v9  ;;  %v1153_v9 = vld [vmem:[#allocation2 + $0x110] sm:$0xff] }
 0x26c   :  { %v3216_v52 = vpop.eup %3215  ;;  %3217 = vtanh.f32 %v1332_v25  ;;  %v1349_v21 = vmul.f32 0.5, %v1345_v35  ;;  %v1148_v35 = vld [vmem:[#allocation2 + $0xe8] sm:$0xff] }
 0x26d   :  { %v1264_v17 = vpop.f32.mrf.mxu3  ;;  %v1339_v46 = vmul.f32 0.5, %v3216_v52 }
 0x26e   :  { %v1265_v3 = vadd.f32 %v1264_v17, %v1250_v37  ;;  %3219 = vtanh.f32 %v1349_v21 }
 0x26f   :  { %v1238_v62 = vpop.f32.mrf.mxu1  ;;  %v1252_v38 = vpop.f32.mrf.mxu2 }
 0x270   :  { %v1239_v12 = vadd.f32 %v1238_v62, %v1224_v33  ;;  %v1147_v62 = vld [vmem:[#allocation2 + $0xe0] sm:$0xff]  ;;  %v1346_v5 = vadd.f32 %v1265_v3, %v1146_v24 }
 0x271   :  { %v1278_v29 = vpop.f32.mrf.mxu0 }
 0x272   :  { %v1347_v54 = vadd.f32 %v1239_v12, %v1151_v58  ;;  %v1342_v58 = vadd.f32 0.5, %v1338_v19  ;;  %v3218_v25 = vpop.eup %3217 }
 0x273   :  { %v1340_v3 = vmul.f32 0.5, %v3218_v25 }
 0x274   :  { %v1351_v8 = vmul.f32 0.5, %v1347_v54 }
 0x275   :  { %v1266_v16 = vpop.f32.mrf.mxu3 }
 0x276   :  { %v1267_v44 = vadd.f32 %v1266_v16, %v1252_v38  ;;  %3221 = vtanh.f32 %v1351_v8 }
 0x277   :  { %v1292_v50 = vpop.f32.mrf.mxu1  ;;  %v1306_v33 = vpop.f32.mrf.mxu2 }
 0x278   :  { %v1293_v59 = vadd.f32 %v1292_v50, %v1278_v29  ;;  %v1348_v29 = vadd.f32 %v1267_v44, %v1152_v34  ;;  %v1343_v50 = vadd.f32 0.5, %v1339_v46  ;;  %v1344_v46 = vadd.f32 0.5, %v1340_v3 }
 0x279   :  { %v1280_v12 = vpop.f32.mrf.mxu0 }
 0x27a   :  { %v1365_v32 = vadd.f32 %v1293_v59, %v3861_v55  ;;  %v1350_v59 = vmul.f32 0.5, %v1346_v5 }
 0x27c   :  { %v1369_v45 = vmul.f32 %v1365_v32, %v1341_v57  ;;  %v1352_v57 = vmul.f32 0.5, %v1348_v29 }
 0x27d   :  { %v1320_v56 = vpop.f32.mrf.mxu3 }
 0x27e   :  { %v1373_v17 = vadd.f32 %v1369_v45, %v1147_v62  ;;  %v1321_v37 = vadd.f32 %v1320_v56, %v1306_v33  ;;  %v3220_v62 = vpop.eup %3219  ;;  %v1154_v56 = vld [vmem:[#allocation2 + $0x118] sm:$0xff] }
 0x27f   :  { %v1294_v27 = vpop.f32.mrf.mxu1  ;;  %v1308_v32 = vpop.f32.mrf.mxu2  ;;  %v1357_v8 = vmul.f32 0.5, %v3220_v62 }
 0x280   :  { %v1366_v38 = vadd.f32 %v1321_v37, %v3864_v41  ;;  %v1295_v16 = vadd.f32 %v1294_v27, %v1280_v12  ;;  %3223 = vtanh.f32 %v1373_v17  ;;  %v3222_v21 = vpop.eup %3221 }
 0x281   :  { %3225 = vtanh.f32 %v1350_v59  ;;  %v1359_v37 = vmul.f32 0.5, %v3222_v21 }
 0x282   :  { %v1370_v24 = vmul.f32 %v1366_v38, %v1342_v58  ;;  %v1367_v52 = vadd.f32 %v1295_v16, %v3861_v55  ;;  %3227 = vtanh.f32 %v1352_v57  ;;  %v1361_v16 = vadd.f32 0.5, %v1357_v8  ;;  %v5055_v8 = vld [vmem:[#allocation16_spill] sm:$0xff] }
 0x283   :  { %v1363_v59 = vadd.f32 0.5, %v1359_v37  ;;  %v5059_v37 = vld [vmem:[#allocation13_spill] sm:$0xff] }
 0x284   :  { %v1374_v54 = vadd.f32 %v1370_v24, %v1148_v35  ;;  %v1371_v44 = vmul.f32 %v1367_v52, %v1343_v50 }
 0x285   :  { %v1322_v34 = vpop.f32.mrf.mxu3 }
 0x286   :  { %v1375_v33 = vadd.f32 %v1371_v44, %v1153_v9  ;;  %v1323_v19 = vadd.f32 %v1322_v34, %v1308_v32  ;;  %3229 = vtanh.f32 %v1374_v54  ;;  %v3224_v45 = vpop.eup %3223 }
 0x287   :  { %v3226_v17 = vpop.eup %3225  ;;  %v1381_v12 = vsub.f32 %v3984_v7, %v3224_v45 }
 0x288   :  { %3231 = vtanh.f32 %v1375_v33  ;;  %v1368_v5 = vadd.f32 %v1323_v19, %v3864_v41  ;;  %v3228_v27 = vpop.eup %3227  ;;  %v1358_v50 = vmul.f32 0.5, %v3226_v17  ;;  %v5058_v17 = vld [vmem:[#allocation101_spill] sm:$0xff] }
 0x289   :  { %v1385_v35 = vmul.f32 %v1381_v12, %v1361_v16  ;;  %v1360_v24 = vmul.f32 0.5, %v3228_v27  ;;  %v5060_v12 = vld [vmem:[#allocation15_spill] sm:$0xff]  ;;  %v5061_v27 = vld [vmem:[#allocation20_spill] sm:$0xff] }
 0x28a   :  { %v1372_v29 = vmul.f32 %v1368_v5, %v1344_v46  ;;  %v1362_v3 = vadd.f32 0.5, %v1358_v50  ;;  %v5053_v46 = vld [vmem:[#allocation98_spill] sm:$0xff]  ;;  %v5054_v5 = vld [vmem:[#allocation99_spill] sm:$0xff] }
 0x28b   :  { %v4100_v54 = vadd.f32 %v3224_v45, %v1385_v35  ;;  %v1364_v32 = vadd.f32 0.5, %v1360_v24  ;;  %v5052_v45 = vld [vmem:[#allocation14_spill] sm:$0xff]  ;;  %v5064_v16 = vld [vmem:[#allocation19_spill] sm:$0xff] }
 0x28c   :  { %v1376_v58 = vadd.f32 %v1372_v29, %v1154_v56  ;;  %v3230_v38 = vpop.eup %3229  ;;  %v5056_v56 = vld [vmem:[#allocation18_spill] sm:$0xff]  ;;  %v5057_v29 = vld [vmem:[#allocation100_spill] sm:$0xff]  ;;  %v5068_v35 = vld [vmem:[#allocation23_spill] sm:$0xff] }
 0x28d   :  { %v1382_v52 = vsub.f32 %v3993_v2, %v3230_v38  ;;  %v5066_v50 = vld [vmem:[#allocation26_spill] sm:$0xff] }
 0x28e   :  { %v3232_v25 = vpop.eup %3231  ;;  %3233 = vtanh.f32 %v1376_v58  ;;  %v5062_v58 = vld [vmem:[#allocation22_spill] sm:$0xff] }
 0x28f   :  { %v1383_v57 = vsub.f32 %v3986_v13, %v3232_v25  ;;  %v1386_v34 = vmul.f32 %v1382_v52, %v1362_v3  ;;  %v5070_v24 = vld [vmem:[#allocation30_spill] sm:$0xff]  ;;  %v5071_v52 = vld [vmem:[#allocation25_spill] sm:$0xff]  ;;  %v5073_v3 = vld [vmem:[#allocation32_spill] sm:$0xff] }
 0x291   :  { %v1387_v9 = vmul.f32 %v1383_v57, %v1363_v59  ;;  %v4109_v13 = vadd.f32 %v3230_v38, %v1386_v34  ;;  %v5063_v38 = vld [vmem:[#allocation17_spill] sm:$0xff]  ;;  %v5069_v57 = vld [vmem:[#allocation28_spill] sm:$0xff]  ;;  %v5076_v34 = vld [vmem:[#allocation31_spill] sm:$0xff] }
 0x292   :  { %v5067_v59 = vld [vmem:[#allocation21_spill] sm:$0xff] }
 0x293   :  { %v4102_v44 = vadd.f32 %v3232_v25, %v1387_v9  ;;  %v5065_v25 = vld [vmem:[#allocation24_spill] sm:$0xff]  ;;  %v5072_v9 = vld [vmem:[#allocation27_spill] sm:$0xff] }
 0x294   :  { %v3234_v7 = vpop.eup %3233 }
 0x295   :  { %v1406_v62 = vpack.c.bf16 %v4102_v44, %v4100_v54  ;;  %v1384_v33 = vsub.f32 %v3995_v26, %v3234_v7  ;;  %v5051_v26 = vld [vmem:[#allocation12_spill] sm:$0xff] }
 0x297   :  { %v1388_v19 = vmul.f32 %v1384_v33, %v1364_v32  ;;  %1416 = vmatmul.bf16.vlgmr.msrb.gmra.mxu0 %v1406_v62  ;;  %1444 = vmatmul.bf16.vlgmr.msrb.gmra.mxu2 %v1406_v62  ;;  %v5075_v32 = vld [vmem:[#allocation29_spill] sm:$0xff]  ;;  %v5078_v33 = vld [vmem:[#allocation38_spill] sm:$0xff] }
 0x298   :  { %1520 = vmatpush.bf16.msrb.mxu0 %v4919_v39  ;;  %1548 = vmatpush.bf16.msrb.mxu2 %v4920_v47 }
 0x299   :  { %v4111_v2 = vadd.f32 %v3234_v7, %v1388_v19  ;;  %v5074_v7 = vld [vmem:[#allocation34_spill] sm:$0xff]  ;;  %v5079_v19 = vld [vmem:[#allocation33_spill] sm:$0xff] }
 0x29b   :  { %v1407_v21 = vpack.c.bf16 %v4111_v2, %v4109_v13 }
 0x29c   :  { %1521 = vmatpush.bf16.msrb.mxu0 %v4921_v20  ;;  %1549 = vmatpush.bf16.msrb.mxu2 %v4922_v51 }
 0x29d   :  { %1430 = vmatmul.bf16.vlgmr.msrb.gmra.mxu1 %v1407_v21  ;;  %1458 = vmatmul.bf16.vlgmr.msrb.gmra.mxu3 %v1407_v21 }
 0x29e   :  { %1534 = vmatpush.bf16.msrb.mxu1 %v4923_v22  ;;  %1562 = vmatpush.bf16.msrb.mxu3 %v4924_v63 }
 0x2a0   :  { %1522 = vmatpush.bf16.msrb.mxu0 %v4925_v60  ;;  %1550 = vmatpush.bf16.msrb.mxu2 %v4926_v10 }
 0x2a2   :  { %1535 = vmatpush.bf16.msrb.mxu1 %v4927_v0  ;;  %1563 = vmatpush.bf16.msrb.mxu3 %v4928_v1 }
 0x2a4   :  { %1523 = vmatpush.bf16.msrb.mxu0 %v4929_v14  ;;  %1551 = vmatpush.bf16.msrb.mxu2 %v4930_v31 }
 0x2a6   :  { %1536 = vmatpush.bf16.msrb.mxu1 %v4931_v11  ;;  %1564 = vmatpush.bf16.msrb.mxu3 %v4932_v43 }
 0x2a7   :  { %1472 = vmatmul.bf16.vlgmr.msra.gmra.mxu0 %v1406_v62  ;;  %1500 = vmatmul.bf16.vlgmr.msra.gmra.mxu2 %v1406_v62 }
 0x2a8   :  { %1524 = vmatpush.bf16.msrb.mxu0 %v4933_v18  ;;  %1552 = vmatpush.bf16.msrb.mxu2 %v4934_v40 }
 0x2aa   :  { %1537 = vmatpush.bf16.msrb.mxu1 %v4935_v4  ;;  %1565 = vmatpush.bf16.msrb.mxu3 %v4936_v61 }
 0x2ac   :  { %1525 = vmatpush.bf16.msrb.mxu0 %v4937_v23  ;;  %1553 = vmatpush.bf16.msrb.mxu2 %v3760_v49 }
 0x2ad   :  { %1486 = vmatmul.bf16.vlgmr.msra.gmra.mxu1 %v1407_v21  ;;  %1514 = vmatmul.bf16.vlgmr.msra.gmra.mxu3 %v1407_v21 }
 0x2ae   :  { %1538 = vmatpush.bf16.msrb.mxu1 %v4938_v53  ;;  %1566 = vmatpush.bf16.msrb.mxu3 %v4939_v6 }
 0x2b0   :  { %1526 = vmatpush.bf16.msrb.mxu0 %v3766_v30  ;;  %1554 = vmatpush.bf16.msrb.mxu2 %v3772_v48 }
 0x2b2   :  { %1539 = vmatpush.bf16.msrb.mxu1 %v4940_v28  ;;  %1567 = vmatpush.bf16.msrb.mxu3 %v3763_v42 }
 0x2b4   :  { %1527 = vmatpush.bf16.msrb.mxu0 %v3778_v36  ;;  %1555 = vmatpush.bf16.msrb.mxu2 %v3784_v15 }
 0x2b6   :  { %1540 = vmatpush.bf16.msrb.mxu1 %v5053_v46  ;;  %1568 = vmatpush.bf16.msrb.mxu3 %v5054_v5 }
 0x2b7   :  { %1528 = vmatmul.bf16.vlgmr.msrb.gmra.mxu0 %v1406_v62  ;;  %1556 = vmatmul.bf16.vlgmr.msrb.gmra.mxu2 %v1406_v62  ;;  %v5077_v62 = vld [vmem:[#allocation36_spill] sm:$0xff] }
 0x2b8   :  { %1659 = vmatpush.bf16.msra.mxu0 %v5051_v26  ;;  %1687 = vmatpush.bf16.msra.mxu2 %v5052_v45  ;;  %v1397_v26 = vld [vmem:[#allocation2 + $0x138] sm:$0xff] }
 0x2ba   :  { %1541 = vmatpush.bf16.msrb.mxu1 %v5057_v29  ;;  %1569 = vmatpush.bf16.msrb.mxu3 %v5058_v17 }
 0x2bc   :  { %1660 = vmatpush.bf16.msra.mxu0 %v5055_v8  ;;  %1688 = vmatpush.bf16.msra.mxu2 %v5056_v56 }
 0x2bd   :  { %1542 = vmatmul.bf16.vlgmr.msrb.gmra.mxu1 %v1407_v21  ;;  %1570 = vmatmul.bf16.vlgmr.msrb.gmra.mxu3 %v1407_v21  ;;  %v5080_v21 = vld [vmem:[#allocation35_spill] sm:$0xff] }
 0x2be   :  { %1673 = vmatpush.bf16.msra.mxu1 %v5059_v37  ;;  %1701 = vmatpush.bf16.msra.mxu3 %v5060_v12 }
 0x2c0   :  { %1661 = vmatpush.bf16.msra.mxu0 %v5061_v27  ;;  %1689 = vmatpush.bf16.msra.mxu2 %v5062_v58  ;;  %v1400_v27 = vld [vmem:[#allocation2 + $0x150] sm:$0xff] }
 0x2c2   :  { %1674 = vmatpush.bf16.msra.mxu1 %v5063_v38  ;;  %1702 = vmatpush.bf16.msra.mxu3 %v5064_v16 }
 0x2c4   :  { %1662 = vmatpush.bf16.msra.mxu0 %v5065_v25  ;;  %1690 = vmatpush.bf16.msra.mxu2 %v5066_v50 }
 0x2c6   :  { %1675 = vmatpush.bf16.msra.mxu1 %v5067_v59  ;;  %1703 = vmatpush.bf16.msra.mxu3 %v5068_v35 }
 0x2c8   :  { %1663 = vmatpush.bf16.msra.mxu0 %v5069_v57  ;;  %1691 = vmatpush.bf16.msra.mxu2 %v5070_v24  ;;  %v5081_v24 = vld [vmem:[#allocation40_spill] sm:$0xff] }
 0x2ca   :  { %1676 = vmatpush.bf16.msra.mxu1 %v5071_v52  ;;  %1704 = vmatpush.bf16.msra.mxu3 %v5072_v9  ;;  %v5082_v52 = vld [vmem:[#allocation42_spill] sm:$0xff]  ;;  %v5083_v9 = vld [vmem:[#allocation44_spill] sm:$0xff] }
 0x2cc   :  { %1664 = vmatpush.bf16.msra.mxu0 %v5073_v3  ;;  %1692 = vmatpush.bf16.msra.mxu2 %v5074_v7  ;;  %v5084_v3 = vld [vmem:[#allocation46_spill] sm:$0xff]  ;;  %v5085_v7 = vld [vmem:[#allocation37_spill] sm:$0xff] }
 0x2ce   :  { %1677 = vmatpush.bf16.msra.mxu1 %v5075_v32  ;;  %1705 = vmatpush.bf16.msra.mxu3 %v5076_v34  ;;  %v5086_v32 = vld [vmem:[#allocation39_spill] sm:$0xff]  ;;  %v5087_v34 = vld [vmem:[#allocation48_spill] sm:$0xff] }
 0x2d0   :  { %1665 = vmatpush.bf16.msra.mxu0 %v5077_v62  ;;  %1693 = vmatpush.bf16.msra.mxu2 %v5078_v33  ;;  %v5088_v62 = vld [vmem:[#allocation50_spill] sm:$0xff]  ;;  %v5089_v33 = vld [vmem:[#allocation41_spill] sm:$0xff] }
 0x2d2   :  { %1678 = vmatpush.bf16.msra.mxu1 %v5079_v19  ;;  %1706 = vmatpush.bf16.msra.mxu3 %v5080_v21  ;;  %v5090_v19 = vld [vmem:[#allocation43_spill] sm:$0xff]  ;;  %v5091_v21 = vld [vmem:[#allocation45_spill] sm:$0xff] }
 0x2d4   :  { %1666 = vmatpush.bf16.msra.mxu0 %v5081_v24  ;;  %1694 = vmatpush.bf16.msra.mxu2 %v5082_v52  ;;  %v5092_v24 = vld [vmem:[#allocation47_spill] sm:$0xff]  ;;  %v5093_v52 = vld [vmem:[#allocation52_spill] sm:$0xff] }
 0x2d6   :  { %1679 = vmatpush.bf16.msra.mxu1 %v5085_v7  ;;  %1707 = vmatpush.bf16.msra.mxu3 %v5086_v32  ;;  %v5096_v7 = vld [vmem:[#allocation51_spill] sm:$0xff]  ;;  %v5097_v32 = vld [vmem:[#allocation56_spill] sm:$0xff] }
 0x2d8   :  { %1715 = vmatpush.bf16.msrb.mxu0 %v5083_v9  ;;  %1743 = vmatpush.bf16.msrb.mxu2 %v5084_v3  ;;  %v5094_v9 = vld [vmem:[#allocation54_spill] sm:$0xff]  ;;  %v5095_v3 = vld [vmem:[#allocation49_spill] sm:$0xff] }
 0x2da   :  { %1680 = vmatpush.bf16.msra.mxu1 %v5089_v33  ;;  %1708 = vmatpush.bf16.msra.mxu3 %v5090_v19  ;;  %v5100_v33 = vld [vmem:[#allocation55_spill] sm:$0xff]  ;;  %v5101_v19 = vld [vmem:[#allocation60_spill] sm:$0xff] }
 0x2dc   :  { %1716 = vmatpush.bf16.msrb.mxu0 %v5087_v34  ;;  %1744 = vmatpush.bf16.msrb.mxu2 %v5088_v62  ;;  %v5098_v34 = vld [vmem:[#allocation58_spill] sm:$0xff]  ;;  %v5099_v62 = vld [vmem:[#allocation53_spill] sm:$0xff] }
 0x2de   :  { %1729 = vmatpush.bf16.msrb.mxu1 %v5091_v21  ;;  %1757 = vmatpush.bf16.msrb.mxu3 %v5092_v24  ;;  %v5102_v21 = vld [vmem:[#allocation62_spill] sm:$0xff]  ;;  %v5103_v24 = vld [vmem:[#allocation57_spill] sm:$0xff] }
 0x2e0   :  { %1717 = vmatpush.bf16.msrb.mxu0 %v5093_v52  ;;  %1745 = vmatpush.bf16.msrb.mxu2 %v5094_v9  ;;  %v5104_v52 = vld [vmem:[#allocation59_spill] sm:$0xff]  ;;  %v5105_v9 = vld [vmem:[#allocation64_spill] sm:$0xff] }
 0x2e2   :  { %1730 = vmatpush.bf16.msrb.mxu1 %v5095_v3  ;;  %1758 = vmatpush.bf16.msrb.mxu3 %v5096_v7  ;;  %v5106_v3 = vld [vmem:[#allocation66_spill] sm:$0xff]  ;;  %v5107_v7 = vld [vmem:[#allocation61_spill] sm:$0xff] }
 0x2e4   :  { %1718 = vmatpush.bf16.msrb.mxu0 %v5097_v32  ;;  %1746 = vmatpush.bf16.msrb.mxu2 %v5098_v34  ;;  %v5108_v32 = vld [vmem:[#allocation63_spill] sm:$0xff]  ;;  %v5109_v34 = vld [vmem:[#allocation68_spill] sm:$0xff] }
 0x2e6   :  { %1731 = vmatpush.bf16.msrb.mxu1 %v5099_v62  ;;  %1759 = vmatpush.bf16.msrb.mxu3 %v5100_v33  ;;  %v5110_v62 = vld [vmem:[#allocation70_spill] sm:$0xff]  ;;  %v5111_v33 = vld [vmem:[#allocation65_spill] sm:$0xff] }
 0x2e8   :  { %1719 = vmatpush.bf16.msrb.mxu0 %v5101_v19  ;;  %1747 = vmatpush.bf16.msrb.mxu2 %v5102_v21  ;;  %v5112_v19 = vld [vmem:[#allocation67_spill] sm:$0xff]  ;;  %v5113_v21 = vld [vmem:[#allocation72_spill] sm:$0xff] }
 0x2ea   :  { %1732 = vmatpush.bf16.msrb.mxu1 %v5103_v24  ;;  %1760 = vmatpush.bf16.msrb.mxu3 %v5104_v52  ;;  %v5114_v24 = vld [vmem:[#allocation74_spill] sm:$0xff]  ;;  %v5115_v52 = vld [vmem:[#allocation69_spill] sm:$0xff] }
 0x2ec   :  { %1720 = vmatpush.bf16.msrb.mxu0 %v5105_v9  ;;  %1748 = vmatpush.bf16.msrb.mxu2 %v5106_v3  ;;  %v5116_v9 = vld [vmem:[#allocation71_spill] sm:$0xff]  ;;  %v5117_v3 = vld [vmem:[#allocation73_spill] sm:$0xff] }
 0x2ee   :  { %1733 = vmatpush.bf16.msrb.mxu1 %v5107_v7  ;;  %1761 = vmatpush.bf16.msrb.mxu3 %v5108_v32  ;;  %v5118_v7 = vld [vmem:[#allocation75_spill] sm:$0xff] }
 0x2f0   :  { %1721 = vmatpush.bf16.msrb.mxu0 %v5109_v34  ;;  %1749 = vmatpush.bf16.msrb.mxu2 %v5110_v62 }
 0x2f2   :  { %1734 = vmatpush.bf16.msrb.mxu1 %v5111_v33  ;;  %1762 = vmatpush.bf16.msrb.mxu3 %v5112_v19 }
 0x2f4   :  { %1722 = vmatpush.bf16.msrb.mxu0 %v5113_v21  ;;  %1750 = vmatpush.bf16.msrb.mxu2 %v5114_v24  ;;  %v1394_v21 = vld [vmem:[#allocation2 + $0x120] sm:$0xff] }
 0x2f6   :  { %1735 = vmatpush.bf16.msrb.mxu1 %v5115_v52  ;;  %1763 = vmatpush.bf16.msrb.mxu3 %v5116_v9  ;;  %v1395_v9 = vld [vmem:[#allocation2 + $0x128] sm:$0xff] }
 0x2fa   :  { %1736 = vmatpush.bf16.msrb.mxu1 %v5117_v3  ;;  %1764 = vmatpush.bf16.msrb.mxu3 %v5118_v7 }
 0x314   :  { %v1417_v32 = vpop.f32.mrf.mxu0 }
 0x31a   :  { %v1431_v34 = vpop.f32.mrf.mxu1  ;;  %v1445_v57 = vpop.f32.mrf.mxu2 }
 0x31b   :  { %v1432_v19 = vadd.f32 %v1431_v34, %v1417_v32  ;;  %v1401_v34 = vld [vmem:[#allocation2 + $0x158] sm:$0xff] }
 0x31c   :  { %v1419_v62 = vpop.f32.mrf.mxu0 }
 0x31d   :  { %v1576_v25 = vadd.f32 %v1432_v19, %v1394_v21  ;;  %v1396_v21 = vld [vmem:[#allocation2 + $0x130] sm:$0xff] }
 0x31f   :  { %v1580_v3 = vmul.f32 0.5, %v1576_v25 }
 0x320   :  { %v1459_v35 = vpop.f32.mrf.mxu3 }
 0x321   :  { %v1460_v16 = vadd.f32 %v1459_v35, %v1445_v57  ;;  %3235 = vtanh.f32 %v1580_v3 }
 0x322   :  { %v1433_v33 = vpop.f32.mrf.mxu1  ;;  %v1447_v59 = vpop.f32.mrf.mxu2 }
 0x323   :  { %v1434_v58 = vadd.f32 %v1433_v33, %v1419_v62  ;;  %v1577_v7 = vadd.f32 %v1460_v16, %v1395_v9  ;;  %v1402_v9 = vld [vmem:[#allocation2 + $0x160] sm:$0xff] }
 0x324   :  { %v1473_v50 = vpop.f32.mrf.mxu0 }
 0x325   :  { %v1578_v37 = vadd.f32 %v1434_v58, %v1400_v27  ;;  %v1581_v29 = vmul.f32 0.5, %v1577_v7 }
 0x327   :  { %v1582_v32 = vmul.f32 0.5, %v1578_v37  ;;  %v3236_v19 = vpop.eup %3235  ;;  %3237 = vtanh.f32 %v1581_v29 }
 0x328   :  { %v1461_v24 = vpop.f32.mrf.mxu3  ;;  %v1588_v16 = vmul.f32 0.5, %v3236_v19 }
 0x329   :  { %v1462_v56 = vadd.f32 %v1461_v24, %v1447_v59  ;;  %3239 = vtanh.f32 %v1582_v32 }
 0x32a   :  { %v1487_v52 = vpop.f32.mrf.mxu1  ;;  %v1501_v38 = vpop.f32.mrf.mxu2  ;;  %v1592_v45 = vadd.f32 0.5, %v1588_v16 }
 0x32b   :  { %v1579_v35 = vadd.f32 %v1462_v56, %v1401_v34  ;;  %v1488_v57 = vadd.f32 %v1487_v52, %v1473_v50  ;;  %v1403_v50 = vld [vmem:[#allocation2 + $0x168] sm:$0xff] }
 0x32c   :  { %v1475_v12 = vpop.f32.mrf.mxu0 }
 0x32d   :  { %v1583_v27 = vmul.f32 0.5, %v1579_v35  ;;  %v1596_v3 = vadd.f32 %v1488_v57, %v1396_v21  ;;  %v3238_v59 = vpop.eup %3237 }
 0x32e   :  { %v1589_v52 = vmul.f32 0.5, %v3238_v59  ;;  %v1404_v59 = vld [vmem:[#allocation2 + $0x170] sm:$0xff] }
 0x32f   :  { %v3240_v46 = vpop.eup %3239  ;;  %3241 = vtanh.f32 %v1583_v27  ;;  %v1600_v32 = vmul.f32 0.5, %v1596_v3  ;;  %v1399_v3 = vld [vmem:[#allocation2 + $0x148] sm:$0xff] }
 0x330   :  { %v1515_v17 = vpop.f32.mrf.mxu3  ;;  %v1590_v19 = vmul.f32 0.5, %v3240_v46 }
 0x331   :  { %v1516_v24 = vadd.f32 %v1515_v17, %v1501_v38  ;;  %3243 = vtanh.f32 %v1600_v32 }
 0x332   :  { %v1489_v8 = vpop.f32.mrf.mxu1  ;;  %v1503_v5 = vpop.f32.mrf.mxu2 }
 0x333   :  { %v1490_v62 = vadd.f32 %v1489_v8, %v1475_v12  ;;  %v1398_v8 = vld [vmem:[#allocation2 + $0x140] sm:$0xff]  ;;  %v1597_v35 = vadd.f32 %v1516_v24, %v1397_v26 }
 0x334   :  { %v1529_v25 = vpop.f32.mrf.mxu0 }
 0x335   :  { %v1598_v37 = vadd.f32 %v1490_v62, %v1402_v9  ;;  %v1593_v9 = vadd.f32 0.5, %v1589_v52  ;;  %v3242_v27 = vpop.eup %3241 }
 0x336   :  { %v1591_v24 = vmul.f32 0.5, %v3242_v27 }
 0x337   :  { %v1602_v57 = vmul.f32 0.5, %v1598_v37 }
 0x338   :  { %v1517_v33 = vpop.f32.mrf.mxu3 }
 0x339   :  { %v1518_v29 = vadd.f32 %v1517_v33, %v1503_v5  ;;  %3245 = vtanh.f32 %v1602_v57 }
 0x33a   :  { %v1543_v58 = vpop.f32.mrf.mxu1  ;;  %v1557_v12 = vpop.f32.mrf.mxu2 }
 0x33b   :  { %v1544_v7 = vadd.f32 %v1543_v58, %v1529_v25  ;;  %v1599_v25 = vadd.f32 %v1518_v29, %v1403_v50  ;;  %v1594_v58 = vadd.f32 0.5, %v1590_v19  ;;  %v1595_v19 = vadd.f32 0.5, %v1591_v24 }
 0x33c   :  { %v1531_v62 = vpop.f32.mrf.mxu0 }
 0x33d   :  { %v1616_v56 = vadd.f32 %v1544_v7, %v3861_v55  ;;  %v1601_v7 = vmul.f32 0.5, %v1597_v35 }
 0x33f   :  { %v1620_v34 = vmul.f32 %v1616_v56, %v1592_v45  ;;  %v1603_v45 = vmul.f32 0.5, %v1599_v25 }
 0x340   :  { %v1571_v21 = vpop.f32.mrf.mxu3 }
 0x341   :  { %v1624_v17 = vadd.f32 %v1620_v34, %v1398_v8  ;;  %v1572_v38 = vadd.f32 %v1571_v21, %v1557_v12  ;;  %v3244_v8 = vpop.eup %3243  ;;  %v1405_v21 = vld [vmem:[#allocation2 + $0x178] sm:$0xff] }
 0x342   :  { %v1545_v16 = vpop.f32.mrf.mxu1  ;;  %v1559_v56 = vpop.f32.mrf.mxu2  ;;  %v1608_v57 = vmul.f32 0.5, %v3244_v8 }
 0x343   :  { %v1617_v5 = vadd.f32 %v1572_v38, %v3864_v41  ;;  %v1546_v33 = vadd.f32 %v1545_v16, %v1531_v62  ;;  %3247 = vtanh.f32 %v1624_v17  ;;  %v3246_v32 = vpop.eup %3245 }
 0x344   :  { %3249 = vtanh.f32 %v1601_v7  ;;  %v1610_v38 = vmul.f32 0.5, %v3246_v32 }
 0x345   :  { %v1621_v26 = vmul.f32 %v1617_v5, %v1593_v9  ;;  %v1618_v46 = vadd.f32 %v1546_v33, %v3861_v55  ;;  %3251 = vtanh.f32 %v1603_v45  ;;  %v1612_v33 = vadd.f32 0.5, %v1608_v57  ;;  %v5123_v57 = vld [vmem:[#allocation16_spill] sm:$0xff] }
 0x346   :  { %v1614_v7 = vadd.f32 0.5, %v1610_v38  ;;  %v5127_v38 = vld [vmem:[#allocation13_spill] sm:$0xff] }
 0x347   :  { %v1625_v37 = vadd.f32 %v1621_v26, %v1399_v3  ;;  %v1622_v29 = vmul.f32 %v1618_v46, %v1594_v58 }
 0x348   :  { %v1573_v50 = vpop.f32.mrf.mxu3 }
 0x349   :  { %v1626_v12 = vadd.f32 %v1622_v29, %v1404_v59  ;;  %v1574_v52 = vadd.f32 %v1573_v50, %v1559_v56  ;;  %3253 = vtanh.f32 %v1625_v37  ;;  %v3248_v34 = vpop.eup %3247 }
 0x34a   :  { %v3250_v17 = vpop.eup %3249  ;;  %v1632_v62 = vsub.f32 %v4100_v54, %v3248_v34 }
 0x34b   :  { %3255 = vtanh.f32 %v1626_v12  ;;  %v1619_v35 = vadd.f32 %v1574_v52, %v3864_v41  ;;  %v3252_v16 = vpop.eup %3251  ;;  %v1609_v58 = vmul.f32 0.5, %v3250_v17  ;;  %v5126_v17 = vld [vmem:[#allocation101_spill] sm:$0xff] }
 0x34c   :  { %v1636_v3 = vmul.f32 %v1632_v62, %v1612_v33  ;;  %v1611_v26 = vmul.f32 0.5, %v3252_v16  ;;  %v5128_v62 = vld [vmem:[#allocation15_spill] sm:$0xff]  ;;  %v5129_v16 = vld [vmem:[#allocation20_spill] sm:$0xff] }
 0x34d   :  { %v1623_v25 = vmul.f32 %v1619_v35, %v1595_v19  ;;  %v1613_v24 = vadd.f32 0.5, %v1609_v58  ;;  %v5121_v19 = vld [vmem:[#allocation98_spill] sm:$0xff]  ;;  %v5122_v35 = vld [vmem:[#allocation99_spill] sm:$0xff] }
 0x34e   :  { %v4216_v37 = vadd.f32 %v3248_v34, %v1636_v3  ;;  %v1615_v56 = vadd.f32 0.5, %v1611_v26  ;;  %v5120_v34 = vld [vmem:[#allocation14_spill] sm:$0xff]  ;;  %v5132_v33 = vld [vmem:[#allocation19_spill] sm:$0xff] }
 0x34f   :  { %v1627_v9 = vadd.f32 %v1623_v25, %v1405_v21  ;;  %v3254_v5 = vpop.eup %3253  ;;  %v5124_v21 = vld [vmem:[#allocation18_spill] sm:$0xff]  ;;  %v5125_v25 = vld [vmem:[#allocation100_spill] sm:$0xff]  ;;  %v5136_v3 = vld [vmem:[#allocation23_spill] sm:$0xff] }
 0x350   :  { %v1633_v46 = vsub.f32 %v4109_v13, %v3254_v5  ;;  %v5134_v58 = vld [vmem:[#allocation26_spill] sm:$0xff] }
 0x351   :  { %v3256_v27 = vpop.eup %3255  ;;  %3257 = vtanh.f32 %v1627_v9  ;;  %v5130_v9 = vld [vmem:[#allocation22_spill] sm:$0xff] }
 0x352   :  { %v1634_v45 = vsub.f32 %v4102_v44, %v3256_v27  ;;  %v1637_v50 = vmul.f32 %v1633_v46, %v1613_v24  ;;  %v5138_v26 = vld [vmem:[#allocation30_spill] sm:$0xff]  ;;  %v5139_v46 = vld [vmem:[#allocation25_spill] sm:$0xff]  ;;  %v5141_v24 = vld [vmem:[#allocation32_spill] sm:$0xff] }
 0x354   :  { %v1638_v59 = vmul.f32 %v1634_v45, %v1614_v7  ;;  %v4225_v44 = vadd.f32 %v3254_v5, %v1637_v50  ;;  %v5131_v5 = vld [vmem:[#allocation17_spill] sm:$0xff]  ;;  %v5137_v45 = vld [vmem:[#allocation28_spill] sm:$0xff]  ;;  %v5144_v50 = vld [vmem:[#allocation31_spill] sm:$0xff] }
 0x355   :  { %v5135_v7 = vld [vmem:[#allocation21_spill] sm:$0xff] }
 0x356   :  { %v4218_v29 = vadd.f32 %v3256_v27, %v1638_v59  ;;  %v5133_v27 = vld [vmem:[#allocation24_spill] sm:$0xff]  ;;  %v5140_v59 = vld [vmem:[#allocation27_spill] sm:$0xff] }
 0x357   :  { %v3258_v54 = vpop.eup %3257 }
 0x358   :  { %v1657_v8 = vpack.c.bf16 %v4218_v29, %v4216_v37  ;;  %v1635_v12 = vsub.f32 %v4111_v2, %v3258_v54  ;;  %v5119_v2 = vld [vmem:[#allocation12_spill] sm:$0xff] }
 0x35a   :  { %v1639_v52 = vmul.f32 %v1635_v12, %v1615_v56  ;;  %1667 = vmatmul.bf16.vlgmr.msra.gmra.mxu0 %v1657_v8  ;;  %1695 = vmatmul.bf16.vlgmr.msra.gmra.mxu2 %v1657_v8  ;;  %v5143_v56 = vld [vmem:[#allocation29_spill] sm:$0xff]  ;;  %v5146_v12 = vld [vmem:[#allocation38_spill] sm:$0xff] }
 0x35b   :  { %1771 = vmatpush.bf16.msra.mxu0 %v4919_v39  ;;  %1799 = vmatpush.bf16.msra.mxu2 %v4920_v47 }
 0x35c   :  { %v4227_v13 = vadd.f32 %v3258_v54, %v1639_v52  ;;  %v5142_v54 = vld [vmem:[#allocation34_spill] sm:$0xff]  ;;  %v5147_v52 = vld [vmem:[#allocation33_spill] sm:$0xff] }
 0x35e   :  { %v1658_v32 = vpack.c.bf16 %v4227_v13, %v4225_v44 }
 0x35f   :  { %1772 = vmatpush.bf16.msra.mxu0 %v4921_v20  ;;  %1800 = vmatpush.bf16.msra.mxu2 %v4922_v51 }
 0x360   :  { %1681 = vmatmul.bf16.vlgmr.msra.gmra.mxu1 %v1658_v32  ;;  %1709 = vmatmul.bf16.vlgmr.msra.gmra.mxu3 %v1658_v32 }
 0x361   :  { %1785 = vmatpush.bf16.msra.mxu1 %v4923_v22  ;;  %1813 = vmatpush.bf16.msra.mxu3 %v4924_v63 }
 0x363   :  { %1773 = vmatpush.bf16.msra.mxu0 %v4925_v60  ;;  %1801 = vmatpush.bf16.msra.mxu2 %v4926_v10 }
 0x365   :  { %1786 = vmatpush.bf16.msra.mxu1 %v4927_v0  ;;  %1814 = vmatpush.bf16.msra.mxu3 %v4928_v1 }
 0x367   :  { %1774 = vmatpush.bf16.msra.mxu0 %v4929_v14  ;;  %1802 = vmatpush.bf16.msra.mxu2 %v4930_v31 }
 0x369   :  { %1787 = vmatpush.bf16.msra.mxu1 %v4931_v11  ;;  %1815 = vmatpush.bf16.msra.mxu3 %v4932_v43 }
 0x36a   :  { %1723 = vmatmul.bf16.vlgmr.msrb.gmra.mxu0 %v1657_v8  ;;  %1751 = vmatmul.bf16.vlgmr.msrb.gmra.mxu2 %v1657_v8 }
 0x36b   :  { %1775 = vmatpush.bf16.msra.mxu0 %v4933_v18  ;;  %1803 = vmatpush.bf16.msra.mxu2 %v4934_v40 }
 0x36d   :  { %1788 = vmatpush.bf16.msra.mxu1 %v4935_v4  ;;  %1816 = vmatpush.bf16.msra.mxu3 %v4936_v61 }
 0x36f   :  { %1776 = vmatpush.bf16.msra.mxu0 %v4937_v23  ;;  %1804 = vmatpush.bf16.msra.mxu2 %v3760_v49 }
 0x370   :  { %1737 = vmatmul.bf16.vlgmr.msrb.gmra.mxu1 %v1658_v32  ;;  %1765 = vmatmul.bf16.vlgmr.msrb.gmra.mxu3 %v1658_v32 }
 0x371   :  { %1789 = vmatpush.bf16.msra.mxu1 %v4938_v53  ;;  %1817 = vmatpush.bf16.msra.mxu3 %v4939_v6 }
 0x373   :  { %1777 = vmatpush.bf16.msra.mxu0 %v3766_v30  ;;  %1805 = vmatpush.bf16.msra.mxu2 %v3772_v48 }
 0x375   :  { %1790 = vmatpush.bf16.msra.mxu1 %v4940_v28  ;;  %1818 = vmatpush.bf16.msra.mxu3 %v3763_v42 }
 0x377   :  { %1778 = vmatpush.bf16.msra.mxu0 %v3778_v36  ;;  %1806 = vmatpush.bf16.msra.mxu2 %v3784_v15 }
 0x379   :  { %1791 = vmatpush.bf16.msra.mxu1 %v5121_v19  ;;  %1819 = vmatpush.bf16.msra.mxu3 %v5122_v35 }
 0x37a   :  { %1779 = vmatmul.bf16.vlgmr.msra.gmra.mxu0 %v1657_v8  ;;  %1807 = vmatmul.bf16.vlgmr.msra.gmra.mxu2 %v1657_v8  ;;  %v5145_v8 = vld [vmem:[#allocation36_spill] sm:$0xff] }
 0x37b   :  { %1910 = vmatpush.bf16.msrb.mxu0 %v5119_v2  ;;  %1938 = vmatpush.bf16.msrb.mxu2 %v5120_v34  ;;  %v1648_v2 = vld [vmem:[#allocation2 + $0x198] sm:$0xff] }
 0x37d   :  { %1792 = vmatpush.bf16.msra.mxu1 %v5125_v25  ;;  %1820 = vmatpush.bf16.msra.mxu3 %v5126_v17 }
 0x37f   :  { %1911 = vmatpush.bf16.msrb.mxu0 %v5123_v57  ;;  %1939 = vmatpush.bf16.msrb.mxu2 %v5124_v21 }
 0x380   :  { %1793 = vmatmul.bf16.vlgmr.msra.gmra.mxu1 %v1658_v32  ;;  %1821 = vmatmul.bf16.vlgmr.msra.gmra.mxu3 %v1658_v32  ;;  %v5148_v32 = vld [vmem:[#allocation35_spill] sm:$0xff] }
 0x381   :  { %1924 = vmatpush.bf16.msrb.mxu1 %v5127_v38  ;;  %1952 = vmatpush.bf16.msrb.mxu3 %v5128_v62 }
 0x383   :  { %1912 = vmatpush.bf16.msrb.mxu0 %v5129_v16  ;;  %1940 = vmatpush.bf16.msrb.mxu2 %v5130_v9  ;;  %v1651_v16 = vld [vmem:[#allocation2 + $0x1b0] sm:$0xff] }
 0x385   :  { %1925 = vmatpush.bf16.msrb.mxu1 %v5131_v5  ;;  %1953 = vmatpush.bf16.msrb.mxu3 %v5132_v33 }
 0x387   :  { %1913 = vmatpush.bf16.msrb.mxu0 %v5133_v27  ;;  %1941 = vmatpush.bf16.msrb.mxu2 %v5134_v58 }
 0x389   :  { %1926 = vmatpush.bf16.msrb.mxu1 %v5135_v7  ;;  %1954 = vmatpush.bf16.msrb.mxu3 %v5136_v3 }
 0x38b   :  { %1914 = vmatpush.bf16.msrb.mxu0 %v5137_v45  ;;  %1942 = vmatpush.bf16.msrb.mxu2 %v5138_v26  ;;  %v5149_v26 = vld [vmem:[#allocation40_spill] sm:$0xff] }
 0x38d   :  { %1927 = vmatpush.bf16.msrb.mxu1 %v5139_v46  ;;  %1955 = vmatpush.bf16.msrb.mxu3 %v5140_v59  ;;  %v5150_v46 = vld [vmem:[#allocation42_spill] sm:$0xff]  ;;  %v5151_v59 = vld [vmem:[#allocation44_spill] sm:$0xff] }
 0x38f   :  { %1915 = vmatpush.bf16.msrb.mxu0 %v5141_v24  ;;  %1943 = vmatpush.bf16.msrb.mxu2 %v5142_v54  ;;  %v5152_v24 = vld [vmem:[#allocation46_spill] sm:$0xff]  ;;  %v5153_v54 = vld [vmem:[#allocation37_spill] sm:$0xff] }
 0x391   :  { %1928 = vmatpush.bf16.msrb.mxu1 %v5143_v56  ;;  %1956 = vmatpush.bf16.msrb.mxu3 %v5144_v50  ;;  %v5154_v56 = vld [vmem:[#allocation39_spill] sm:$0xff]  ;;  %v5155_v50 = vld [vmem:[#allocation48_spill] sm:$0xff] }
 0x393   :  { %1916 = vmatpush.bf16.msrb.mxu0 %v5145_v8  ;;  %1944 = vmatpush.bf16.msrb.mxu2 %v5146_v12  ;;  %v5156_v8 = vld [vmem:[#allocation50_spill] sm:$0xff]  ;;  %v5157_v12 = vld [vmem:[#allocation41_spill] sm:$0xff] }
 0x395   :  { %1929 = vmatpush.bf16.msrb.mxu1 %v5147_v52  ;;  %1957 = vmatpush.bf16.msrb.mxu3 %v5148_v32  ;;  %v5158_v52 = vld [vmem:[#allocation43_spill] sm:$0xff]  ;;  %v5159_v32 = vld [vmem:[#allocation45_spill] sm:$0xff] }
 0x397   :  { %1917 = vmatpush.bf16.msrb.mxu0 %v5149_v26  ;;  %1945 = vmatpush.bf16.msrb.mxu2 %v5150_v46  ;;  %v5160_v26 = vld [vmem:[#allocation47_spill] sm:$0xff]  ;;  %v5161_v46 = vld [vmem:[#allocation52_spill] sm:$0xff] }
 0x399   :  { %1930 = vmatpush.bf16.msrb.mxu1 %v5153_v54  ;;  %1958 = vmatpush.bf16.msrb.mxu3 %v5154_v56  ;;  %v5164_v54 = vld [vmem:[#allocation51_spill] sm:$0xff]  ;;  %v5165_v56 = vld [vmem:[#allocation56_spill] sm:$0xff] }
 0x39b   :  { %1966 = vmatpush.bf16.msra.mxu0 %v5151_v59  ;;  %1994 = vmatpush.bf16.msra.mxu2 %v5152_v24  ;;  %v5162_v59 = vld [vmem:[#allocation54_spill] sm:$0xff]  ;;  %v5163_v24 = vld [vmem:[#allocation49_spill] sm:$0xff] }
 0x39d   :  { %1931 = vmatpush.bf16.msrb.mxu1 %v5157_v12  ;;  %1959 = vmatpush.bf16.msrb.mxu3 %v5158_v52  ;;  %v5168_v12 = vld [vmem:[#allocation55_spill] sm:$0xff]  ;;  %v5169_v52 = vld [vmem:[#allocation60_spill] sm:$0xff] }
 0x39f   :  { %1967 = vmatpush.bf16.msra.mxu0 %v5155_v50  ;;  %1995 = vmatpush.bf16.msra.mxu2 %v5156_v8  ;;  %v5166_v50 = vld [vmem:[#allocation58_spill] sm:$0xff]  ;;  %v5167_v8 = vld [vmem:[#allocation53_spill] sm:$0xff] }
 0x3a1   :  { %1980 = vmatpush.bf16.msra.mxu1 %v5159_v32  ;;  %2008 = vmatpush.bf16.msra.mxu3 %v5160_v26  ;;  %v5170_v32 = vld [vmem:[#allocation62_spill] sm:$0xff]  ;;  %v5171_v26 = vld [vmem:[#allocation57_spill] sm:$0xff] }
 0x3a3   :  { %1968 = vmatpush.bf16.msra.mxu0 %v5161_v46  ;;  %1996 = vmatpush.bf16.msra.mxu2 %v5162_v59  ;;  %v5172_v46 = vld [vmem:[#allocation59_spill] sm:$0xff]  ;;  %v5173_v59 = vld [vmem:[#allocation64_spill] sm:$0xff] }
 0x3a5   :  { %1981 = vmatpush.bf16.msra.mxu1 %v5163_v24  ;;  %2009 = vmatpush.bf16.msra.mxu3 %v5164_v54  ;;  %v5174_v24 = vld [vmem:[#allocation66_spill] sm:$0xff]  ;;  %v5175_v54 = vld [vmem:[#allocation61_spill] sm:$0xff] }
 0x3a7   :  { %1969 = vmatpush.bf16.msra.mxu0 %v5165_v56  ;;  %1997 = vmatpush.bf16.msra.mxu2 %v5166_v50  ;;  %v5176_v56 = vld [vmem:[#allocation63_spill] sm:$0xff]  ;;  %v5177_v50 = vld [vmem:[#allocation68_spill] sm:$0xff] }
 0x3a9   :  { %1982 = vmatpush.bf16.msra.mxu1 %v5167_v8  ;;  %2010 = vmatpush.bf16.msra.mxu3 %v5168_v12  ;;  %v5178_v8 = vld [vmem:[#allocation70_spill] sm:$0xff]  ;;  %v5179_v12 = vld [vmem:[#allocation65_spill] sm:$0xff] }
 0x3ab   :  { %1970 = vmatpush.bf16.msra.mxu0 %v5169_v52  ;;  %1998 = vmatpush.bf16.msra.mxu2 %v5170_v32  ;;  %v5180_v52 = vld [vmem:[#allocation67_spill] sm:$0xff]  ;;  %v5181_v32 = vld [vmem:[#allocation72_spill] sm:$0xff] }
 0x3ad   :  { %1983 = vmatpush.bf16.msra.mxu1 %v5171_v26  ;;  %2011 = vmatpush.bf16.msra.mxu3 %v5172_v46  ;;  %v5182_v26 = vld [vmem:[#allocation74_spill] sm:$0xff]  ;;  %v5183_v46 = vld [vmem:[#allocation69_spill] sm:$0xff] }
 0x3af   :  { %1971 = vmatpush.bf16.msra.mxu0 %v5173_v59  ;;  %1999 = vmatpush.bf16.msra.mxu2 %v5174_v24  ;;  %v5184_v59 = vld [vmem:[#allocation71_spill] sm:$0xff]  ;;  %v5185_v24 = vld [vmem:[#allocation73_spill] sm:$0xff] }
 0x3b1   :  { %1984 = vmatpush.bf16.msra.mxu1 %v5175_v54  ;;  %2012 = vmatpush.bf16.msra.mxu3 %v5176_v56  ;;  %v5186_v54 = vld [vmem:[#allocation75_spill] sm:$0xff] }
 0x3b3   :  { %1972 = vmatpush.bf16.msra.mxu0 %v5177_v50  ;;  %2000 = vmatpush.bf16.msra.mxu2 %v5178_v8 }
 0x3b5   :  { %1985 = vmatpush.bf16.msra.mxu1 %v5179_v12  ;;  %2013 = vmatpush.bf16.msra.mxu3 %v5180_v52 }
 0x3b7   :  { %1973 = vmatpush.bf16.msra.mxu0 %v5181_v32  ;;  %2001 = vmatpush.bf16.msra.mxu2 %v5182_v26  ;;  %v1645_v32 = vld [vmem:[#allocation2 + $0x180] sm:$0xff] }
 0x3b9   :  { %1986 = vmatpush.bf16.msra.mxu1 %v5183_v46  ;;  %2014 = vmatpush.bf16.msra.mxu3 %v5184_v59  ;;  %v1646_v59 = vld [vmem:[#allocation2 + $0x188] sm:$0xff] }
 0x3bd   :  { %1987 = vmatpush.bf16.msra.mxu1 %v5185_v24  ;;  %2015 = vmatpush.bf16.msra.mxu3 %v5186_v54 }
 0x3d7   :  { %v1668_v56 = vpop.f32.mrf.mxu0 }
 0x3dd   :  { %v1682_v50 = vpop.f32.mrf.mxu1  ;;  %v1696_v45 = vpop.f32.mrf.mxu2 }
 0x3de   :  { %v1683_v52 = vadd.f32 %v1682_v50, %v1668_v56  ;;  %v1652_v50 = vld [vmem:[#allocation2 + $0x1b8] sm:$0xff] }
 0x3df   :  { %v1670_v8 = vpop.f32.mrf.mxu0 }
 0x3e0   :  { %v1827_v27 = vadd.f32 %v1683_v52, %v1645_v32  ;;  %v1647_v32 = vld [vmem:[#allocation2 + $0x190] sm:$0xff] }
 0x3e2   :  { %v1831_v24 = vmul.f32 0.5, %v1827_v27 }
 0x3e3   :  { %v1710_v3 = vpop.f32.mrf.mxu3 }
 0x3e4   :  { %v1711_v33 = vadd.f32 %v1710_v3, %v1696_v45  ;;  %3259 = vtanh.f32 %v1831_v24 }
 0x3e5   :  { %v1684_v12 = vpop.f32.mrf.mxu1  ;;  %v1698_v7 = vpop.f32.mrf.mxu2 }
 0x3e6   :  { %v1685_v9 = vadd.f32 %v1684_v12, %v1670_v8  ;;  %v1828_v54 = vadd.f32 %v1711_v33, %v1646_v59  ;;  %v1653_v59 = vld [vmem:[#allocation2 + $0x1c0] sm:$0xff] }
 0x3e7   :  { %v1724_v58 = vpop.f32.mrf.mxu0 }
 0x3e8   :  { %v1829_v38 = vadd.f32 %v1685_v9, %v1651_v16  ;;  %v1832_v25 = vmul.f32 0.5, %v1828_v54 }
 0x3ea   :  { %v1833_v56 = vmul.f32 0.5, %v1829_v38  ;;  %v3260_v52 = vpop.eup %3259  ;;  %3261 = vtanh.f32 %v1832_v25 }
 0x3eb   :  { %v1712_v26 = vpop.f32.mrf.mxu3  ;;  %v1839_v33 = vmul.f32 0.5, %v3260_v52 }
 0x3ec   :  { %v1713_v21 = vadd.f32 %v1712_v26, %v1698_v7  ;;  %3263 = vtanh.f32 %v1833_v56 }
 0x3ed   :  { %v1738_v46 = vpop.f32.mrf.mxu1  ;;  %v1752_v5 = vpop.f32.mrf.mxu2  ;;  %v1843_v34 = vadd.f32 0.5, %v1839_v33 }
 0x3ee   :  { %v1830_v3 = vadd.f32 %v1713_v21, %v1652_v50  ;;  %v1739_v45 = vadd.f32 %v1738_v46, %v1724_v58  ;;  %v1654_v58 = vld [vmem:[#allocation2 + $0x1c8] sm:$0xff] }
 0x3ef   :  { %v1726_v62 = vpop.f32.mrf.mxu0 }
 0x3f0   :  { %v1834_v16 = vmul.f32 0.5, %v1830_v3  ;;  %v1847_v24 = vadd.f32 %v1739_v45, %v1647_v32  ;;  %v3262_v7 = vpop.eup %3261 }
 0x3f1   :  { %v1840_v46 = vmul.f32 0.5, %v3262_v7  ;;  %v1655_v7 = vld [vmem:[#allocation2 + $0x1d0] sm:$0xff] }
 0x3f2   :  { %v3264_v19 = vpop.eup %3263  ;;  %3265 = vtanh.f32 %v1834_v16  ;;  %v1851_v56 = vmul.f32 0.5, %v1847_v24  ;;  %v1650_v24 = vld [vmem:[#allocation2 + $0x1a8] sm:$0xff] }
 0x3f3   :  { %v1766_v17 = vpop.f32.mrf.mxu3  ;;  %v1841_v52 = vmul.f32 0.5, %v3264_v19 }
 0x3f4   :  { %v1767_v26 = vadd.f32 %v1766_v17, %v1752_v5  ;;  %3267 = vtanh.f32 %v1851_v56 }
 0x3f5   :  { %v1740_v57 = vpop.f32.mrf.mxu1  ;;  %v1754_v35 = vpop.f32.mrf.mxu2 }
 0x3f6   :  { %v1741_v8 = vadd.f32 %v1740_v57, %v1726_v62  ;;  %v1649_v57 = vld [vmem:[#allocation2 + $0x1a0] sm:$0xff]  ;;  %v1848_v3 = vadd.f32 %v1767_v26, %v1648_v2 }
 0x3f7   :  { %v1780_v27 = vpop.f32.mrf.mxu0 }
 0x3f8   :  { %v1849_v38 = vadd.f32 %v1741_v8, %v1653_v59  ;;  %v1844_v59 = vadd.f32 0.5, %v1840_v46  ;;  %v3266_v16 = vpop.eup %3265 }
 0x3f9   :  { %v1842_v26 = vmul.f32 0.5, %v3266_v16 }
 0x3fa   :  { %v1853_v45 = vmul.f32 0.5, %v1849_v38 }
 0x3fb   :  { %v1768_v12 = vpop.f32.mrf.mxu3 }
 0x3fc   :  { %v1769_v25 = vadd.f32 %v1768_v12, %v1754_v35  ;;  %3269 = vtanh.f32 %v1853_v45 }
 0x3fd   :  { %v1794_v9 = vpop.f32.mrf.mxu1  ;;  %v1808_v62 = vpop.f32.mrf.mxu2 }
 0x3fe   :  { %v1795_v54 = vadd.f32 %v1794_v9, %v1780_v27  ;;  %v1850_v27 = vadd.f32 %v1769_v25, %v1654_v58  ;;  %v1845_v9 = vadd.f32 0.5, %v1841_v52  ;;  %v1846_v52 = vadd.f32 0.5, %v1842_v26 }
 0x3ff   :  { %v1782_v8 = vpop.f32.mrf.mxu0 }
 0x400   :  { %v1867_v21 = vadd.f32 %v1795_v54, %v3861_v55  ;;  %v1852_v54 = vmul.f32 0.5, %v1848_v3 }
 0x402   :  { %v1871_v50 = vmul.f32 %v1867_v21, %v1843_v34  ;;  %v1854_v34 = vmul.f32 0.5, %v1850_v27 }
 0x403   :  { %v1822_v32 = vpop.f32.mrf.mxu3 }
 0x404   :  { %v1875_v17 = vadd.f32 %v1871_v50, %v1649_v57  ;;  %v1823_v5 = vadd.f32 %v1822_v32, %v1808_v62  ;;  %v3268_v57 = vpop.eup %3267  ;;  %v1656_v32 = vld [vmem:[#allocation2 + $0x1d8] sm:$0xff] }
 0x405   :  { %v1796_v33 = vpop.f32.mrf.mxu1  ;;  %v1810_v21 = vpop.f32.mrf.mxu2  ;;  %v1859_v45 = vmul.f32 0.5, %v3268_v57 }
 0x406   :  { %v1868_v35 = vadd.f32 %v1823_v5, %v3864_v41  ;;  %v1797_v12 = vadd.f32 %v1796_v33, %v1782_v8  ;;  %3271 = vtanh.f32 %v1875_v17  ;;  %v3270_v56 = vpop.eup %3269 }
 0x407   :  { %3273 = vtanh.f32 %v1852_v54  ;;  %v1861_v5 = vmul.f32 0.5, %v3270_v56 }
 0x408   :  { %v1872_v2 = vmul.f32 %v1868_v35, %v1844_v59  ;;  %v1869_v19 = vadd.f32 %v1797_v12, %v3861_v55  ;;  %3275 = vtanh.f32 %v1854_v34  ;;  %v1863_v12 = vadd.f32 0.5, %v1859_v45  ;;  %v5191_v45 = vld [vmem:[#allocation16_spill] sm:$0xff] }
 0x409   :  { %v1865_v54 = vadd.f32 0.5, %v1861_v5  ;;  %v5195_v5 = vld [vmem:[#allocation13_spill] sm:$0xff] }
 0x40a   :  { %v1876_v38 = vadd.f32 %v1872_v2, %v1650_v24  ;;  %v1873_v25 = vmul.f32 %v1869_v19, %v1845_v9 }
 0x40b   :  { %v1824_v58 = vpop.f32.mrf.mxu3 }
 0x40c   :  { %v1877_v62 = vadd.f32 %v1873_v25, %v1655_v7  ;;  %v1825_v46 = vadd.f32 %v1824_v58, %v1810_v21  ;;  %3277 = vtanh.f32 %v1876_v38  ;;  %v3272_v50 = vpop.eup %3271 }
 0x40d   :  { %v3274_v17 = vpop.eup %3273  ;;  %v1883_v8 = vsub.f32 %v4216_v37, %v3272_v50 }
 0x40e   :  { %3279 = vtanh.f32 %v1877_v62  ;;  %v1870_v3 = vadd.f32 %v1825_v46, %v3864_v41  ;;  %v3276_v33 = vpop.eup %3275  ;;  %v1860_v9 = vmul.f32 0.5, %v3274_v17  ;;  %v5194_v17 = vld [vmem:[#allocation101_spill] sm:$0xff] }
 0x40f   :  { %v1887_v24 = vmul.f32 %v1883_v8, %v1863_v12  ;;  %v1862_v2 = vmul.f32 0.5, %v3276_v33  ;;  %v5196_v8 = vld [vmem:[#allocation15_spill] sm:$0xff]  ;;  %v5197_v33 = vld [vmem:[#allocation20_spill] sm:$0xff] }
 0x410   :  { %v1874_v27 = vmul.f32 %v1870_v3, %v1846_v52  ;;  %v1864_v26 = vadd.f32 0.5, %v1860_v9  ;;  %v5189_v52 = vld [vmem:[#allocation98_spill] sm:$0xff]  ;;  %v5190_v3 = vld [vmem:[#allocation99_spill] sm:$0xff] }
 0x411   :  { %v4332_v38 = vadd.f32 %v3272_v50, %v1887_v24  ;;  %v1866_v21 = vadd.f32 0.5, %v1862_v2  ;;  %v5188_v50 = vld [vmem:[#allocation14_spill] sm:$0xff]  ;;  %v5200_v12 = vld [vmem:[#allocation19_spill] sm:$0xff] }
 0x412   :  { %v1878_v59 = vadd.f32 %v1874_v27, %v1656_v32  ;;  %v3278_v35 = vpop.eup %3277  ;;  %v5192_v32 = vld [vmem:[#allocation18_spill] sm:$0xff]  ;;  %v5193_v27 = vld [vmem:[#allocation100_spill] sm:$0xff]  ;;  %v5204_v24 = vld [vmem:[#allocation23_spill] sm:$0xff] }
 0x413   :  { %v1884_v19 = vsub.f32 %v4225_v44, %v3278_v35  ;;  %v5202_v9 = vld [vmem:[#allocation26_spill] sm:$0xff] }
 0x414   :  { %v3280_v16 = vpop.eup %3279  ;;  %3281 = vtanh.f32 %v1878_v59  ;;  %v5198_v59 = vld [vmem:[#allocation22_spill] sm:$0xff] }
 0x415   :  { %v1885_v34 = vsub.f32 %v4218_v29, %v3280_v16  ;;  %v1888_v58 = vmul.f32 %v1884_v19, %v1864_v26  ;;  %v5206_v2 = vld [vmem:[#allocation30_spill] sm:$0xff]  ;;  %v5207_v19 = vld [vmem:[#allocation25_spill] sm:$0xff]  ;;  %v5209_v26 = vld [vmem:[#allocation32_spill] sm:$0xff] }
 0x417   :  { %v1889_v7 = vmul.f32 %v1885_v34, %v1865_v54  ;;  %v4341_v29 = vadd.f32 %v3278_v35, %v1888_v58  ;;  %v5199_v35 = vld [vmem:[#allocation17_spill] sm:$0xff]  ;;  %v5205_v34 = vld [vmem:[#allocation28_spill] sm:$0xff]  ;;  %v5212_v58 = vld [vmem:[#allocation31_spill] sm:$0xff] }
 0x418   :  { %v5203_v54 = vld [vmem:[#allocation21_spill] sm:$0xff] }
 0x419   :  { %v4334_v25 = vadd.f32 %v3280_v16, %v1889_v7  ;;  %v5201_v16 = vld [vmem:[#allocation24_spill] sm:$0xff]  ;;  %v5208_v7 = vld [vmem:[#allocation27_spill] sm:$0xff] }
 0x41a   :  { %v3282_v37 = vpop.eup %3281 }
 0x41b   :  { %v1908_v57 = vpack.c.bf16 %v4334_v25, %v4332_v38  ;;  %v1886_v62 = vsub.f32 %v4227_v13, %v3282_v37  ;;  %v5187_v13 = vld [vmem:[#allocation12_spill] sm:$0xff] }
 0x41d   :  { %v1890_v46 = vmul.f32 %v1886_v62, %v1866_v21  ;;  %1918 = vmatmul.bf16.vlgmr.msrb.gmra.mxu0 %v1908_v57  ;;  %1946 = vmatmul.bf16.vlgmr.msrb.gmra.mxu2 %v1908_v57  ;;  %v5211_v21 = vld [vmem:[#allocation29_spill] sm:$0xff]  ;;  %v5214_v62 = vld [vmem:[#allocation38_spill] sm:$0xff] }
 0x41e   :  { %2022 = vmatpush.bf16.msrb.mxu0 %v4919_v39  ;;  %2050 = vmatpush.bf16.msrb.mxu2 %v4920_v47 }
 0x41f   :  { %v4343_v44 = vadd.f32 %v3282_v37, %v1890_v46  ;;  %v5210_v37 = vld [vmem:[#allocation34_spill] sm:$0xff]  ;;  %v5215_v46 = vld [vmem:[#allocation33_spill] sm:$0xff] }
 0x421   :  { %v1909_v56 = vpack.c.bf16 %v4343_v44, %v4341_v29 }
 0x422   :  { %2023 = vmatpush.bf16.msrb.mxu0 %v4921_v20  ;;  %2051 = vmatpush.bf16.msrb.mxu2 %v4922_v51 }
 0x423   :  { %1932 = vmatmul.bf16.vlgmr.msrb.gmra.mxu1 %v1909_v56  ;;  %1960 = vmatmul.bf16.vlgmr.msrb.gmra.mxu3 %v1909_v56 }
 0x424   :  { %2036 = vmatpush.bf16.msrb.mxu1 %v4923_v22  ;;  %2064 = vmatpush.bf16.msrb.mxu3 %v4924_v63 }
 0x426   :  { %2024 = vmatpush.bf16.msrb.mxu0 %v4925_v60  ;;  %2052 = vmatpush.bf16.msrb.mxu2 %v4926_v10 }
 0x428   :  { %2037 = vmatpush.bf16.msrb.mxu1 %v4927_v0  ;;  %2065 = vmatpush.bf16.msrb.mxu3 %v4928_v1 }
 0x42a   :  { %2025 = vmatpush.bf16.msrb.mxu0 %v4929_v14  ;;  %2053 = vmatpush.bf16.msrb.mxu2 %v4930_v31 }
 0x42c   :  { %2038 = vmatpush.bf16.msrb.mxu1 %v4931_v11  ;;  %2066 = vmatpush.bf16.msrb.mxu3 %v4932_v43 }
 0x42d   :  { %1974 = vmatmul.bf16.vlgmr.msra.gmra.mxu0 %v1908_v57  ;;  %2002 = vmatmul.bf16.vlgmr.msra.gmra.mxu2 %v1908_v57 }
 0x42e   :  { %2026 = vmatpush.bf16.msrb.mxu0 %v4933_v18  ;;  %2054 = vmatpush.bf16.msrb.mxu2 %v4934_v40 }
 0x430   :  { %2039 = vmatpush.bf16.msrb.mxu1 %v4935_v4  ;;  %2067 = vmatpush.bf16.msrb.mxu3 %v4936_v61 }
 0x432   :  { %2027 = vmatpush.bf16.msrb.mxu0 %v4937_v23  ;;  %2055 = vmatpush.bf16.msrb.mxu2 %v3760_v49 }
 0x433   :  { %1988 = vmatmul.bf16.vlgmr.msra.gmra.mxu1 %v1909_v56  ;;  %2016 = vmatmul.bf16.vlgmr.msra.gmra.mxu3 %v1909_v56 }
 0x434   :  { %2040 = vmatpush.bf16.msrb.mxu1 %v4938_v53  ;;  %2068 = vmatpush.bf16.msrb.mxu3 %v4939_v6 }
 0x436   :  { %2028 = vmatpush.bf16.msrb.mxu0 %v3766_v30  ;;  %2056 = vmatpush.bf16.msrb.mxu2 %v3772_v48 }
 0x438   :  { %2041 = vmatpush.bf16.msrb.mxu1 %v4940_v28  ;;  %2069 = vmatpush.bf16.msrb.mxu3 %v3763_v42 }
 0x43a   :  { %2029 = vmatpush.bf16.msrb.mxu0 %v3778_v36  ;;  %2057 = vmatpush.bf16.msrb.mxu2 %v3784_v15 }
 0x43c   :  { %2042 = vmatpush.bf16.msrb.mxu1 %v5189_v52  ;;  %2070 = vmatpush.bf16.msrb.mxu3 %v5190_v3 }
 0x43d   :  { %2030 = vmatmul.bf16.vlgmr.msrb.gmra.mxu0 %v1908_v57  ;;  %2058 = vmatmul.bf16.vlgmr.msrb.gmra.mxu2 %v1908_v57  ;;  %v5213_v57 = vld [vmem:[#allocation36_spill] sm:$0xff] }
 0x43e   :  { %2161 = vmatpush.bf16.msra.mxu0 %v5187_v13  ;;  %2189 = vmatpush.bf16.msra.mxu2 %v5188_v50  ;;  %v1899_v13 = vld [vmem:[#allocation2 + $0x1f8] sm:$0xff] }
 0x440   :  { %2043 = vmatpush.bf16.msrb.mxu1 %v5193_v27  ;;  %2071 = vmatpush.bf16.msrb.mxu3 %v5194_v17 }
 0x442   :  { %2162 = vmatpush.bf16.msra.mxu0 %v5191_v45  ;;  %2190 = vmatpush.bf16.msra.mxu2 %v5192_v32 }
 0x443   :  { %2044 = vmatmul.bf16.vlgmr.msrb.gmra.mxu1 %v1909_v56  ;;  %2072 = vmatmul.bf16.vlgmr.msrb.gmra.mxu3 %v1909_v56  ;;  %v5216_v56 = vld [vmem:[#allocation35_spill] sm:$0xff] }
 0x444   :  { %2175 = vmatpush.bf16.msra.mxu1 %v5195_v5  ;;  %2203 = vmatpush.bf16.msra.mxu3 %v5196_v8 }
 0x446   :  { %2163 = vmatpush.bf16.msra.mxu0 %v5197_v33  ;;  %2191 = vmatpush.bf16.msra.mxu2 %v5198_v59  ;;  %v1902_v33 = vld [vmem:[#allocation2 + $0x210] sm:$0xff] }
 0x448   :  { %2176 = vmatpush.bf16.msra.mxu1 %v5199_v35  ;;  %2204 = vmatpush.bf16.msra.mxu3 %v5200_v12 }
 0x44a   :  { %2164 = vmatpush.bf16.msra.mxu0 %v5201_v16  ;;  %2192 = vmatpush.bf16.msra.mxu2 %v5202_v9 }
 0x44c   :  { %2177 = vmatpush.bf16.msra.mxu1 %v5203_v54  ;;  %2205 = vmatpush.bf16.msra.mxu3 %v5204_v24 }
 0x44e   :  { %2165 = vmatpush.bf16.msra.mxu0 %v5205_v34  ;;  %2193 = vmatpush.bf16.msra.mxu2 %v5206_v2  ;;  %v5217_v2 = vld [vmem:[#allocation40_spill] sm:$0xff] }
 0x450   :  { %2178 = vmatpush.bf16.msra.mxu1 %v5207_v19  ;;  %2206 = vmatpush.bf16.msra.mxu3 %v5208_v7  ;;  %v5218_v19 = vld [vmem:[#allocation42_spill] sm:$0xff]  ;;  %v5219_v7 = vld [vmem:[#allocation44_spill] sm:$0xff] }
 0x452   :  { %2166 = vmatpush.bf16.msra.mxu0 %v5209_v26  ;;  %2194 = vmatpush.bf16.msra.mxu2 %v5210_v37  ;;  %v5220_v26 = vld [vmem:[#allocation46_spill] sm:$0xff]  ;;  %v5221_v37 = vld [vmem:[#allocation37_spill] sm:$0xff] }
 0x454   :  { %2179 = vmatpush.bf16.msra.mxu1 %v5211_v21  ;;  %2207 = vmatpush.bf16.msra.mxu3 %v5212_v58  ;;  %v5222_v21 = vld [vmem:[#allocation39_spill] sm:$0xff]  ;;  %v5223_v58 = vld [vmem:[#allocation48_spill] sm:$0xff] }
 0x456   :  { %2167 = vmatpush.bf16.msra.mxu0 %v5213_v57  ;;  %2195 = vmatpush.bf16.msra.mxu2 %v5214_v62  ;;  %v5224_v57 = vld [vmem:[#allocation50_spill] sm:$0xff]  ;;  %v5225_v62 = vld [vmem:[#allocation41_spill] sm:$0xff] }
 0x458   :  { %2180 = vmatpush.bf16.msra.mxu1 %v5215_v46  ;;  %2208 = vmatpush.bf16.msra.mxu3 %v5216_v56  ;;  %v5226_v46 = vld [vmem:[#allocation43_spill] sm:$0xff]  ;;  %v5227_v56 = vld [vmem:[#allocation45_spill] sm:$0xff] }
 0x45a   :  { %2168 = vmatpush.bf16.msra.mxu0 %v5217_v2  ;;  %2196 = vmatpush.bf16.msra.mxu2 %v5218_v19  ;;  %v5228_v2 = vld [vmem:[#allocation47_spill] sm:$0xff]  ;;  %v5229_v19 = vld [vmem:[#allocation52_spill] sm:$0xff] }
 0x45c   :  { %2181 = vmatpush.bf16.msra.mxu1 %v5221_v37  ;;  %2209 = vmatpush.bf16.msra.mxu3 %v5222_v21  ;;  %v5232_v37 = vld [vmem:[#allocation51_spill] sm:$0xff]  ;;  %v5233_v21 = vld [vmem:[#allocation56_spill] sm:$0xff] }
 0x45e   :  { %2217 = vmatpush.bf16.msrb.mxu0 %v5219_v7  ;;  %2245 = vmatpush.bf16.msrb.mxu2 %v5220_v26  ;;  %v5230_v7 = vld [vmem:[#allocation54_spill] sm:$0xff]  ;;  %v5231_v26 = vld [vmem:[#allocation49_spill] sm:$0xff] }
 0x460   :  { %2182 = vmatpush.bf16.msra.mxu1 %v5225_v62  ;;  %2210 = vmatpush.bf16.msra.mxu3 %v5226_v46  ;;  %v5236_v62 = vld [vmem:[#allocation55_spill] sm:$0xff]  ;;  %v5237_v46 = vld [vmem:[#allocation60_spill] sm:$0xff] }
 0x462   :  { %2218 = vmatpush.bf16.msrb.mxu0 %v5223_v58  ;;  %2246 = vmatpush.bf16.msrb.mxu2 %v5224_v57  ;;  %v5234_v58 = vld [vmem:[#allocation58_spill] sm:$0xff]  ;;  %v5235_v57 = vld [vmem:[#allocation53_spill] sm:$0xff] }
 0x464   :  { %2231 = vmatpush.bf16.msrb.mxu1 %v5227_v56  ;;  %2259 = vmatpush.bf16.msrb.mxu3 %v5228_v2  ;;  %v5238_v56 = vld [vmem:[#allocation62_spill] sm:$0xff]  ;;  %v5239_v2 = vld [vmem:[#allocation57_spill] sm:$0xff] }
 0x466   :  { %2219 = vmatpush.bf16.msrb.mxu0 %v5229_v19  ;;  %2247 = vmatpush.bf16.msrb.mxu2 %v5230_v7  ;;  %v5240_v19 = vld [vmem:[#allocation59_spill] sm:$0xff]  ;;  %v5241_v7 = vld [vmem:[#allocation64_spill] sm:$0xff] }
 0x468   :  { %2232 = vmatpush.bf16.msrb.mxu1 %v5231_v26  ;;  %2260 = vmatpush.bf16.msrb.mxu3 %v5232_v37  ;;  %v5242_v26 = vld [vmem:[#allocation66_spill] sm:$0xff]  ;;  %v5243_v37 = vld [vmem:[#allocation61_spill] sm:$0xff] }
 0x46a   :  { %2220 = vmatpush.bf16.msrb.mxu0 %v5233_v21  ;;  %2248 = vmatpush.bf16.msrb.mxu2 %v5234_v58  ;;  %v5244_v21 = vld [vmem:[#allocation63_spill] sm:$0xff]  ;;  %v5245_v58 = vld [vmem:[#allocation68_spill] sm:$0xff] }
 0x46c   :  { %2233 = vmatpush.bf16.msrb.mxu1 %v5235_v57  ;;  %2261 = vmatpush.bf16.msrb.mxu3 %v5236_v62  ;;  %v5246_v57 = vld [vmem:[#allocation70_spill] sm:$0xff]  ;;  %v5247_v62 = vld [vmem:[#allocation65_spill] sm:$0xff] }
 0x46e   :  { %2221 = vmatpush.bf16.msrb.mxu0 %v5237_v46  ;;  %2249 = vmatpush.bf16.msrb.mxu2 %v5238_v56  ;;  %v5248_v46 = vld [vmem:[#allocation67_spill] sm:$0xff]  ;;  %v5249_v56 = vld [vmem:[#allocation72_spill] sm:$0xff] }
 0x470   :  { %2234 = vmatpush.bf16.msrb.mxu1 %v5239_v2  ;;  %2262 = vmatpush.bf16.msrb.mxu3 %v5240_v19  ;;  %v5250_v2 = vld [vmem:[#allocation74_spill] sm:$0xff]  ;;  %v5251_v19 = vld [vmem:[#allocation69_spill] sm:$0xff] }
 0x472   :  { %2222 = vmatpush.bf16.msrb.mxu0 %v5241_v7  ;;  %2250 = vmatpush.bf16.msrb.mxu2 %v5242_v26  ;;  %v5252_v7 = vld [vmem:[#allocation71_spill] sm:$0xff]  ;;  %v5253_v26 = vld [vmem:[#allocation73_spill] sm:$0xff] }
 0x474   :  { %2235 = vmatpush.bf16.msrb.mxu1 %v5243_v37  ;;  %2263 = vmatpush.bf16.msrb.mxu3 %v5244_v21  ;;  %v5254_v37 = vld [vmem:[#allocation75_spill] sm:$0xff] }
 0x476   :  { %2223 = vmatpush.bf16.msrb.mxu0 %v5245_v58  ;;  %2251 = vmatpush.bf16.msrb.mxu2 %v5246_v57 }
 0x478   :  { %2236 = vmatpush.bf16.msrb.mxu1 %v5247_v62  ;;  %2264 = vmatpush.bf16.msrb.mxu3 %v5248_v46 }
 0x47a   :  { %2224 = vmatpush.bf16.msrb.mxu0 %v5249_v56  ;;  %2252 = vmatpush.bf16.msrb.mxu2 %v5250_v2  ;;  %v1896_v56 = vld [vmem:[#allocation2 + $0x1e0] sm:$0xff] }
 0x47c   :  { %2237 = vmatpush.bf16.msrb.mxu1 %v5251_v19  ;;  %2265 = vmatpush.bf16.msrb.mxu3 %v5252_v7  ;;  %v1897_v7 = vld [vmem:[#allocation2 + $0x1e8] sm:$0xff] }
 0x480   :  { %2238 = vmatpush.bf16.msrb.mxu1 %v5253_v26  ;;  %2266 = vmatpush.bf16.msrb.mxu3 %v5254_v37 }
 0x49a   :  { %v1919_v21 = vpop.f32.mrf.mxu0 }
 0x4a0   :  { %v1933_v58 = vpop.f32.mrf.mxu1  ;;  %v1947_v34 = vpop.f32.mrf.mxu2 }
 0x4a1   :  { %v1934_v46 = vadd.f32 %v1933_v58, %v1919_v21  ;;  %v1903_v58 = vld [vmem:[#allocation2 + $0x218] sm:$0xff] }
 0x4a2   :  { %v1921_v57 = vpop.f32.mrf.mxu0 }
 0x4a3   :  { %v2078_v16 = vadd.f32 %v1934_v46, %v1896_v56  ;;  %v1898_v56 = vld [vmem:[#allocation2 + $0x1f0] sm:$0xff] }
 0x4a5   :  { %v2082_v26 = vmul.f32 0.5, %v2078_v16 }
 0x4a6   :  { %v1961_v24 = vpop.f32.mrf.mxu3 }
 0x4a7   :  { %v1962_v12 = vadd.f32 %v1961_v24, %v1947_v34  ;;  %3283 = vtanh.f32 %v2082_v26 }
 0x4a8   :  { %v1935_v62 = vpop.f32.mrf.mxu1  ;;  %v1949_v54 = vpop.f32.mrf.mxu2 }
 0x4a9   :  { %v1936_v59 = vadd.f32 %v1935_v62, %v1921_v57  ;;  %v2079_v37 = vadd.f32 %v1962_v12, %v1897_v7  ;;  %v1904_v7 = vld [vmem:[#allocation2 + $0x220] sm:$0xff] }
 0x4aa   :  { %v1975_v9 = vpop.f32.mrf.mxu0 }
 0x4ab   :  { %v2080_v5 = vadd.f32 %v1936_v59, %v1902_v33  ;;  %v2083_v27 = vmul.f32 0.5, %v2079_v37 }
 0x4ad   :  { %v2084_v21 = vmul.f32 0.5, %v2080_v5  ;;  %v3284_v46 = vpop.eup %3283  ;;  %3285 = vtanh.f32 %v2083_v27 }
 0x4ae   :  { %v1963_v2 = vpop.f32.mrf.mxu3  ;;  %v2090_v12 = vmul.f32 0.5, %v3284_v46 }
 0x4af   :  { %v1964_v32 = vadd.f32 %v1963_v2, %v1949_v54  ;;  %3287 = vtanh.f32 %v2084_v21 }
 0x4b0   :  { %v1989_v19 = vpop.f32.mrf.mxu1  ;;  %v2003_v35 = vpop.f32.mrf.mxu2  ;;  %v2094_v50 = vadd.f32 0.5, %v2090_v12 }
 0x4b1   :  { %v2081_v24 = vadd.f32 %v1964_v32, %v1903_v58  ;;  %v1990_v34 = vadd.f32 %v1989_v19, %v1975_v9  ;;  %v1905_v9 = vld [vmem:[#allocation2 + $0x228] sm:$0xff] }
 0x4b2   :  { %v1977_v8 = vpop.f32.mrf.mxu0 }
 0x4b3   :  { %v2085_v33 = vmul.f32 0.5, %v2081_v24  ;;  %v2098_v26 = vadd.f32 %v1990_v34, %v1898_v56  ;;  %v3286_v54 = vpop.eup %3285 }
 0x4b4   :  { %v2091_v19 = vmul.f32 0.5, %v3286_v54  ;;  %v1906_v54 = vld [vmem:[#allocation2 + $0x230] sm:$0xff] }
 0x4b5   :  { %v3288_v52 = vpop.eup %3287  ;;  %3289 = vtanh.f32 %v2085_v33  ;;  %v2102_v21 = vmul.f32 0.5, %v2098_v26  ;;  %v1901_v26 = vld [vmem:[#allocation2 + $0x208] sm:$0xff] }
 0x4b6   :  { %v2017_v17 = vpop.f32.mrf.mxu3  ;;  %v2092_v46 = vmul.f32 0.5, %v3288_v52 }
 0x4b7   :  { %v2018_v2 = vadd.f32 %v2017_v17, %v2003_v35  ;;  %3291 = vtanh.f32 %v2102_v21 }
 0x4b8   :  { %v1991_v45 = vpop.f32.mrf.mxu1  ;;  %v2005_v3 = vpop.f32.mrf.mxu2 }
 0x4b9   :  { %v1992_v57 = vadd.f32 %v1991_v45, %v1977_v8  ;;  %v1900_v45 = vld [vmem:[#allocation2 + $0x200] sm:$0xff]  ;;  %v2099_v24 = vadd.f32 %v2018_v2, %v1899_v13 }
 0x4ba   :  { %v2031_v16 = vpop.f32.mrf.mxu0 }
 0x4bb   :  { %v2100_v5 = vadd.f32 %v1992_v57, %v1904_v7  ;;  %v2095_v7 = vadd.f32 0.5, %v2091_v19  ;;  %v3290_v33 = vpop.eup %3289 }
 0x4bc   :  { %v2093_v2 = vmul.f32 0.5, %v3290_v33 }
 0x4bd   :  { %v2104_v34 = vmul.f32 0.5, %v2100_v5 }
 0x4be   :  { %v2019_v62 = vpop.f32.mrf.mxu3 }
 0x4bf   :  { %v2020_v27 = vadd.f32 %v2019_v62, %v2005_v3  ;;  %3293 = vtanh.f32 %v2104_v34 }
 0x4c0   :  { %v2045_v59 = vpop.f32.mrf.mxu1  ;;  %v2059_v8 = vpop.f32.mrf.mxu2 }
 0x4c1   :  { %v2046_v37 = vadd.f32 %v2045_v59, %v2031_v16  ;;  %v2101_v16 = vadd.f32 %v2020_v27, %v1905_v9  ;;  %v2096_v59 = vadd.f32 0.5, %v2092_v46  ;;  %v2097_v46 = vadd.f32 0.5, %v2093_v2 }
 0x4c2   :  { %v2033_v57 = vpop.f32.mrf.mxu0 }
 0x4c3   :  { %v2118_v32 = vadd.f32 %v2046_v37, %v3861_v55  ;;  %v2103_v37 = vmul.f32 0.5, %v2099_v24 }
 0x4c5   :  { %v2122_v58 = vmul.f32 %v2118_v32, %v2094_v50  ;;  %v2105_v50 = vmul.f32 0.5, %v2101_v16 }
 0x4c6   :  { %v2073_v56 = vpop.f32.mrf.mxu3 }
 0x4c7   :  { %v2126_v17 = vadd.f32 %v2122_v58, %v1900_v45  ;;  %v2074_v35 = vadd.f32 %v2073_v56, %v2059_v8  ;;  %v3292_v45 = vpop.eup %3291  ;;  %v1907_v56 = vld [vmem:[#allocation2 + $0x238] sm:$0xff] }
 0x4c8   :  { %v2047_v12 = vpop.f32.mrf.mxu1  ;;  %v2061_v32 = vpop.f32.mrf.mxu2  ;;  %v2110_v34 = vmul.f32 0.5, %v3292_v45 }
 0x4c9   :  { %v2119_v3 = vadd.f32 %v2074_v35, %v3864_v41  ;;  %v2048_v62 = vadd.f32 %v2047_v12, %v2033_v57  ;;  %3295 = vtanh.f32 %v2126_v17  ;;  %v3294_v21 = vpop.eup %3293 }
 0x4ca   :  { %3297 = vtanh.f32 %v2103_v37  ;;  %v2112_v35 = vmul.f32 0.5, %v3294_v21 }
 0x4cb   :  { %v2123_v13 = vmul.f32 %v2119_v3, %v2095_v7  ;;  %v2120_v52 = vadd.f32 %v2048_v62, %v3861_v55  ;;  %3299 = vtanh.f32 %v2105_v50  ;;  %v2114_v62 = vadd.f32 0.5, %v2110_v34  ;;  %v5259_v34 = vld [vmem:[#allocation16_spill] sm:$0xff] }
 0x4cc   :  { %v2116_v37 = vadd.f32 0.5, %v2112_v35  ;;  %v5263_v35 = vld [vmem:[#allocation13_spill] sm:$0xff] }
 0x4cd   :  { %v2127_v5 = vadd.f32 %v2123_v13, %v1901_v26  ;;  %v2124_v27 = vmul.f32 %v2120_v52, %v2096_v59 }
 0x4ce   :  { %v2075_v9 = vpop.f32.mrf.mxu3 }
 0x4cf   :  { %v2128_v8 = vadd.f32 %v2124_v27, %v1906_v54  ;;  %v2076_v19 = vadd.f32 %v2075_v9, %v2061_v32  ;;  %3301 = vtanh.f32 %v2127_v5  ;;  %v3296_v58 = vpop.eup %3295 }
 0x4d0   :  { %v3298_v17 = vpop.eup %3297  ;;  %v2134_v57 = vsub.f32 %v4332_v38, %v3296_v58 }
 0x4d1   :  { %3303 = vtanh.f32 %v2128_v8  ;;  %v2121_v24 = vadd.f32 %v2076_v19, %v3864_v41  ;;  %v3300_v12 = vpop.eup %3299  ;;  %v2111_v59 = vmul.f32 0.5, %v3298_v17  ;;  %v5262_v17 = vld [vmem:[#allocation101_spill] sm:$0xff] }
 0x4d2   :  { %v2138_v26 = vmul.f32 %v2134_v57, %v2114_v62  ;;  %v2113_v13 = vmul.f32 0.5, %v3300_v12  ;;  %v5264_v57 = vld [vmem:[#allocation15_spill] sm:$0xff]  ;;  %v5265_v12 = vld [vmem:[#allocation20_spill] sm:$0xff] }
 0x4d3   :  { %v2125_v16 = vmul.f32 %v2121_v24, %v2097_v46  ;;  %v2115_v2 = vadd.f32 0.5, %v2111_v59  ;;  %v5257_v46 = vld [vmem:[#allocation98_spill] sm:$0xff]  ;;  %v5258_v24 = vld [vmem:[#allocation99_spill] sm:$0xff] }
 0x4d4   :  { %v4448_v5 = vadd.f32 %v3296_v58, %v2138_v26  ;;  %v2117_v32 = vadd.f32 0.5, %v2113_v13  ;;  %v5256_v58 = vld [vmem:[#allocation14_spill] sm:$0xff]  ;;  %v5268_v62 = vld [vmem:[#allocation19_spill] sm:$0xff] }
 0x4d5   :  { %v2129_v7 = vadd.f32 %v2125_v16, %v1907_v56  ;;  %v3302_v3 = vpop.eup %3301  ;;  %v5260_v56 = vld [vmem:[#allocation18_spill] sm:$0xff]  ;;  %v5261_v16 = vld [vmem:[#allocation100_spill] sm:$0xff]  ;;  %v5272_v26 = vld [vmem:[#allocation23_spill] sm:$0xff] }
 0x4d6   :  { %v2135_v52 = vsub.f32 %v4341_v29, %v3302_v3  ;;  %v5270_v59 = vld [vmem:[#allocation26_spill] sm:$0xff] }
 0x4d7   :  { %v3304_v33 = vpop.eup %3303  ;;  %3305 = vtanh.f32 %v2129_v7  ;;  %v5266_v7 = vld [vmem:[#allocation22_spill] sm:$0xff] }
 0x4d8   :  { %v2136_v50 = vsub.f32 %v4334_v25, %v3304_v33  ;;  %v2139_v9 = vmul.f32 %v2135_v52, %v2115_v2  ;;  %v5274_v13 = vld [vmem:[#allocation30_spill] sm:$0xff]  ;;  %v5275_v52 = vld [vmem:[#allocation25_spill] sm:$0xff]  ;;  %v5277_v2 = vld [vmem:[#allocation32_spill] sm:$0xff] }
 0x4da   :  { %v2140_v54 = vmul.f32 %v2136_v50, %v2116_v37  ;;  %v4457_v25 = vadd.f32 %v3302_v3, %v2139_v9  ;;  %v5267_v3 = vld [vmem:[#allocation17_spill] sm:$0xff]  ;;  %v5273_v50 = vld [vmem:[#allocation28_spill] sm:$0xff]  ;;  %v5280_v9 = vld [vmem:[#allocation31_spill] sm:$0xff] }
 0x4db   :  { %v5271_v37 = vld [vmem:[#allocation21_spill] sm:$0xff] }
 0x4dc   :  { %v4450_v27 = vadd.f32 %v3304_v33, %v2140_v54  ;;  %v5269_v33 = vld [vmem:[#allocation24_spill] sm:$0xff]  ;;  %v5276_v54 = vld [vmem:[#allocation27_spill] sm:$0xff] }
 0x4dd   :  { %v3306_v38 = vpop.eup %3305 }
 0x4de   :  { %v2159_v45 = vpack.c.bf16 %v4450_v27, %v4448_v5  ;;  %v2137_v8 = vsub.f32 %v4343_v44, %v3306_v38  ;;  %v5255_v44 = vld [vmem:[#allocation12_spill] sm:$0xff] }
 0x4e0   :  { %v2141_v19 = vmul.f32 %v2137_v8, %v2117_v32  ;;  %2169 = vmatmul.bf16.vlgmr.msra.gmra.mxu0 %v2159_v45  ;;  %2197 = vmatmul.bf16.vlgmr.msra.gmra.mxu2 %v2159_v45  ;;  %v5279_v32 = vld [vmem:[#allocation29_spill] sm:$0xff]  ;;  %v5282_v8 = vld [vmem:[#allocation38_spill] sm:$0xff] }
 0x4e1   :  { %2273 = vmatpush.bf16.msra.mxu0 %v4919_v39  ;;  %2301 = vmatpush.bf16.msra.mxu2 %v4920_v47 }
 0x4e2   :  { %v4459_v29 = vadd.f32 %v3306_v38, %v2141_v19  ;;  %v5278_v38 = vld [vmem:[#allocation34_spill] sm:$0xff]  ;;  %v5283_v19 = vld [vmem:[#allocation33_spill] sm:$0xff] }
 0x4e4   :  { %v2160_v21 = vpack.c.bf16 %v4459_v29, %v4457_v25 }
 0x4e5   :  { %2274 = vmatpush.bf16.msra.mxu0 %v4921_v20  ;;  %2302 = vmatpush.bf16.msra.mxu2 %v4922_v51 }
 0x4e6   :  { %2183 = vmatmul.bf16.vlgmr.msra.gmra.mxu1 %v2160_v21  ;;  %2211 = vmatmul.bf16.vlgmr.msra.gmra.mxu3 %v2160_v21 }
 0x4e7   :  { %2287 = vmatpush.bf16.msra.mxu1 %v4923_v22  ;;  %2315 = vmatpush.bf16.msra.mxu3 %v4924_v63 }
 0x4e9   :  { %2275 = vmatpush.bf16.msra.mxu0 %v4925_v60  ;;  %2303 = vmatpush.bf16.msra.mxu2 %v4926_v10 }
 0x4eb   :  { %2288 = vmatpush.bf16.msra.mxu1 %v4927_v0  ;;  %2316 = vmatpush.bf16.msra.mxu3 %v4928_v1 }
 0x4ed   :  { %2276 = vmatpush.bf16.msra.mxu0 %v4929_v14  ;;  %2304 = vmatpush.bf16.msra.mxu2 %v4930_v31 }
 0x4ef   :  { %2289 = vmatpush.bf16.msra.mxu1 %v4931_v11  ;;  %2317 = vmatpush.bf16.msra.mxu3 %v4932_v43 }
 0x4f0   :  { %2225 = vmatmul.bf16.vlgmr.msrb.gmra.mxu0 %v2159_v45  ;;  %2253 = vmatmul.bf16.vlgmr.msrb.gmra.mxu2 %v2159_v45 }
 0x4f1   :  { %2277 = vmatpush.bf16.msra.mxu0 %v4933_v18  ;;  %2305 = vmatpush.bf16.msra.mxu2 %v4934_v40 }
 0x4f3   :  { %2290 = vmatpush.bf16.msra.mxu1 %v4935_v4  ;;  %2318 = vmatpush.bf16.msra.mxu3 %v4936_v61 }
 0x4f5   :  { %2278 = vmatpush.bf16.msra.mxu0 %v4937_v23  ;;  %2306 = vmatpush.bf16.msra.mxu2 %v3760_v49 }
 0x4f6   :  { %2239 = vmatmul.bf16.vlgmr.msrb.gmra.mxu1 %v2160_v21  ;;  %2267 = vmatmul.bf16.vlgmr.msrb.gmra.mxu3 %v2160_v21 }
 0x4f7   :  { %2291 = vmatpush.bf16.msra.mxu1 %v4938_v53  ;;  %2319 = vmatpush.bf16.msra.mxu3 %v4939_v6 }
 0x4f9   :  { %2279 = vmatpush.bf16.msra.mxu0 %v3766_v30  ;;  %2307 = vmatpush.bf16.msra.mxu2 %v3772_v48 }
 0x4fb   :  { %2292 = vmatpush.bf16.msra.mxu1 %v4940_v28  ;;  %2320 = vmatpush.bf16.msra.mxu3 %v3763_v42 }
 0x4fd   :  { %2280 = vmatpush.bf16.msra.mxu0 %v3778_v36  ;;  %2308 = vmatpush.bf16.msra.mxu2 %v3784_v15 }
 0x4ff   :  { %2293 = vmatpush.bf16.msra.mxu1 %v5257_v46  ;;  %2321 = vmatpush.bf16.msra.mxu3 %v5258_v24  ;;  %v2150_v46 = vld [vmem:[#allocation2 + $0x258] sm:$0xff] }
 0x500   :  { %2281 = vmatmul.bf16.vlgmr.msra.gmra.mxu0 %v2159_v45  ;;  %2309 = vmatmul.bf16.vlgmr.msra.gmra.mxu2 %v2159_v45  ;;  %v5281_v45 = vld [vmem:[#allocation36_spill] sm:$0xff] }
 0x501   :  { %2412 = vmatpush.bf16.msrb.mxu0 %v5255_v44  ;;  %2440 = vmatpush.bf16.msrb.mxu2 %v5256_v58  ;;  %v5285_v44 = vld [vmem:[#allocation40_spill] sm:$0xff]  ;;  %v5286_v58 = vld [vmem:[#allocation42_spill] sm:$0xff] }
 0x503   :  { %2294 = vmatpush.bf16.msra.mxu1 %v5261_v16  ;;  %2322 = vmatpush.bf16.msra.mxu3 %v5262_v17 }
 0x505   :  { %2413 = vmatpush.bf16.msrb.mxu0 %v5259_v34  ;;  %2441 = vmatpush.bf16.msrb.mxu2 %v5260_v56  ;;  %v5287_v34 = vld [vmem:[#allocation44_spill] sm:$0xff]  ;;  %v5288_v56 = vld [vmem:[#allocation46_spill] sm:$0xff] }
 0x506   :  { %2295 = vmatmul.bf16.vlgmr.msra.gmra.mxu1 %v2160_v21  ;;  %2323 = vmatmul.bf16.vlgmr.msra.gmra.mxu3 %v2160_v21  ;;  %v5284_v21 = vld [vmem:[#allocation35_spill] sm:$0xff] }
 0x507   :  { %2426 = vmatpush.bf16.msrb.mxu1 %v5263_v35  ;;  %2454 = vmatpush.bf16.msrb.mxu3 %v5264_v57  ;;  %v5289_v35 = vld [vmem:[#allocation37_spill] sm:$0xff]  ;;  %v5290_v57 = vld [vmem:[#allocation39_spill] sm:$0xff] }
 0x509   :  { %2414 = vmatpush.bf16.msrb.mxu0 %v5265_v12  ;;  %2442 = vmatpush.bf16.msrb.mxu2 %v5266_v7  ;;  %v5291_v12 = vld [vmem:[#allocation48_spill] sm:$0xff]  ;;  %v5292_v7 = vld [vmem:[#allocation50_spill] sm:$0xff] }
 0x50b   :  { %2427 = vmatpush.bf16.msrb.mxu1 %v5267_v3  ;;  %2455 = vmatpush.bf16.msrb.mxu3 %v5268_v62  ;;  %v5293_v3 = vld [vmem:[#allocation41_spill] sm:$0xff]  ;;  %v5294_v62 = vld [vmem:[#allocation43_spill] sm:$0xff] }
 0x50d   :  { %2415 = vmatpush.bf16.msrb.mxu0 %v5269_v33  ;;  %2443 = vmatpush.bf16.msrb.mxu2 %v5270_v59  ;;  %v5295_v33 = vld [vmem:[#allocation45_spill] sm:$0xff]  ;;  %v5296_v59 = vld [vmem:[#allocation47_spill] sm:$0xff] }
 0x50f   :  { %2428 = vmatpush.bf16.msrb.mxu1 %v5271_v37  ;;  %2456 = vmatpush.bf16.msrb.mxu3 %v5272_v26  ;;  %v5297_v37 = vld [vmem:[#allocation52_spill] sm:$0xff]  ;;  %v5298_v26 = vld [vmem:[#allocation54_spill] sm:$0xff] }
 0x511   :  { %2416 = vmatpush.bf16.msrb.mxu0 %v5273_v50  ;;  %2444 = vmatpush.bf16.msrb.mxu2 %v5274_v13  ;;  %v5299_v50 = vld [vmem:[#allocation49_spill] sm:$0xff]  ;;  %v5300_v13 = vld [vmem:[#allocation51_spill] sm:$0xff] }
 0x513   :  { %2429 = vmatpush.bf16.msrb.mxu1 %v5275_v52  ;;  %2457 = vmatpush.bf16.msrb.mxu3 %v5276_v54  ;;  %v5301_v52 = vld [vmem:[#allocation56_spill] sm:$0xff]  ;;  %v5302_v54 = vld [vmem:[#allocation58_spill] sm:$0xff] }
 0x515   :  { %2417 = vmatpush.bf16.msrb.mxu0 %v5277_v2  ;;  %2445 = vmatpush.bf16.msrb.mxu2 %v5278_v38  ;;  %v5303_v2 = vld [vmem:[#allocation53_spill] sm:$0xff]  ;;  %v5304_v38 = vld [vmem:[#allocation55_spill] sm:$0xff] }
 0x517   :  { %2430 = vmatpush.bf16.msrb.mxu1 %v5279_v32  ;;  %2458 = vmatpush.bf16.msrb.mxu3 %v5280_v9  ;;  %v5305_v32 = vld [vmem:[#allocation60_spill] sm:$0xff]  ;;  %v5306_v9 = vld [vmem:[#allocation62_spill] sm:$0xff] }
 0x519   :  { %2418 = vmatpush.bf16.msrb.mxu0 %v5281_v45  ;;  %2446 = vmatpush.bf16.msrb.mxu2 %v5282_v8  ;;  %v5307_v45 = vld [vmem:[#allocation57_spill] sm:$0xff]  ;;  %v5308_v8 = vld [vmem:[#allocation59_spill] sm:$0xff] }
 0x51b   :  { %2431 = vmatpush.bf16.msrb.mxu1 %v5283_v19  ;;  %2459 = vmatpush.bf16.msrb.mxu3 %v5284_v21  ;;  %v5309_v19 = vld [vmem:[#allocation64_spill] sm:$0xff]  ;;  %v5310_v21 = vld [vmem:[#allocation66_spill] sm:$0xff] }
 0x51d   :  { %2419 = vmatpush.bf16.msrb.mxu0 %v5285_v44  ;;  %2447 = vmatpush.bf16.msrb.mxu2 %v5286_v58  ;;  %v5311_v44 = vld [vmem:[#allocation61_spill] sm:$0xff]  ;;  %v5312_v58 = vld [vmem:[#allocation63_spill] sm:$0xff] }
 0x51f   :  { %2432 = vmatpush.bf16.msrb.mxu1 %v5289_v35  ;;  %2460 = vmatpush.bf16.msrb.mxu3 %v5290_v57  ;;  %v5315_v35 = vld [vmem:[#allocation65_spill] sm:$0xff]  ;;  %v5316_v57 = vld [vmem:[#allocation67_spill] sm:$0xff] }
 0x521   :  { %2468 = vmatpush.bf16.msra.mxu0 %v5287_v34  ;;  %2496 = vmatpush.bf16.msra.mxu2 %v5288_v56  ;;  %v5313_v34 = vld [vmem:[#allocation68_spill] sm:$0xff]  ;;  %v5314_v56 = vld [vmem:[#allocation70_spill] sm:$0xff] }
 0x523   :  { %2433 = vmatpush.bf16.msrb.mxu1 %v5293_v3  ;;  %2461 = vmatpush.bf16.msrb.mxu3 %v5294_v62  ;;  %v5319_v3 = vld [vmem:[#allocation69_spill] sm:$0xff]  ;;  %v5320_v62 = vld [vmem:[#allocation71_spill] sm:$0xff] }
 0x525   :  { %2469 = vmatpush.bf16.msra.mxu0 %v5291_v12  ;;  %2497 = vmatpush.bf16.msra.mxu2 %v5292_v7  ;;  %v5317_v12 = vld [vmem:[#allocation72_spill] sm:$0xff]  ;;  %v5318_v7 = vld [vmem:[#allocation74_spill] sm:$0xff] }
 0x527   :  { %2482 = vmatpush.bf16.msra.mxu1 %v5295_v33  ;;  %2510 = vmatpush.bf16.msra.mxu3 %v5296_v59  ;;  %v5321_v33 = vld [vmem:[#allocation73_spill] sm:$0xff]  ;;  %v5322_v59 = vld [vmem:[#allocation75_spill] sm:$0xff] }
 0x529   :  { %2470 = vmatpush.bf16.msra.mxu0 %v5297_v37  ;;  %2498 = vmatpush.bf16.msra.mxu2 %v5298_v26 }
 0x52b   :  { %2483 = vmatpush.bf16.msra.mxu1 %v5299_v50  ;;  %2511 = vmatpush.bf16.msra.mxu3 %v5300_v13 }
 0x52d   :  { %2471 = vmatpush.bf16.msra.mxu0 %v5301_v52  ;;  %2499 = vmatpush.bf16.msra.mxu2 %v5302_v54 }
 0x52f   :  { %2484 = vmatpush.bf16.msra.mxu1 %v5303_v2  ;;  %2512 = vmatpush.bf16.msra.mxu3 %v5304_v38 }
 0x531   :  { %2472 = vmatpush.bf16.msra.mxu0 %v5305_v32  ;;  %2500 = vmatpush.bf16.msra.mxu2 %v5306_v9  ;;  %v2147_v9 = vld [vmem:[#allocation2 + $0x240] sm:$0xff] }
 0x533   :  { %2485 = vmatpush.bf16.msra.mxu1 %v5307_v45  ;;  %2513 = vmatpush.bf16.msra.mxu3 %v5308_v8 }
 0x535   :  { %2473 = vmatpush.bf16.msra.mxu0 %v5309_v19  ;;  %2501 = vmatpush.bf16.msra.mxu2 %v5310_v21 }
 0x537   :  { %2486 = vmatpush.bf16.msra.mxu1 %v5311_v44  ;;  %2514 = vmatpush.bf16.msra.mxu3 %v5312_v58  ;;  %v2148_v58 = vld [vmem:[#allocation2 + $0x248] sm:$0xff] }
 0x539   :  { %2474 = vmatpush.bf16.msra.mxu0 %v5313_v34  ;;  %2502 = vmatpush.bf16.msra.mxu2 %v5314_v56 }
 0x53b   :  { %2487 = vmatpush.bf16.msra.mxu1 %v5315_v35  ;;  %2515 = vmatpush.bf16.msra.mxu3 %v5316_v57  ;;  %v2153_v35 = vld [vmem:[#allocation2 + $0x270] sm:$0xff] }
 0x53d   :  { %2475 = vmatpush.bf16.msra.mxu0 %v5317_v12  ;;  %2503 = vmatpush.bf16.msra.mxu2 %v5318_v7 }
 0x53f   :  { %2488 = vmatpush.bf16.msra.mxu1 %v5319_v3  ;;  %2516 = vmatpush.bf16.msra.mxu3 %v5320_v62 }
 0x543   :  { %2489 = vmatpush.bf16.msra.mxu1 %v5321_v33  ;;  %2517 = vmatpush.bf16.msra.mxu3 %v5322_v59 }
 0x55d   :  { %v2170_v37 = vpop.f32.mrf.mxu0 }
 0x563   :  { %v2184_v26 = vpop.f32.mrf.mxu1  ;;  %v2198_v50 = vpop.f32.mrf.mxu2 }
 0x564   :  { %v2185_v38 = vadd.f32 %v2184_v26, %v2170_v37  ;;  %v2154_v26 = vld [vmem:[#allocation2 + $0x278] sm:$0xff] }
 0x565   :  { %v2172_v13 = vpop.f32.mrf.mxu0 }
 0x566   :  { %v2329_v45 = vadd.f32 %v2185_v38, %v2147_v9  ;;  %v2149_v9 = vld [vmem:[#allocation2 + $0x250] sm:$0xff] }
 0x568   :  { %v2333_v56 = vmul.f32 0.5, %v2329_v45 }
 0x569   :  { %v2212_v52 = vpop.f32.mrf.mxu3 }
 0x56a   :  { %v2213_v19 = vadd.f32 %v2212_v52, %v2198_v50  ;;  %3307 = vtanh.f32 %v2333_v56 }
 0x56b   :  { %v2186_v54 = vpop.f32.mrf.mxu1  ;;  %v2200_v2 = vpop.f32.mrf.mxu2 }
 0x56c   :  { %v2187_v34 = vadd.f32 %v2186_v54, %v2172_v13  ;;  %v2330_v57 = vadd.f32 %v2213_v19, %v2148_v58  ;;  %v2155_v58 = vld [vmem:[#allocation2 + $0x280] sm:$0xff] }
 0x56d   :  { %v2226_v32 = vpop.f32.mrf.mxu0 }
 0x56e   :  { %v2331_v7 = vadd.f32 %v2187_v34, %v2153_v35  ;;  %v2334_v62 = vmul.f32 0.5, %v2330_v57 }
 0x570   :  { %v2335_v37 = vmul.f32 0.5, %v2331_v7  ;;  %v3308_v38 = vpop.eup %3307  ;;  %3309 = vtanh.f32 %v2334_v62 }
 0x571   :  { %v2214_v8 = vpop.f32.mrf.mxu3  ;;  %v2341_v19 = vmul.f32 0.5, %v3308_v38 }
 0x572   :  { %v2215_v33 = vadd.f32 %v2214_v8, %v2200_v2  ;;  %3311 = vtanh.f32 %v2335_v37 }
 0x573   :  { %v2240_v21 = vpop.f32.mrf.mxu1  ;;  %v2254_v44 = vpop.f32.mrf.mxu2  ;;  %v2345_v24 = vadd.f32 0.5, %v2341_v19 }
 0x574   :  { %v2332_v50 = vadd.f32 %v2215_v33, %v2154_v26  ;;  %v2241_v52 = vadd.f32 %v2240_v21, %v2226_v32  ;;  %v2156_v32 = vld [vmem:[#allocation2 + $0x288] sm:$0xff]  ;;  %v2151_v21 = vld [vmem:[#allocation2 + $0x260] sm:$0xff] }
 0x575   :  { %v2228_v12 = vpop.f32.mrf.mxu0 }
 0x576   :  { %v2336_v34 = vmul.f32 0.5, %v2332_v50  ;;  %v2349_v35 = vadd.f32 %v2241_v52, %v2149_v9  ;;  %v3310_v2 = vpop.eup %3309 }
 0x578   :  { %v3312_v16 = vpop.eup %3311  ;;  %3313 = vtanh.f32 %v2336_v34  ;;  %v2353_v37 = vmul.f32 0.5, %v2349_v35  ;;  %v2152_v35 = vld [vmem:[#allocation2 + $0x268] sm:$0xff] }
 0x579   :  { %v2268_v3 = vpop.f32.mrf.mxu3  ;;  %v2343_v38 = vmul.f32 0.5, %v3312_v16 }
 0x57a   :  { %v2269_v8 = vadd.f32 %v2268_v3, %v2254_v44  ;;  %3315 = vtanh.f32 %v2353_v37 }
 0x57b   :  { %v2242_v59 = vpop.f32.mrf.mxu1  ;;  %v2256_v17 = vpop.f32.mrf.mxu2 }
 0x57c   :  { %v2243_v13 = vadd.f32 %v2242_v59, %v2228_v12  ;;  %v2342_v59 = vmul.f32 0.5, %v3310_v2  ;;  %v2350_v50 = vadd.f32 %v2269_v8, %v2150_v46  ;;  %v2157_v2 = vld [vmem:[#allocation2 + $0x290] sm:$0xff] }
 0x57d   :  { %v2282_v54 = vpop.f32.mrf.mxu0 }
 0x57e   :  { %v2351_v7 = vadd.f32 %v2243_v13, %v2155_v58  ;;  %v2346_v58 = vadd.f32 0.5, %v2342_v59  ;;  %v3314_v34 = vpop.eup %3313 }
 0x57f   :  { %v2344_v8 = vmul.f32 0.5, %v3314_v34 }
 0x580   :  { %v2355_v52 = vmul.f32 0.5, %v2351_v7 }
 0x581   :  { %v2270_v45 = vpop.f32.mrf.mxu3 }
 0x582   :  { %v2271_v62 = vadd.f32 %v2270_v45, %v2256_v17  ;;  %3317 = vtanh.f32 %v2355_v52 }
 0x583   :  { %v2296_v56 = vpop.f32.mrf.mxu1  ;;  %v2310_v12 = vpop.f32.mrf.mxu2 }
 0x584   :  { %v2297_v57 = vadd.f32 %v2296_v56, %v2282_v54  ;;  %v2352_v54 = vadd.f32 %v2271_v62, %v2156_v32  ;;  %v2347_v56 = vadd.f32 0.5, %v2343_v38  ;;  %v2348_v38 = vadd.f32 0.5, %v2344_v8 }
 0x585   :  { %v2284_v13 = vpop.f32.mrf.mxu0 }
 0x586   :  { %v2369_v33 = vadd.f32 %v2297_v57, %v3861_v55  ;;  %v2354_v57 = vmul.f32 0.5, %v2350_v50 }
 0x588   :  { %v2373_v26 = vmul.f32 %v2369_v33, %v2345_v24  ;;  %v2356_v24 = vmul.f32 0.5, %v2352_v54 }
 0x589   :  { %v2324_v9 = vpop.f32.mrf.mxu3 }
 0x58a   :  { %v2377_v44 = vadd.f32 %v2373_v26, %v2151_v21  ;;  %v2325_v3 = vadd.f32 %v2324_v9, %v2310_v12  ;;  %v3316_v21 = vpop.eup %3315  ;;  %v2158_v9 = vld [vmem:[#allocation2 + $0x298] sm:$0xff] }
 0x58b   :  { %v2298_v19 = vpop.f32.mrf.mxu1  ;;  %v2312_v33 = vpop.f32.mrf.mxu2  ;;  %v2361_v52 = vmul.f32 0.5, %v3316_v21 }
 0x58c   :  { %v2370_v17 = vadd.f32 %v2325_v3, %v3864_v41  ;;  %v2299_v45 = vadd.f32 %v2298_v19, %v2284_v13  ;;  %3319 = vtanh.f32 %v2377_v44  ;;  %v3318_v37 = vpop.eup %3317 }
 0x58d   :  { %3321 = vtanh.f32 %v2354_v57  ;;  %v2363_v3 = vmul.f32 0.5, %v3318_v37 }
 0x58e   :  { %v2374_v46 = vmul.f32 %v2370_v17, %v2346_v58  ;;  %v2371_v16 = vadd.f32 %v2299_v45, %v3861_v55  ;;  %3323 = vtanh.f32 %v2356_v24  ;;  %v2365_v45 = vadd.f32 0.5, %v2361_v52  ;;  %v2405_v52 = vld [vmem:[#allocation2 + $0x2d8] sm:$0xff] }
 0x58f   :  { %v2367_v57 = vadd.f32 0.5, %v2363_v3 }
 0x590   :  { %v2378_v7 = vadd.f32 %v2374_v46, %v2152_v35  ;;  %v2375_v62 = vmul.f32 %v2371_v16, %v2347_v56 }
 0x591   :  { %v2326_v32 = vpop.f32.mrf.mxu3 }
 0x592   :  { %v2379_v12 = vadd.f32 %v2375_v62, %v2157_v2  ;;  %v2327_v59 = vadd.f32 %v2326_v32, %v2312_v33  ;;  %3325 = vtanh.f32 %v2378_v7  ;;  %v3320_v26 = vpop.eup %3319 }
 0x593   :  { %v3322_v44 = vpop.eup %3321  ;;  %v2385_v13 = vsub.f32 %v4448_v5, %v3320_v26 }
 0x594   :  { %3327 = vtanh.f32 %v2379_v12  ;;  %v2372_v50 = vadd.f32 %v2327_v59, %v3864_v41  ;;  %v3324_v19 = vpop.eup %3323  ;;  %v2362_v56 = vmul.f32 0.5, %v3322_v44 }
 0x595   :  { %v2389_v35 = vmul.f32 %v2385_v13, %v2365_v45  ;;  %v2364_v46 = vmul.f32 0.5, %v3324_v19 }
 0x596   :  { %v2376_v54 = vmul.f32 %v2372_v50, %v2348_v38  ;;  %v2366_v8 = vadd.f32 0.5, %v2362_v56  ;;  %v2400_v38 = vld [vmem:[#allocation2 + $0x2b0] sm:$0xff] }
 0x597   :  { %v4564_v7 = vadd.f32 %v3320_v26, %v2389_v35  ;;  %v2368_v33 = vadd.f32 0.5, %v2364_v46  ;;  %v2406_v46 = vld [vmem:[#allocation2 + $0x2e0] sm:$0xff] }
 0x598   :  { %v2380_v58 = vadd.f32 %v2376_v54, %v2158_v9  ;;  %v3326_v17 = vpop.eup %3325 }
 0x599   :  { %v2386_v16 = vsub.f32 %v4457_v25, %v3326_v17 }
 0x59a   :  { %v3328_v34 = vpop.eup %3327  ;;  %3329 = vtanh.f32 %v2380_v58  ;;  %v2401_v58 = vld [vmem:[#allocation2 + $0x2b8] sm:$0xff] }
 0x59b   :  { %v2387_v24 = vsub.f32 %v4450_v27, %v3328_v34  ;;  %v2390_v32 = vmul.f32 %v2386_v16, %v2366_v8 }
 0x59d   :  { %v2391_v2 = vmul.f32 %v2387_v24, %v2367_v57  ;;  %v4573_v27 = vadd.f32 %v3326_v17, %v2390_v32 }
 0x59f   :  { %v4566_v62 = vadd.f32 %v3328_v34, %v2391_v2 }
 0x5a0   :  { %v3330_v5 = vpop.eup %3329 }
 0x5a1   :  { %v2410_v21 = vpack.c.bf16 %v4566_v62, %v4564_v7  ;;  %v2388_v12 = vsub.f32 %v4459_v29, %v3330_v5 }
 0x5a3   :  { %v2392_v59 = vmul.f32 %v2388_v12, %v2368_v33  ;;  %2420 = vmatmul.bf16.vlgmr.msrb.gmra.mxu0 %v2410_v21  ;;  %2448 = vmatmul.bf16.vlgmr.msrb.gmra.mxu2 %v2410_v21 }
 0x5a4   :  { %2524 = vmatpush.bf16.msrb.mxu0 %v4919_v39  ;;  %2552 = vmatpush.bf16.msrb.mxu2 %v4920_v47  ;;  %v5323_v39 = vld [vmem:[#allocation98_spill] sm:$0xff]  ;;  %v5325_v47 = vld [vmem:[#allocation100_spill] sm:$0xff] }
 0x5a5   :  { %v4575_v25 = vadd.f32 %v3330_v5, %v2392_v59 }
 0x5a7   :  { %v2411_v37 = vpack.c.bf16 %v4575_v25, %v4573_v27 }
 0x5a8   :  { %2525 = vmatpush.bf16.msrb.mxu0 %v4921_v20  ;;  %2553 = vmatpush.bf16.msrb.mxu2 %v4922_v51  ;;  %v5326_v20 = vld [vmem:[#allocation101_spill] sm:$0xff] }
 0x5a9   :  { %2434 = vmatmul.bf16.vlgmr.msrb.gmra.mxu1 %v2411_v37  ;;  %2462 = vmatmul.bf16.vlgmr.msrb.gmra.mxu3 %v2411_v37 }
 0x5aa   :  { %2538 = vmatpush.bf16.msrb.mxu1 %v4923_v22  ;;  %2566 = vmatpush.bf16.msrb.mxu3 %v4924_v63 }
 0x5ac   :  { %2526 = vmatpush.bf16.msrb.mxu0 %v4925_v60  ;;  %2554 = vmatpush.bf16.msrb.mxu2 %v4926_v10  ;;  %v2398_v10 = vld [vmem:[#allocation2 + $0x2a0] sm:$0xff] }
 0x5ae   :  { %2539 = vmatpush.bf16.msrb.mxu1 %v4927_v0  ;;  %2567 = vmatpush.bf16.msrb.mxu3 %v4928_v1 }
 0x5b0   :  { %2527 = vmatpush.bf16.msrb.mxu0 %v4929_v14  ;;  %2555 = vmatpush.bf16.msrb.mxu2 %v4930_v31 }
 0x5b2   :  { %2540 = vmatpush.bf16.msrb.mxu1 %v4931_v11  ;;  %2568 = vmatpush.bf16.msrb.mxu3 %v4932_v43  ;;  %v2399_v43 = vld [vmem:[#allocation2 + $0x2a8] sm:$0xff] }
 0x5b3   :  { %2476 = vmatmul.bf16.vlgmr.msra.gmra.mxu0 %v2410_v21  ;;  %2504 = vmatmul.bf16.vlgmr.msra.gmra.mxu2 %v2410_v21 }
 0x5b4   :  { %2528 = vmatpush.bf16.msrb.mxu0 %v4933_v18  ;;  %2556 = vmatpush.bf16.msrb.mxu2 %v4934_v40 }
 0x5b6   :  { %2541 = vmatpush.bf16.msrb.mxu1 %v4935_v4  ;;  %2569 = vmatpush.bf16.msrb.mxu3 %v4936_v61  ;;  %v2404_v4 = vld [vmem:[#allocation2 + $0x2d0] sm:$0xff] }
 0x5b8   :  { %2529 = vmatpush.bf16.msrb.mxu0 %v4937_v23  ;;  %2557 = vmatpush.bf16.msrb.mxu2 %v3760_v49  ;;  %v5324_v49 = vld [vmem:[#allocation99_spill] sm:$0xff] }
 0x5b9   :  { %2490 = vmatmul.bf16.vlgmr.msra.gmra.mxu1 %v2411_v37  ;;  %2518 = vmatmul.bf16.vlgmr.msra.gmra.mxu3 %v2411_v37 }
 0x5ba   :  { %2542 = vmatpush.bf16.msrb.mxu1 %v4938_v53  ;;  %2570 = vmatpush.bf16.msrb.mxu3 %v4939_v6 }
 0x5bc   :  { %2530 = vmatpush.bf16.msrb.mxu0 %v3766_v30  ;;  %2558 = vmatpush.bf16.msrb.mxu2 %v3772_v48 }
 0x5be   :  { %2543 = vmatpush.bf16.msrb.mxu1 %v4940_v28  ;;  %2571 = vmatpush.bf16.msrb.mxu3 %v3763_v42 }
 0x5c0   :  { %2531 = vmatpush.bf16.msrb.mxu0 %v3778_v36  ;;  %2559 = vmatpush.bf16.msrb.mxu2 %v3784_v15 }
 0x5c2   :  { %2544 = vmatpush.bf16.msrb.mxu1 %v5323_v39  ;;  %2572 = vmatpush.bf16.msrb.mxu3 %v5324_v49 }
 0x5c3   :  { %2532 = vmatmul.bf16.vlgmr.msrb.gmra.mxu0 %v2410_v21  ;;  %2560 = vmatmul.bf16.vlgmr.msrb.gmra.mxu2 %v2410_v21 }
 0x5c6   :  { %2545 = vmatpush.bf16.msrb.mxu1 %v5325_v47  ;;  %2573 = vmatpush.bf16.msrb.mxu3 %v5326_v20  ;;  %v2407_v47 = vld [vmem:[#allocation2 + $0x2e8] sm:$0xff] }
 0x5c9   :  { %2546 = vmatmul.bf16.vlgmr.msrb.gmra.mxu1 %v2411_v37  ;;  %2574 = vmatmul.bf16.vlgmr.msrb.gmra.mxu3 %v2411_v37  ;;  %v2402_v37 = vld [vmem:[#allocation2 + $0x2c0] sm:$0xff] }
 0x620   :  { %v2421_v30 = vpop.f32.mrf.mxu0 }
 0x626   :  { %v2435_v48 = vpop.f32.mrf.mxu1  ;;  %v2449_v51 = vpop.f32.mrf.mxu2 }
 0x627   :  { %v2436_v15 = vadd.f32 %v2435_v48, %v2421_v30 }
 0x628   :  { %v2423_v42 = vpop.f32.mrf.mxu0 }
 0x629   :  { %v2580_v0 = vadd.f32 %v2436_v15, %v2398_v10 }
 0x62b   :  { %v2584_v18 = vmul.f32 0.5, %v2580_v0 }
 0x62c   :  { %v2463_v22 = vpop.f32.mrf.mxu3 }
 0x62d   :  { %v2464_v14 = vadd.f32 %v2463_v22, %v2449_v51  ;;  %3331 = vtanh.f32 %v2584_v18 }
 0x62e   :  { %v2437_v36 = vpop.f32.mrf.mxu1  ;;  %v2451_v63 = vpop.f32.mrf.mxu2 }
 0x62f   :  { %v2438_v40 = vadd.f32 %v2437_v36, %v2423_v42  ;;  %v2581_v61 = vadd.f32 %v2464_v14, %v2399_v43 }
 0x630   :  { %v2477_v60 = vpop.f32.mrf.mxu0 }
 0x631   :  { %v2582_v53 = vadd.f32 %v2438_v40, %v2404_v4  ;;  %v2585_v29 = vmul.f32 0.5, %v2581_v61  ;;  %v2408_v61 = vld [vmem:[#allocation2 + $0x2f0] sm:$0xff] }
 0x633   :  { %v2586_v9 = vmul.f32 0.5, %v2582_v53  ;;  %v3332_v3 = vpop.eup %3331  ;;  %3333 = vtanh.f32 %v2585_v29 }
 0x634   :  { %v2465_v1 = vpop.f32.mrf.mxu3  ;;  %v2592_v34 = vmul.f32 0.5, %v3332_v3 }
 0x635   :  { %v2466_v26 = vadd.f32 %v2465_v1, %v2451_v63  ;;  %3335 = vtanh.f32 %v2586_v9 }
 0x636   :  { %v2491_v31 = vpop.f32.mrf.mxu1  ;;  %v2505_v11 = vpop.f32.mrf.mxu2  ;;  %v2596_v5 = vadd.f32 0.5, %v2592_v34 }
 0x637   :  { %v2492_v28 = vadd.f32 %v2491_v31, %v2477_v60  ;;  %v2583_v13 = vadd.f32 %v2466_v26, %v2405_v52  ;;  %v2403_v31 = vld [vmem:[#allocation2 + $0x2c8] sm:$0xff] }
 0x638   :  { %v2479_v23 = vpop.f32.mrf.mxu0 }
 0x639   :  { %v2600_v44 = vadd.f32 %v2492_v28, %v2400_v38  ;;  %v2587_v35 = vmul.f32 0.5, %v2583_v13  ;;  %v3334_v8 = vpop.eup %3333 }
 0x63a   :  { %v2593_v49 = vmul.f32 0.5, %v3334_v8 }
 0x63b   :  { %v2604_v56 = vmul.f32 0.5, %v2600_v44  ;;  %v3336_v21 = vpop.eup %3335 }
 0x63c   :  { %v2519_v6 = vpop.f32.mrf.mxu3  ;;  %v2594_v48 = vmul.f32 0.5, %v3336_v21  ;;  %v2597_v10 = vadd.f32 0.5, %v2593_v49 }
 0x63d   :  { %v2520_v19 = vadd.f32 %v2519_v6, %v2505_v11  ;;  %3337 = vtanh.f32 %v2604_v56 }
 0x63e   :  { %v2493_v50 = vpop.f32.mrf.mxu1  ;;  %v2507_v54 = vpop.f32.mrf.mxu2  ;;  %3339 = vtanh.f32 %v2587_v35  ;;  %v2598_v11 = vadd.f32 0.5, %v2594_v48 }
 0x63f   :  { %v2494_v57 = vadd.f32 %v2493_v50, %v2479_v23  ;;  %v2601_v24 = vadd.f32 %v2520_v19, %v2401_v58  ;;  %v2409_v58 = vld [vmem:[#allocation2 + $0x2f8] sm:$0xff] }
 0x640   :  { %v2533_v17 = vpop.f32.mrf.mxu0 }
 0x641   :  { %v2602_v33 = vadd.f32 %v2494_v57, %v2406_v46  ;;  %v2605_v12 = vmul.f32 0.5, %v2601_v24 }
 0x643   :  { %v2606_v51 = vmul.f32 0.5, %v2602_v33  ;;  %3341 = vtanh.f32 %v2605_v12  ;;  %v3338_v60 = vpop.eup %3337 }
 0x644   :  { %v2521_v45 = vpop.f32.mrf.mxu3  ;;  %v3340_v14 = vpop.eup %3339  ;;  %v2612_v40 = vmul.f32 0.5, %v3338_v60 }
 0x645   :  { %v2522_v59 = vadd.f32 %v2521_v45, %v2507_v54  ;;  %v2595_v23 = vmul.f32 0.5, %v3340_v14 }
 0x646   :  { %v2547_v16 = vpop.f32.mrf.mxu1  ;;  %v2561_v39 = vpop.f32.mrf.mxu2  ;;  %v2616_v9 = vadd.f32 0.5, %v2612_v40 }
 0x647   :  { %v2548_v2 = vadd.f32 %v2547_v16, %v2533_v17  ;;  %v2603_v36 = vadd.f32 %v2522_v59, %v2407_v47  ;;  %v2599_v3 = vadd.f32 0.5, %v2595_v23 }
 0x648   :  { %v2535_v63 = vpop.f32.mrf.mxu0 }
 0x649   :  { %v2620_v32 = vadd.f32 %v2548_v2, %v3861_v55  ;;  %v2607_v4 = vmul.f32 0.5, %v2603_v36  ;;  %v3342_v28 = vpop.eup %3341 }
 0x64a   :  { %v2613_v13 = vmul.f32 0.5, %v3342_v28 }
 0x64b   :  { %v2624_v20 = vmul.f32 %v2620_v32, %v2596_v5 }
 0x64c   :  { %v2575_v30 = vpop.f32.mrf.mxu3  ;;  %v2617_v24 = vadd.f32 0.5, %v2613_v13 }
 0x64d   :  { %v2628_v42 = vadd.f32 %v2624_v20, %v2402_v37  ;;  %v2576_v22 = vadd.f32 %v2575_v30, %v2561_v39 }
 0x64e   :  { %v2549_v15 = vpop.f32.mrf.mxu1  ;;  %v2563_v29 = vpop.f32.mrf.mxu2 }
 0x64f   :  { %3343 = vtanh.f32 %v2628_v42  ;;  %v2621_v0 = vadd.f32 %v2576_v22, %v3864_v41  ;;  %v2550_v1 = vadd.f32 %v2549_v15, %v2535_v63 }
 0x650   :  { %3345 = vtanh.f32 %v2606_v51 }
 0x651   :  { %v2625_v43 = vmul.f32 %v2621_v0, %v2597_v10  ;;  %v2622_v18 = vadd.f32 %v2550_v1, %v3861_v55 }
 0x653   :  { %v2629_v53 = vadd.f32 %v2625_v43, %v2403_v31  ;;  %v2626_v6 = vmul.f32 %v2622_v18, %v2598_v11 }
 0x654   :  { %v2577_v26 = vpop.f32.mrf.mxu3 }
 0x655   :  { %v3344_v38 = vpop.eup %3343  ;;  %3347 = vtanh.f32 %v2629_v53  ;;  %v2630_v50 = vadd.f32 %v2626_v6, %v2408_v61  ;;  %v2578_v52 = vadd.f32 %v2577_v26, %v2563_v29 }
 0x656   :  { %3349 = vtanh.f32 %v2607_v4  ;;  %v2636_v54 = vsub.f32 %v4564_v7, %v3344_v38  ;;  %v3346_v44 = vpop.eup %3345 }
 0x657   :  { %3351 = vtanh.f32 %v2630_v50  ;;  %v2623_v55 = vadd.f32 %v2578_v52, %v3864_v41  ;;  %v2614_v45 = vmul.f32 0.5, %v3346_v44 }
 0x658   :  { %v2640_v19 = vmul.f32 %v2636_v54, %v2616_v9 }
 0x659   :  { %v2627_v17 = vmul.f32 %v2623_v55, %v2599_v3  ;;  %v2618_v7 = vadd.f32 0.5, %v2614_v45 }
 0x65a   :  { %v2644_v34 = vadd.f32 %v3344_v38, %v2640_v19 }
 0x65b   :  { %v3348_v56 = vpop.eup %3347  ;;  %v2631_v57 = vadd.f32 %v2627_v17, %v2409_v58 }
 0x65c   :  { %v3350_v35 = vpop.eup %3349  ;;  %2648 = vst [vmem:[#allocation8] sm:$0xff] %v2644_v34  ;;  %v2637_v46 = vsub.f32 %v4573_v27, %v3348_v56 }
 0x65d   :  { %v3352_v16 = vpop.eup %3351  ;;  %3353 = vtanh.f32 %v2631_v57  ;;  %v2615_v41 = vmul.f32 0.5, %v3350_v35 }
 0x65e   :  { %v2641_v2 = vmul.f32 %v2637_v46, %v2617_v24  ;;  %v2638_v8 = vsub.f32 %v4566_v62, %v3352_v16 }
 0x65f   :  { %v2619_v12 = vadd.f32 0.5, %v2615_v41 }
 0x660   :  { %v2645_v5 = vadd.f32 %v3348_v56, %v2641_v2  ;;  %v2642_v33 = vmul.f32 %v2638_v8, %v2618_v7 }
 0x662   :  { %2649 = vst [vmem:[#allocation8 + $0x8] sm:$0xff] %v2645_v5  ;;  %v2646_v32 = vadd.f32 %v3352_v16, %v2642_v33 }
 0x663   :  { %v3354_v21 = vpop.eup %3353 }
 0x664   :  { %2650 = vst [vmem:[#allocation8 + $0x10] sm:$0xff] %v2646_v32  ;;  %v2639_v59 = vsub.f32 %v4575_v25, %v3354_v21 }
 0x666   :  { %v2643_v27 = vmul.f32 %v2639_v59, %v2619_v12 }
 0x668   :  { %v2647_v62 = vadd.f32 %v3354_v21, %v2643_v27 }
 0x66a   :  { %2651 = vst [vmem:[#allocation8 + $0x18] sm:$0xff] %v2647_v62 }
 0x66b   :  { %2664 = dma.vmem_to_hbm [thread:$0]  %s2657_s2, 512, %s2659_s5, [#allocation4], %s3466_s6, %s3466_s6, %s3467_s7  }
 0x66c   :  { %3455 = dma.done.wait [#allocation4], 512  }
 0x66d   :  { %3456 = vsyncadd [#allocation4], 4294966784 }
 0x66e   :  { %2669 = vsyncpa [#allocation3], 1 }
 0x66f   :  { %2670 = vsyncpa [#allocation6], 1 }
 0x670   :  { %2671 = vsyncpa [#allocation4], 1 }

</bundles_post_ra>
